<compile_context>
chip_gen: v7x
topology: tpu7x:2x2x1
jax: 0.10.0
libtpu: 0.0.40
codegen_flags: <defaults>
</compile_context>

<pallas_src>
import functools

import jax
import jax.numpy as jnp
from jax.experimental import pallas as pl
from jax.experimental.pallas import tpu as pltpu


def _round_up(x, m):
    return ((x + m - 1) // m) * m


def ffn_kernel(x_ref, w1_ref, b1_ref, w2_ref, b2_ref, gamma_ref, beta_ref,
               o_ref, *, eps, inv_f):
    # x_ref: (tm, Fp); w1: (Fp, Dp); b1: (1, Dp); w2: (Dp, Fp); b2/gamma/beta: (1, Fp)
    x = x_ref[...]                      # native dtype; no whole-tile upcast

    # Linear 1 + ReLU: native-dtype operands into the MXU, f32 accumulate.
    h = jnp.dot(x, w1_ref[...], preferred_element_type=jnp.float32)
    h = h + b1_ref[...].astype(jnp.float32)
    h = jnp.maximum(h, 0.0)

    # Linear 2 (+ residual). Cast only the (tm, Dp) activation back to the weight
    # dtype so the second matmul also takes the fast native-dtype MXU path.
    y = jnp.dot(h.astype(w2_ref.dtype), w2_ref[...],
                preferred_element_type=jnp.float32)
    y = y + b2_ref[...].astype(jnp.float32) + x.astype(jnp.float32)

    # LayerNorm over the real F features. Padded columns of y are exactly zero
    # (zero-padded weights/bias/residual), so they drop out of both sums.
    # Fused single pass: sum and sum-of-squares, var = E[y^2] - mean^2.
    s1 = jnp.sum(y, axis=-1, keepdims=True)
    s2 = jnp.sum(y * y, axis=-1, keepdims=True)
    mean = s1 * inv_f
    var = jnp.maximum(s2 * inv_f - mean * mean, 0.0)
    inv = jax.lax.rsqrt(var + eps)                                   # EUP
    normed = (y - mean) * inv * gamma_ref[...].astype(jnp.float32) \
             + beta_ref[...].astype(jnp.float32)

    # Dropout (eval mode) = identity.
    o_ref[...] = normed.astype(o_ref.dtype)


def _make_ffn_call(rows_p, f_p, d_p, tile_rows, out_dtype, eps, inv_f,
                   single_buffer_weights):
    # Invariant operands (constant index_map): optionally single-buffer them so
    # whole-weight VMEM residency is not doubled by the default pipeliner.
    const_kwargs = dict(pipeline_mode=pl.Buffered(1)) if single_buffer_weights else {}

    def const_spec(shape):
        return pl.BlockSpec(shape, lambda i: (0, 0), **const_kwargs)

    kernel = functools.partial(ffn_kernel, eps=eps, inv_f=inv_f)

    return pl.pallas_call(
        kernel,
        out_shape=jax.ShapeDtypeStruct((rows_p, f_p), out_dtype),
        grid_spec=pltpu.PrefetchScalarGridSpec(
            num_scalar_prefetch=0,
            grid=(rows_p // tile_rows,),
            in_specs=[
                pl.BlockSpec((tile_rows, f_p), lambda i: (i, 0)),  # x rows (tiled)
                const_spec((f_p, d_p)),                            # w1 (whole)
                const_spec((1, d_p)),                              # b1
                const_spec((d_p, f_p)),                            # w2 (whole)
                const_spec((1, f_p)),                              # b2
                const_spec((1, f_p)),                              # gamma
                const_spec((1, f_p)),                              # beta
            ],
            out_specs=pl.BlockSpec((tile_rows, f_p), lambda i: (i, 0)),
        ),
        compiler_params=pltpu.CompilerParams(
            dimension_semantics=("parallel",),
            # Raise from the 16/32 MiB scoped default; 64 MiB is safe on every chip
            # (== v7x physical). For large F/D on v5e/v6e push toward ~100 MiB.
            vmem_limit_bytes=64 * 1024 * 1024,
        ),
    )


def ffn_forward(x, w1, b1, w2, b2, gamma, beta, *, eps=1e-5, tile_rows=256):
    B, S, F = x.shape
    D = w1.shape[1]
    rows = B * S

    # Pad rows up to the tile size (no divisibility requirement on B*S) and the
    # feature/hidden dims to multiples of 128 so the output slab is lane-dense.
    f_p = _round_up(F, 128)
    d_p = _round_up(D, 128)
    rows_p = _round_up(rows, tile_rows)

    x2d = jnp.pad(x.reshape(rows, F), ((0, rows_p - rows), (0, f_p - F)))
    w1p = jnp.pad(w1, ((0, f_p - F), (0, d_p - D)))
    b1p = jnp.pad(b1, (0, d_p - D)).reshape(1, d_p)
    w2p = jnp.pad(w2, ((0, d_p - D), (0, f_p - F)))
    b2p = jnp.pad(b2, (0, f_p - F)).reshape(1, f_p)
    gp = jnp.pad(gamma, (0, f_p - F)).reshape(1, f_p)
    bp = jnp.pad(beta, (0, f_p - F)).reshape(1, f_p)

    args = (x2d, w1p, b1p, w2p, b2p, gp, bp)
    inv_f = 1.0 / float(F)

    try:
        call = _make_ffn_call(rows_p, f_p, d_p, tile_rows, x.dtype,
                              float(eps), inv_f, single_buffer_weights=True)
        out2d = jax.block_until_ready(call(*args))
    except Exception:
        # Fallback if this JAX/Mosaic build rejects pl.Buffered(1) for these specs.
        call = _make_ffn_call(rows_p, f_p, d_p, tile_rows, x.dtype,
                              float(eps), inv_f, single_buffer_weights=False)
        out2d = jax.block_until_ready(call(*args))

    return out2d[:rows, :F].reshape(B, S, F)


def reference_ffn(x, w1, b1, w2, b2, gamma, beta, eps=1e-5):
    h = jnp.maximum(x @ w1 + b1, 0.0)
    y = h @ w2 + b2 + x
    mean = jnp.mean(y, axis=-1, keepdims=True)
    var = jnp.mean((y - mean) ** 2, axis=-1, keepdims=True)
    return (y - mean) / jnp.sqrt(var + eps) * gamma + beta


if __name__ == "__main__":
    # Small shapes: batch=2, seq=8, features_size=32, dim_feedforward=64
    B, S, F, D = 2, 8, 32, 64
    key = jax.random.PRNGKey(0)
    kx, kw1, kb1, kw2, kb2 = jax.random.split(key, 5)

    x = jax.random.normal(kx, (B, S, F), dtype=jnp.float32)

    # Deterministic parameter init (uniform, roughly PyTorch Linear scale)
    lim1 = 1.0 / (F ** 0.5)
    lim2 = 1.0 / (D ** 0.5)
    w1 = jax.random.uniform(kw1, (F, D), minval=-lim1, maxval=lim1, dtype=jnp.float32)
    b1 = jax.random.uniform(kb1, (D,), minval=-lim1, maxval=lim1, dtype=jnp.float32)
    w2 = jax.random.uniform(kw2, (D, F), minval=-lim2, maxval=lim2, dtype=jnp.float32)
    b2 = jax.random.uniform(kb2, (F,), minval=-lim2, maxval=lim2, dtype=jnp.float32)
    gamma = jnp.ones((F,), dtype=jnp.float32)   # LayerNorm weight
    beta = jnp.zeros((F,), dtype=jnp.float32)   # LayerNorm bias

    out = ffn_forward(x, w1, b1, w2, b2, gamma, beta)
    out = jax.block_until_ready(out)

    ref = reference_ffn(x, w1, b1, w2, b2, gamma, beta)
    assert out.shape == (B, S, F)
    assert jnp.allclose(out, ref, atol=1e-4, rtol=1e-4), "mismatch vs reference"

    print("KERNEL_OK")
</pallas_src>

<mosaic_0001>
module attributes {stable_mosaic.version = 11 : i64} {
  func.func @ffn_kernel(%arg0: i32, %arg1: memref<256x128xf32, #tpu.memory_space<vmem>>, %arg2: memref<128x128xf32, #tpu.memory_space<vmem>>, %arg3: memref<1x128xf32, #tpu.memory_space<vmem>>, %arg4: memref<128x128xf32, #tpu.memory_space<vmem>>, %arg5: memref<1x128xf32, #tpu.memory_space<vmem>>, %arg6: memref<1x128xf32, #tpu.memory_space<vmem>>, %arg7: memref<1x128xf32, #tpu.memory_space<vmem>>, %arg8: memref<256x128xf32, #tpu.memory_space<vmem>>) attributes {dimension_semantics = [#tpu.dimension_semantics<parallel>], iteration_bounds = array<i64: 1>, scalar_prefetch = 0 : i64, scratch_operands = 0 : i64, tpu.core_type = #tpu.core_type<tc>, window_params = [{transform_indices = @transform_0, window_bounds = array<i64: 256, 128>}, {pipeline_mode = #tpu.pipeline_mode<synchronous>, transform_indices = @transform_1, window_bounds = array<i64: 128, 128>}, {pipeline_mode = #tpu.pipeline_mode<synchronous>, transform_indices = @transform_2, window_bounds = array<i64: 1, 128>}, {pipeline_mode = #tpu.pipeline_mode<synchronous>, transform_indices = @transform_3, window_bounds = array<i64: 128, 128>}, {pipeline_mode = #tpu.pipeline_mode<synchronous>, transform_indices = @transform_4, window_bounds = array<i64: 1, 128>}, {pipeline_mode = #tpu.pipeline_mode<synchronous>, transform_indices = @transform_5, window_bounds = array<i64: 1, 128>}, {pipeline_mode = #tpu.pipeline_mode<synchronous>, transform_indices = @transform_6, window_bounds = array<i64: 1, 128>}, {transform_indices = @transform_7, window_bounds = array<i64: 256, 128>}]} {
    %c0 = arith.constant 0 : index
    %c0_0 = arith.constant 0 : index
    %0 = vector.load %arg1[%c0, %c0_0] : memref<256x128xf32, #tpu.memory_space<vmem>>, vector<256x128xf32>
    %c0_1 = arith.constant 0 : index
    %c0_2 = arith.constant 0 : index
    %1 = vector.load %arg2[%c0_1, %c0_2] : memref<128x128xf32, #tpu.memory_space<vmem>>, vector<128x128xf32>
    %cst = arith.constant dense<0.000000e+00> : vector<256x128xf32>
    %2 = tpu.matmul %0, %1, %cst {dimension_numbers = #tpu.dot_dimension_numbers<[1], [0], [0], [1], [0, 0, 1, 1], [], []>} : vector<256x128xf32>, vector<128x128xf32>, vector<256x128xf32> -> vector<256x128xf32>
    %c0_3 = arith.constant 0 : index
    %c0_4 = arith.constant 0 : index
    %3 = vector.load %arg3[%c0_3, %c0_4] : memref<1x128xf32, #tpu.memory_space<vmem>>, vector<1x128xf32>
    %4 = vector.broadcast %3 : vector<1x128xf32> to vector<256x128xf32>
    %5 = arith.addf %2, %4 : vector<256x128xf32>
    %cst_5 = arith.constant 0.000000e+00 : f32
    %6 = vector.broadcast %cst_5 : f32 to vector<256x128xf32>
    %7 = arith.maximumf %5, %6 : vector<256x128xf32>
    %c0_6 = arith.constant 0 : index
    %c0_7 = arith.constant 0 : index
    %8 = vector.load %arg4[%c0_6, %c0_7] : memref<128x128xf32, #tpu.memory_space<vmem>>, vector<128x128xf32>
    %cst_8 = arith.constant dense<0.000000e+00> : vector<256x128xf32>
    %9 = tpu.matmul %7, %8, %cst_8 {dimension_numbers = #tpu.dot_dimension_numbers<[1], [0], [0], [1], [0, 0, 1, 1], [], []>} : vector<256x128xf32>, vector<128x128xf32>, vector<256x128xf32> -> vector<256x128xf32>
    %c0_9 = arith.constant 0 : index
    %c0_10 = arith.constant 0 : index
    %10 = vector.load %arg5[%c0_9, %c0_10] : memref<1x128xf32, #tpu.memory_space<vmem>>, vector<1x128xf32>
    %11 = vector.broadcast %10 : vector<1x128xf32> to vector<256x128xf32>
    %12 = arith.addf %9, %11 : vector<256x128xf32>
    %13 = arith.addf %12, %0 : vector<256x128xf32>
    %cst_11 = arith.constant dense<0.000000e+00> : vector<256xf32>
    %14 = vector.multi_reduction <add>, %13, %cst_11 [1] : vector<256x128xf32> to vector<256xf32>
    %15 = vector.shape_cast %14 : vector<256xf32> to vector<256x1xf32>
    %16 = arith.mulf %13, %13 : vector<256x128xf32>
    %cst_12 = arith.constant dense<0.000000e+00> : vector<256xf32>
    %17 = vector.multi_reduction <add>, %16, %cst_12 [1] : vector<256x128xf32> to vector<256xf32>
    %18 = vector.shape_cast %17 : vector<256xf32> to vector<256x1xf32>
    %cst_13 = arith.constant 3.125000e-02 : f32
    %19 = vector.broadcast %cst_13 : f32 to vector<256x1xf32>
    %20 = arith.mulf %15, %19 : vector<256x1xf32>
    %cst_14 = arith.constant 3.125000e-02 : f32
    %21 = vector.broadcast %cst_14 : f32 to vector<256x1xf32>
    %22 = arith.mulf %18, %21 : vector<256x1xf32>
    %23 = arith.mulf %20, %20 : vector<256x1xf32>
    %24 = arith.subf %22, %23 : vector<256x1xf32>
    %cst_15 = arith.constant 0.000000e+00 : f32
    %25 = vector.broadcast %cst_15 : f32 to vector<256x1xf32>
    %26 = arith.maximumf %24, %25 : vector<256x1xf32>
    %cst_16 = arith.constant 9.99999974E-6 : f32
    %27 = vector.broadcast %cst_16 : f32 to vector<256x1xf32>
    %28 = arith.addf %26, %27 : vector<256x1xf32>
    %29 = math.rsqrt %28 : vector<256x1xf32>
    %30 = vector.broadcast %20 : vector<256x1xf32> to vector<256x128xf32>
    %31 = arith.subf %13, %30 : vector<256x128xf32>
    %32 = vector.broadcast %29 : vector<256x1xf32> to vector<256x128xf32>
    %33 = arith.mulf %31, %32 : vector<256x128xf32>
    %c0_17 = arith.constant 0 : index
    %c0_18 = arith.constant 0 : index
    %34 = vector.load %arg6[%c0_17, %c0_18] : memref<1x128xf32, #tpu.memory_space<vmem>>, vector<1x128xf32>
    %35 = vector.broadcast %34 : vector<1x128xf32> to vector<256x128xf32>
    %36 = arith.mulf %33, %35 : vector<256x128xf32>
    %c0_19 = arith.constant 0 : index
    %c0_20 = arith.constant 0 : index
    %37 = vector.load %arg7[%c0_19, %c0_20] : memref<1x128xf32, #tpu.memory_space<vmem>>, vector<1x128xf32>
    %38 = vector.broadcast %37 : vector<1x128xf32> to vector<256x128xf32>
    %39 = arith.addf %36, %38 : vector<256x128xf32>
    %c0_21 = arith.constant 0 : index
    %c0_22 = arith.constant 0 : index
    %40 = vector.load %arg8[%c0_21, %c0_22] : memref<256x128xf32, #tpu.memory_space<vmem>>, vector<256x128xf32>
    tpu.vector_store %arg8[%c0_21, %c0_22], %39 {strides = array<i32>} : memref<256x128xf32, #tpu.memory_space<vmem>>, vector<256x128xf32>,
    return
  }
  func.func @transform_0(%arg0: i32) -> (i32, i32) {
    %c0_i32 = arith.constant 0 : i32
    %c0_i32_0 = arith.constant 0 : i32
    return %arg0, %c0_i32 : i32, i32
  }
  func.func @transform_1(%arg0: i32) -> (i32, i32) {
    %c0_i32 = arith.constant 0 : i32
    %c0_i32_0 = arith.constant 0 : i32
    %c0_i32_1 = arith.constant 0 : i32
    return %c0_i32, %c0_i32_0 : i32, i32
  }
  func.func @transform_2(%arg0: i32) -> (i32, i32) {
    %c0_i32 = arith.constant 0 : i32
    %c0_i32_0 = arith.constant 0 : i32
    %c0_i32_1 = arith.constant 0 : i32
    return %c0_i32, %c0_i32_0 : i32, i32
  }
  func.func @transform_3(%arg0: i32) -> (i32, i32) {
    %c0_i32 = arith.constant 0 : i32
    %c0_i32_0 = arith.constant 0 : i32
    %c0_i32_1 = arith.constant 0 : i32
    return %c0_i32, %c0_i32_0 : i32, i32
  }
  func.func @transform_4(%arg0: i32) -> (i32, i32) {
    %c0_i32 = arith.constant 0 : i32
    %c0_i32_0 = arith.constant 0 : i32
    %c0_i32_1 = arith.constant 0 : i32
    return %c0_i32, %c0_i32_0 : i32, i32
  }
  func.func @transform_5(%arg0: i32) -> (i32, i32) {
    %c0_i32 = arith.constant 0 : i32
    %c0_i32_0 = arith.constant 0 : i32
    %c0_i32_1 = arith.constant 0 : i32
    return %c0_i32, %c0_i32_0 : i32, i32
  }
  func.func @transform_6(%arg0: i32) -> (i32, i32) {
    %c0_i32 = arith.constant 0 : i32
    %c0_i32_0 = arith.constant 0 : i32
    %c0_i32_1 = arith.constant 0 : i32
    return %c0_i32, %c0_i32_0 : i32, i32
  }
  func.func @transform_7(%arg0: i32) -> (i32, i32) {
    %c0_i32 = arith.constant 0 : i32
    %c0_i32_0 = arith.constant 0 : i32
    return %arg0, %c0_i32 : i32, i32
  }
}

module attributes {stable_mosaic.version = 11 : i64} {
  func.func @ffn_kernel(%arg0: i32, %arg1: memref<256x128xf32, #tpu.memory_space<vmem>>, %arg2: memref<128x128xf32, #tpu.memory_space<vmem>>, %arg3: memref<1x128xf32, #tpu.memory_space<vmem>>, %arg4: memref<128x128xf32, #tpu.memory_space<vmem>>, %arg5: memref<1x128xf32, #tpu.memory_space<vmem>>, %arg6: memref<1x128xf32, #tpu.memory_space<vmem>>, %arg7: memref<1x128xf32, #tpu.memory_space<vmem>>, %arg8: memref<256x128xf32, #tpu.memory_space<vmem>>) attributes {dimension_semantics = [#tpu.dimension_semantics<parallel>], iteration_bounds = array<i64: 1>, scalar_prefetch = 0 : i64, scratch_operands = 0 : i64, tpu.core_type = #tpu.core_type<tc>, window_params = [{transform_indices = @transform_0, window_bounds = array<i64: 256, 128>}, {pipeline_mode = #tpu.pipeline_mode<synchronous>, transform_indices = @transform_1, window_bounds = array<i64: 128, 128>}, {pipeline_mode = #tpu.pipeline_mode<synchronous>, transform_indices = @transform_2, window_bounds = array<i64: 1, 128>}, {pipeline_mode = #tpu.pipeline_mode<synchronous>, transform_indices = @transform_3, window_bounds = array<i64: 128, 128>}, {pipeline_mode = #tpu.pipeline_mode<synchronous>, transform_indices = @transform_4, window_bounds = array<i64: 1, 128>}, {pipeline_mode = #tpu.pipeline_mode<synchronous>, transform_indices = @transform_5, window_bounds = array<i64: 1, 128>}, {pipeline_mode = #tpu.pipeline_mode<synchronous>, transform_indices = @transform_6, window_bounds = array<i64: 1, 128>}, {transform_indices = @transform_7, window_bounds = array<i64: 256, 128>}]} {
    %c0 = arith.constant 0 : index
    %c0_0 = arith.constant 0 : index
    %0 = vector.load %arg1[%c0, %c0_0] : memref<256x128xf32, #tpu.memory_space<vmem>>, vector<256x128xf32>
    %c0_1 = arith.constant 0 : index
    %c0_2 = arith.constant 0 : index
    %1 = vector.load %arg2[%c0_1, %c0_2] : memref<128x128xf32, #tpu.memory_space<vmem>>, vector<128x128xf32>
    %cst = arith.constant dense<0.000000e+00> : vector<256x128xf32>
    %2 = tpu.matmul %0, %1, %cst {dimension_numbers = #tpu.dot_dimension_numbers<[1], [0], [0], [1], [0, 0, 1, 1], [], []>} : vector<256x128xf32>, vector<128x128xf32>, vector<256x128xf32> -> vector<256x128xf32>
    %c0_3 = arith.constant 0 : index
    %c0_4 = arith.constant 0 : index
    %3 = vector.load %arg3[%c0_3, %c0_4] : memref<1x128xf32, #tpu.memory_space<vmem>>, vector<1x128xf32>
    %4 = vector.broadcast %3 : vector<1x128xf32> to vector<256x128xf32>
    %5 = arith.addf %2, %4 : vector<256x128xf32>
    %cst_5 = arith.constant 0.000000e+00 : f32
    %6 = vector.broadcast %cst_5 : f32 to vector<256x128xf32>
    %7 = arith.maximumf %5, %6 : vector<256x128xf32>
    %c0_6 = arith.constant 0 : index
    %c0_7 = arith.constant 0 : index
    %8 = vector.load %arg4[%c0_6, %c0_7] : memref<128x128xf32, #tpu.memory_space<vmem>>, vector<128x128xf32>
    %cst_8 = arith.constant dense<0.000000e+00> : vector<256x128xf32>
    %9 = tpu.matmul %7, %8, %cst_8 {dimension_numbers = #tpu.dot_dimension_numbers<[1], [0], [0], [1], [0, 0, 1, 1], [], []>} : vector<256x128xf32>, vector<128x128xf32>, vector<256x128xf32> -> vector<256x128xf32>
    %c0_9 = arith.constant 0 : index
    %c0_10 = arith.constant 0 : index
    %10 = vector.load %arg5[%c0_9, %c0_10] : memref<1x128xf32, #tpu.memory_space<vmem>>, vector<1x128xf32>
    %11 = vector.broadcast %10 : vector<1x128xf32> to vector<256x128xf32>
    %12 = arith.addf %9, %11 : vector<256x128xf32>
    %13 = arith.addf %12, %0 : vector<256x128xf32>
    %cst_11 = arith.constant dense<0.000000e+00> : vector<256xf32>
    %14 = vector.multi_reduction <add>, %13, %cst_11 [1] : vector<256x128xf32> to vector<256xf32>
    %15 = vector.shape_cast %14 : vector<256xf32> to vector<256x1xf32>
    %16 = arith.mulf %13, %13 : vector<256x128xf32>
    %cst_12 = arith.constant dense<0.000000e+00> : vector<256xf32>
    %17 = vector.multi_reduction <add>, %16, %cst_12 [1] : vector<256x128xf32> to vector<256xf32>
    %18 = vector.shape_cast %17 : vector<256xf32> to vector<256x1xf32>
    %cst_13 = arith.constant 3.125000e-02 : f32
    %19 = vector.broadcast %cst_13 : f32 to vector<256x1xf32>
    %20 = arith.mulf %15, %19 : vector<256x1xf32>
    %cst_14 = arith.constant 3.125000e-02 : f32
    %21 = vector.broadcast %cst_14 : f32 to vector<256x1xf32>
    %22 = arith.mulf %18, %21 : vector<256x1xf32>
    %23 = arith.mulf %20, %20 : vector<256x1xf32>
    %24 = arith.subf %22, %23 : vector<256x1xf32>
    %cst_15 = arith.constant 0.000000e+00 : f32
    %25 = vector.broadcast %cst_15 : f32 to vector<256x1xf32>
    %26 = arith.maximumf %24, %25 : vector<256x1xf32>
    %cst_16 = arith.constant 9.99999974E-6 : f32
    %27 = vector.broadcast %cst_16 : f32 to vector<256x1xf32>
    %28 = arith.addf %26, %27 : vector<256x1xf32>
    %29 = math.rsqrt %28 : vector<256x1xf32>
    %30 = vector.broadcast %20 : vector<256x1xf32> to vector<256x128xf32>
    %31 = arith.subf %13, %30 : vector<256x128xf32>
    %32 = vector.broadcast %29 : vector<256x1xf32> to vector<256x128xf32>
    %33 = arith.mulf %31, %32 : vector<256x128xf32>
    %c0_17 = arith.constant 0 : index
    %c0_18 = arith.constant 0 : index
    %34 = vector.load %arg6[%c0_17, %c0_18] : memref<1x128xf32, #tpu.memory_space<vmem>>, vector<1x128xf32>
    %35 = vector.broadcast %34 : vector<1x128xf32> to vector<256x128xf32>
    %36 = arith.mulf %33, %35 : vector<256x128xf32>
    %c0_19 = arith.constant 0 : index
    %c0_20 = arith.constant 0 : index
    %37 = vector.load %arg7[%c0_19, %c0_20] : memref<1x128xf32, #tpu.memory_space<vmem>>, vector<1x128xf32>
    %38 = vector.broadcast %37 : vector<1x128xf32> to vector<256x128xf32>
    %39 = arith.addf %36, %38 : vector<256x128xf32>
    %c0_21 = arith.constant 0 : index
    %c0_22 = arith.constant 0 : index
    %40 = vector.load %arg8[%c0_21, %c0_22] : memref<256x128xf32, #tpu.memory_space<vmem>>, vector<256x128xf32>
    tpu.vector_store %arg8[%c0_21, %c0_22], %39 {strides = array<i32>} : memref<256x128xf32, #tpu.memory_space<vmem>>, vector<256x128xf32>,
    return
  }
  func.func @transform_0(%arg0: i32) -> (i32, i32) {
    %c0_i32 = arith.constant 0 : i32
    %c0_i32_0 = arith.constant 0 : i32
    return %arg0, %c0_i32 : i32, i32
  }
  func.func @transform_1(%arg0: i32) -> (i32, i32) {
    %c0_i32 = arith.constant 0 : i32
    %c0_i32_0 = arith.constant 0 : i32
    %c0_i32_1 = arith.constant 0 : i32
    return %c0_i32, %c0_i32_0 : i32, i32
  }
  func.func @transform_2(%arg0: i32) -> (i32, i32) {
    %c0_i32 = arith.constant 0 : i32
    %c0_i32_0 = arith.constant 0 : i32
    %c0_i32_1 = arith.constant 0 : i32
    return %c0_i32, %c0_i32_0 : i32, i32
  }
  func.func @transform_3(%arg0: i32) -> (i32, i32) {
    %c0_i32 = arith.constant 0 : i32
    %c0_i32_0 = arith.constant 0 : i32
    %c0_i32_1 = arith.constant 0 : i32
    return %c0_i32, %c0_i32_0 : i32, i32
  }
  func.func @transform_4(%arg0: i32) -> (i32, i32) {
    %c0_i32 = arith.constant 0 : i32
    %c0_i32_0 = arith.constant 0 : i32
    %c0_i32_1 = arith.constant 0 : i32
    return %c0_i32, %c0_i32_0 : i32, i32
  }
  func.func @transform_5(%arg0: i32) -> (i32, i32) {
    %c0_i32 = arith.constant 0 : i32
    %c0_i32_0 = arith.constant 0 : i32
    %c0_i32_1 = arith.constant 0 : i32
    return %c0_i32, %c0_i32_0 : i32, i32
  }
  func.func @transform_6(%arg0: i32) -> (i32, i32) {
    %c0_i32 = arith.constant 0 : i32
    %c0_i32_0 = arith.constant 0 : i32
    %c0_i32_1 = arith.constant 0 : i32
    return %c0_i32, %c0_i32_0 : i32, i32
  }
  func.func @transform_7(%arg0: i32) -> (i32, i32) {
    %c0_i32 = arith.constant 0 : i32
    %c0_i32_0 = arith.constant 0 : i32
    return %arg0, %c0_i32 : i32, i32
  }
}

</mosaic_0001>

<bundles_post_ra>
// kernel: tpu_custom_call.1
= control target key start
LH: loop header
LB: loop body
LE: loop exit
PB: predicated region body
PF: predicated region fallthrough
CT: control target
= control target key end

     0   :  { %12 = vsyncpa [#allocation3], 0  ;;  %s2666_s0 = inlined_call_operand.hbm [shape: f32[256,128], index: 0, kind: input, shape index: {}]   ;;  %s2667_s1 = inlined_call_operand.hbm [shape: f32[128,128], index: 1, kind: input, shape index: {}]   ;;  %s2668_s2 = inlined_call_operand.hbm [shape: f32[1,128], index: 2, kind: input, shape index: {}]   ;;  %s2669_s3 = inlined_call_operand.hbm [shape: f32[128,128], index: 3, kind: input, shape index: {}]   ;;  %s2670_s4 = inlined_call_operand.hbm [shape: f32[1,128], index: 4, kind: input, shape index: {}]   ;;  %s2671_s5 = inlined_call_operand.hbm [shape: f32[1,128], index: 5, kind: input, shape index: {}]   ;;  %s2672_s6 = inlined_call_operand.hbm [shape: f32[1,128], index: 6, kind: input, shape index: {}]   ;;  %s2673_s7 = inlined_call_operand.hbm [shape: f32[256,128], index: 7, kind: output, shape index: {}]  }
   0x1   :  { %13 = vsyncpa [#allocation6], 0 }
   0x2   :  { %14 = vsyncpa [#allocation9], 0 }
   0x3   :  { %15 = vsyncpa [#allocation12], 0 }
   0x4   :  { %16 = vsyncpa [#allocation4], 0  ;;  %s1868_s24 = smov [#allocation5]   ;;  %s1869_s26 = smov [#allocation8]  }
   0x5   :  { %s34_s25 = sshll.u32 %s1868_s24, 4  ;;  %s56_s27 = sshll.u32 %s1869_s26, 4  ;;  %s35_s25 = int_to_ptr.vmem [resolvable:$true] %s34_s25  ;;  %s1918_s27 = int_to_ptr.vmem [resolvable:$true] %s56_s27 }
   0x6   :  { %s1682_s30 = scalar_lea.hbm %s2667_s1, 2048 }
   0x7   :  { %p1683_p0 = scmp.ne.s32.totalorder %s2667_s1, %s1682_s30  ;;  %p1686_p1 = scmp.lt.u32.totalorder %s1682_s30, %s2667_s1 }
   0x9   :  { %p1688_p2 = pnand %p1686_p1, %p1683_p0 }
   0xb   :  { %1691 = shalt.err (!%p1688_p2)
}
   0xc   :  { %s1692_s12 = scalar_lea.vmem %s35_s25, 2048  ;;  %p1697_p4 = scmp.lt.s32.totalorder %s35_s25, %s35_s25 }
   0xd   :  { %p1693_p3 = scmp.ne.s32.totalorder %s35_s25, %s1692_s12  ;;  %p1698_p5 = scmp.lt.s32.totalorder %s1692_s12, %s1692_s12 }
   0xf   :  { %p1699_p6 = por %p1698_p5, %p1697_p4 }
  0x11   :  { %p1700_p7 = pnand %p1699_p6, %p1693_p3 }
  0x13   :  { %1703 = shalt.err (!%p1700_p7)
}
  0x14   :  { %s1870_s13 = smov 128   ;;  %s1871_s14 = smov 8  }
  0x15   :  { %40 = dma.hbm_to_vmem [thread:$0]  %s2667_s1, 2048, %s35_s25, [#allocation6], %s1870_s13, %s1870_s13, %s1871_s14  }
  0x16   :  { %s1704_s19 = scalar_lea.hbm %s2669_s3, 2048 }
  0x17   :  { %p1705_p8 = scmp.ne.s32.totalorder %s2669_s3, %s1704_s19  ;;  %p1708_p9 = scmp.lt.u32.totalorder %s1704_s19, %s2669_s3 }
  0x19   :  { %p1710_p10 = pnand %p1708_p9, %p1705_p8 }
  0x1b   :  { %1713 = shalt.err (!%p1710_p10)
}
  0x1c   :  { %s1714_s24 = scalar_lea.vmem %s1918_s27, 2048  ;;  %p1719_p12 = scmp.lt.s32.totalorder %s1918_s27, %s1918_s27 }
  0x1d   :  { %p1715_p11 = scmp.ne.s32.totalorder %s1918_s27, %s1714_s24  ;;  %p1720_p13 = scmp.lt.s32.totalorder %s1714_s24, %s1714_s24 }
  0x1f   :  { %p1721_p0 = por %p1720_p13, %p1719_p12 }
  0x21   :  { %p1722_p1 = pnand %p1721_p0, %p1715_p11 }
  0x23   :  { %1725 = shalt.err (!%p1722_p1)
}
  0x24   :  { %62 = dma.hbm_to_vmem [thread:$0]  %s2669_s3, 2048, %s1918_s27, [#allocation9], %s1870_s13, %s1870_s13, %s1871_s14  }
  0x25   :  { %s1872_s26 = smov [#allocation11]   ;;  %s1873_s29 = smov [#allocation2]  }
  0x26   :  { %s79_s28 = sshll.u32 %s1872_s26, 4  ;;  %s22_s30 = sshll.u32 %s1873_s29, 4  ;;  %s80_s28 = int_to_ptr.vmem [resolvable:$true] %s79_s28  ;;  %s1955_s30 = int_to_ptr.vmem [resolvable:$true] %s22_s30 }
  0x27   :  { %s1726_s10 = scalar_lea.hbm %s2671_s5, 16 }
  0x28   :  { %p1727_p2 = scmp.ne.s32.totalorder %s2671_s5, %s1726_s10  ;;  %p1730_p3 = scmp.lt.u32.totalorder %s1726_s10, %s2671_s5 }
  0x2a   :  { %p1732_p4 = pnand %p1730_p3, %p1727_p2 }
  0x2c   :  { %1735 = shalt.err (!%p1732_p4)
}
  0x2d   :  { %s1736_s3 = scalar_lea.vmem %s80_s28, 16  ;;  %s1740_s27 = scalar_lea.vmem %s80_s28, 32 }
  0x2e   :  { %p1737_p5 = scmp.ne.s32.totalorder %s80_s28, %s1736_s3  ;;  %p1741_p6 = scmp.lt.s32.totalorder %s80_s28, %s80_s28 }
  0x2f   :  { %p1742_p7 = scmp.lt.s32.totalorder %s1740_s27, %s1736_s3 }
  0x31   :  { %p1743_p8 = por %p1742_p7, %p1741_p6 }
  0x33   :  { %p1744_p9 = pnand %p1743_p8, %p1737_p5 }
  0x35   :  { %1747 = shalt.err (!%p1744_p9)
}
  0x36   :  { %82 = dma.hbm_to_vmem [thread:$0]  %s2671_s5, 16, %s80_s28, [#allocation12]  }
  0x37   :  { %s1748_s21 = scalar_lea.hbm %s2666_s0, 4096 }
  0x38   :  { %p1749_p10 = scmp.ne.s32.totalorder %s2666_s0, %s1748_s21  ;;  %p1752_p11 = scmp.lt.u32.totalorder %s1748_s21, %s2666_s0 }
  0x3a   :  { %p1754_p12 = pnand %p1752_p11, %p1749_p10 }
  0x3c   :  { %1757 = shalt.err (!%p1754_p12)
}
  0x3d   :  { %s1758_s25 = scalar_lea.vmem %s1955_s30, 4096  ;;  %p1763_p0 = scmp.lt.s32.totalorder %s1955_s30, %s1955_s30 }
  0x3e   :  { %p1759_p13 = scmp.ne.s32.totalorder %s1955_s30, %s1758_s25  ;;  %p1764_p1 = scmp.lt.s32.totalorder %s1758_s25, %s1758_s25 }
  0x40   :  { %p1765_p2 = por %p1764_p1, %p1763_p0 }
  0x42   :  { %p1766_p3 = pnand %p1765_p2, %p1759_p13 }
  0x44   :  { %1769 = shalt.err (!%p1766_p3)
}
  0x45   :  { %28 = dma.hbm_to_vmem [thread:$0]  %s2666_s0, 4096, %s1955_s30, [#allocation3], %s1870_s13, %s1870_s13, %s1871_s14  }
  0x46   :  { %s1874_s28 = smov [#allocation7]   ;;  %s1875_s8 = smov [#allocation10]  }
  0x47   :  { %s47_s29 = sshll.u32 %s1874_s28, 4  ;;  %s69_s9 = sshll.u32 %s1875_s8, 4  ;;  %s48_s29 = int_to_ptr.vmem [resolvable:$true] %s47_s29  ;;  %s70_s9 = int_to_ptr.vmem [resolvable:$true] %s69_s9 }
  0x48   :  { %s1770_s12 = scalar_lea.hbm %s2668_s2, 16 }
  0x49   :  { %p1771_p4 = scmp.ne.s32.totalorder %s2668_s2, %s1770_s12  ;;  %p1774_p5 = scmp.lt.u32.totalorder %s1770_s12, %s2668_s2 }
  0x4b   :  { %p1776_p6 = pnand %p1774_p5, %p1771_p4 }
  0x4d   :  { %1779 = shalt.err (!%p1776_p6)
}
  0x4e   :  { %s1780_s0 = scalar_lea.vmem %s48_s29, 16  ;;  %s1784_s30 = scalar_lea.vmem %s48_s29, 32 }
  0x4f   :  { %p1781_p7 = scmp.ne.s32.totalorder %s48_s29, %s1780_s0  ;;  %p1785_p8 = scmp.lt.s32.totalorder %s48_s29, %s48_s29 }
  0x50   :  { %p1786_p9 = scmp.lt.s32.totalorder %s1784_s30, %s1780_s0 }
  0x52   :  { %p1787_p10 = por %p1786_p9, %p1785_p8 }
  0x54   :  { %p1788_p11 = pnand %p1787_p10, %p1781_p7 }
  0x56   :  { %1791 = shalt.err (!%p1788_p11)
}
  0x57   :  { %50 = dma.hbm_to_vmem [thread:$0]  %s2668_s2, 16, %s48_s29, [#allocation6]  }
  0x58   :  { %s1792_s21 = scalar_lea.hbm %s2670_s4, 16 }
  0x59   :  { %p1793_p12 = scmp.ne.s32.totalorder %s2670_s4, %s1792_s21  ;;  %p1796_p13 = scmp.lt.u32.totalorder %s1792_s21, %s2670_s4 }
  0x5b   :  { %p1798_p0 = pnand %p1796_p13, %p1793_p12 }
  0x5d   :  { %1801 = shalt.err (!%p1798_p0)
}
  0x5e   :  { %s1802_s25 = scalar_lea.vmem %s70_s9, 16  ;;  %s1806_s5 = scalar_lea.vmem %s70_s9, 32 }
  0x5f   :  { %p1803_p1 = scmp.ne.s32.totalorder %s70_s9, %s1802_s25  ;;  %p1807_p2 = scmp.lt.s32.totalorder %s70_s9, %s70_s9 }
  0x60   :  { %p1808_p3 = scmp.lt.s32.totalorder %s1806_s5, %s1802_s25 }
  0x62   :  { %p1809_p4 = por %p1808_p3, %p1807_p2 }
  0x64   :  { %p1810_p5 = pnand %p1809_p4, %p1803_p1 }
  0x66   :  { %1813 = shalt.err (!%p1810_p5)
}
  0x67   :  { %72 = dma.hbm_to_vmem [thread:$0]  %s2670_s4, 16, %s70_s9, [#allocation9]  }
  0x68   :  { %s1876_s28 = smov [#allocation13]   ;;  %s1814_s11 = scalar_lea.hbm %s2672_s6, 16 }
  0x69   :  { %s89_s29 = sshll.u32 %s1876_s28, 4  ;;  %p1815_p6 = scmp.ne.s32.totalorder %s2672_s6, %s1814_s11  ;;  %s90_s29 = int_to_ptr.vmem [resolvable:$true] %s89_s29 }
  0x6a   :  { %p1818_p7 = scmp.lt.u32.totalorder %s1814_s11, %s2672_s6 }
  0x6c   :  { %p1820_p8 = pnand %p1818_p7, %p1815_p6 }
  0x6e   :  { %1823 = shalt.err (!%p1820_p8)
}
  0x6f   :  { %s1824_s27 = scalar_lea.vmem %s90_s29, 16  ;;  %s1828_s4 = scalar_lea.vmem %s90_s29, 32 }
  0x70   :  { %p1825_p9 = scmp.ne.s32.totalorder %s90_s29, %s1824_s27  ;;  %p1829_p10 = scmp.lt.s32.totalorder %s90_s29, %s90_s29 }
  0x71   :  { %p1830_p11 = scmp.lt.s32.totalorder %s1828_s4, %s1824_s27 }
  0x73   :  { %p1831_p12 = por %p1830_p11, %p1829_p10 }
  0x75   :  { %p1832_p13 = pnand %p1831_p12, %p1825_p9 }
  0x77   :  { %1835 = shalt.err (!%p1832_p13)
}
  0x78   :  { %92 = dma.hbm_to_vmem [thread:$0]  %s2672_s6, 16, %s90_s29, [#allocation12]  }
  0x79   :  { %1858 = dma.done.wait [#allocation3], 4096  }
  0x7a   :  { %1859 = vsyncadd [#allocation3], 4294963200 }
  0x7b   :  { %1860 = dma.done.wait [#allocation6], 2064  }
  0x7c   :  { %1861 = vsyncadd [#allocation6], 4294965232 }
  0x7d   :  { %1862 = dma.done.wait [#allocation9], 2064  }
  0x7e   :  { %1863 = vsyncadd [#allocation9], 4294965232 }
  0x7f   :  { %1864 = dma.done.wait [#allocation12], 32  }
  0x80   :  { %1865 = vsyncadd [#allocation12], 4294967264  ;;  %v146_v0 = vld [vmem:[#allocation5] sm:$0xff]  ;;  %v147_v1 = vld [vmem:[#allocation5 + $0x8] sm:$0xff]  ;;  %s1877_s6 = smov [#allocation14]  }
  0x81   :  { %v148_v2 = vld [vmem:[#allocation5 + $0x10] sm:$0xff]  ;;  %v1544_v3 = vpack.c.bf16 %v147_v1, %v146_v0  ;;  %v149_v4 = vld [vmem:[#allocation5 + $0x18] sm:$0xff]  ;;  %v150_v6 = vld [vmem:[#allocation5 + $0x20] sm:$0xff]  ;;  %s1269_s30 = sshll.u32 %s1877_s6, 4  ;;  %s1270_s30 = int_to_ptr.vmem [resolvable:$true] %s1269_s30 }
  0x82   :  { %v1548_v5 = vpack.c.bf16 %v149_v4, %v148_v2  ;;  %v151_v7 = vld [vmem:[#allocation5 + $0x28] sm:$0xff]  ;;  %v2025_v9 = vld [vmem:[#allocation2] sm:$0xff]  ;;  %v152_v10 = vld [vmem:[#allocation5 + $0x30] sm:$0xff]  ;;  %s1836_s17 = scalar_lea.vmem %s1270_s30, 4096  ;;  %p1841_p1 = scmp.lt.s32.totalorder %s1270_s30, %s1270_s30 }
  0x83   :  { %1545 = vmatprep.subr.bf16.mxu0 %v1544_v3  ;;  %v1552_v8 = vpack.c.bf16 %v151_v7, %v150_v6  ;;  %v153_v11 = vld [vmem:[#allocation5 + $0x38] sm:$0xff]  ;;  %1416 = vmatprep.mubr.f32.mxu0 %v2025_v9  ;;  %v154_v13 = vld [vmem:[#allocation5 + $0x40] sm:$0xff]  ;;  %v155_v14 = vld [vmem:[#allocation5 + $0x48] sm:$0xff]  ;;  %p1837_p0 = scmp.ne.s32.totalorder %s1270_s30, %s1836_s17  ;;  %p1842_p2 = scmp.lt.s32.totalorder %s1836_s17, %s1836_s17 }
  0x84   :  { %1547 = vmatpush3.bf16.msra.mxu0 %v1544_v3  ;;  %v1556_v12 = vpack.c.bf16 %v153_v11, %v152_v10  ;;  %v1560_v15 = vpack.c.bf16 %v155_v14, %v154_v13  ;;  %v156_v16 = vld [vmem:[#allocation5 + $0x50] sm:$0xff]  ;;  %v157_v17 = vld [vmem:[#allocation5 + $0x58] sm:$0xff]  ;;  %v426_v18 = vld [vmem:[#allocation8] sm:$0xff] }
  0x85   :  { %1549 = vmatprep.subr.bf16.mxu0 %v1548_v5  ;;  %v427_v19 = vld [vmem:[#allocation8 + $0x8] sm:$0xff]  ;;  %v428_v20 = vld [vmem:[#allocation8 + $0x10] sm:$0xff]  ;;  %v1564_v21 = vpack.c.bf16 %v157_v17, %v156_v16  ;;  %v158_v22 = vld [vmem:[#allocation5 + $0x60] sm:$0xff]  ;;  %p1843_p3 = por %p1842_p2, %p1841_p1 }
  0x86   :  { %v1576_v23 = vpack.c.bf16 %v427_v19, %v426_v18  ;;  %v429_v24 = vld [vmem:[#allocation8 + $0x18] sm:$0xff]  ;;  %v159_v25 = vld [vmem:[#allocation5 + $0x68] sm:$0xff]  ;;  %v160_v30 = vld [vmem:[#allocation5 + $0x70] sm:$0xff] }
  0x87   :  { %v1580_v26 = vpack.c.bf16 %v429_v24, %v428_v20  ;;  %v430_v27 = vld [vmem:[#allocation8 + $0x20] sm:$0xff]  ;;  %v431_v28 = vld [vmem:[#allocation8 + $0x28] sm:$0xff]  ;;  %v1568_v29 = vpack.c.bf16 %v159_v25, %v158_v22  ;;  %v161_v32 = vld [vmem:[#allocation5 + $0x78] sm:$0xff]  ;;  %p1844_p4 = pnand %p1843_p3, %p1837_p0 }
  0x88   :  { %1551 = vmatpush3.bf16.msra.mxu0 %v1548_v5  ;;  %1577 = vmatprep.subr.bf16.mxu1 %v1576_v23  ;;  %v1584_v31 = vpack.c.bf16 %v431_v28, %v430_v27  ;;  %v432_v33 = vld [vmem:[#allocation8 + $0x30] sm:$0xff]  ;;  %v433_v34 = vld [vmem:[#allocation8 + $0x38] sm:$0xff]  ;;  %v1572_v35 = vpack.c.bf16 %v161_v32, %v160_v30  ;;  %v434_v37 = vld [vmem:[#allocation8 + $0x40] sm:$0xff] }
  0x89   :  { %1553 = vmatprep.subr.bf16.mxu0 %v1552_v8  ;;  %1579 = vmatpush3.bf16.msra.mxu1 %v1576_v23  ;;  %v1588_v36 = vpack.c.bf16 %v433_v34, %v432_v33  ;;  %v435_v38 = vld [vmem:[#allocation8 + $0x48] sm:$0xff]  ;;  %v436_v40 = vld [vmem:[#allocation8 + $0x50] sm:$0xff]  ;;  %v437_v41 = vld [vmem:[#allocation8 + $0x58] sm:$0xff] }
  0x8a   :  { %1581 = vmatprep.subr.bf16.mxu1 %v1580_v26  ;;  %v1592_v39 = vpack.c.bf16 %v435_v38, %v434_v37  ;;  %v2028_v42 = vld [vmem:[#allocation2 + $0x8] sm:$0xff]  ;;  %v2030_v43 = vld [vmem:[#allocation2 + $0x10] sm:$0xff]  ;;  %v1596_v44 = vpack.c.bf16 %v437_v41, %v436_v40  ;;  %v2034_v47 = vld [vmem:[#allocation2 + $0x18] sm:$0xff] }
  0x8b   :  { %v438_v45 = vld [vmem:[#allocation8 + $0x60] sm:$0xff]  ;;  %v439_v46 = vld [vmem:[#allocation8 + $0x68] sm:$0xff]  ;;  %v2046_v52 = vld [vmem:[#allocation2 + $0x38] sm:$0xff] }
  0x8c   :  { %1555 = vmatpush3.bf16.msra.mxu0 %v1552_v8  ;;  %v2036_v48 = vld [vmem:[#allocation2 + $0x20] sm:$0xff]  ;;  %v1600_v49 = vpack.c.bf16 %v439_v46, %v438_v45  ;;  %v2040_v50 = vld [vmem:[#allocation2 + $0x28] sm:$0xff]  ;;  %v2042_v51 = vld [vmem:[#allocation2 + $0x30] sm:$0xff] }
  0x8d   :  { %1557 = vmatprep.subr.bf16.mxu0 %v1556_v12  ;;  %1583 = vmatpush3.bf16.msra.mxu1 %v1580_v26  ;;  %v2048_v53 = vld [vmem:[#allocation2 + $0x40] sm:$0xff]  ;;  %v2052_v54 = vld [vmem:[#allocation2 + $0x48] sm:$0xff]  ;;  %v2054_v55 = vld [vmem:[#allocation2 + $0x50] sm:$0xff] }
  0x8e   :  { %1585 = vmatprep.subr.bf16.mxu1 %v1584_v31  ;;  %v2058_v56 = vld [vmem:[#allocation2 + $0x58] sm:$0xff]  ;;  %v2060_v57 = vld [vmem:[#allocation2 + $0x60] sm:$0xff]  ;;  %v2064_v58 = vld [vmem:[#allocation2 + $0x68] sm:$0xff] }
  0x8f   :  { %v2066_v59 = vld [vmem:[#allocation2 + $0x70] sm:$0xff]  ;;  %v2070_v60 = vld [vmem:[#allocation2 + $0x78] sm:$0xff]  ;;  %v2072_v61 = vld [vmem:[#allocation2 + $0x80] sm:$0xff] }
  0x90   :  { %1559 = vmatpush3.bf16.msra.mxu0 %v1556_v12  ;;  %v2076_v62 = vld [vmem:[#allocation2 + $0x88] sm:$0xff]  ;;  %v2078_v63 = vld [vmem:[#allocation2 + $0x90] sm:$0xff]  ;;  %v2082_v0 = vld [vmem:[#allocation2 + $0x98] sm:$0xff] }
  0x91   :  { %1561 = vmatprep.subr.bf16.mxu0 %v1560_v15  ;;  %1587 = vmatpush3.bf16.msra.mxu1 %v1584_v31  ;;  %v2084_v1 = vld [vmem:[#allocation2 + $0xa0] sm:$0xff]  ;;  %v2088_v2 = vld [vmem:[#allocation2 + $0xa8] sm:$0xff]  ;;  %v2090_v3 = vld [vmem:[#allocation2 + $0xb0] sm:$0xff] }
  0x92   :  { %1589 = vmatprep.subr.bf16.mxu1 %v1588_v36  ;;  %v2094_v4 = vld [vmem:[#allocation2 + $0xb8] sm:$0xff]  ;;  %v2096_v5 = vld [vmem:[#allocation2 + $0xc0] sm:$0xff]  ;;  %v2100_v6 = vld [vmem:[#allocation2 + $0xc8] sm:$0xff] }
  0x93   :  { %v2102_v7 = vld [vmem:[#allocation2 + $0xd0] sm:$0xff]  ;;  %v2106_v8 = vld [vmem:[#allocation2 + $0xd8] sm:$0xff]  ;;  %v2108_v10 = vld [vmem:[#allocation2 + $0xe0] sm:$0xff] }
  0x94   :  { %1563 = vmatpush3.bf16.msra.mxu0 %v1560_v15  ;;  %v2112_v11 = vld [vmem:[#allocation2 + $0xe8] sm:$0xff]  ;;  %v2114_v12 = vld [vmem:[#allocation2 + $0xf0] sm:$0xff]  ;;  %v2118_v13 = vld [vmem:[#allocation2 + $0xf8] sm:$0xff] }
  0x95   :  { %1565 = vmatprep.subr.bf16.mxu0 %v1564_v21  ;;  %1591 = vmatpush3.bf16.msra.mxu1 %v1588_v36  ;;  %v440_v14 = vld [vmem:[#allocation8 + $0x70] sm:$0xff]  ;;  %v441_v15 = vld [vmem:[#allocation8 + $0x78] sm:$0xff] }
  0x96   :  { %1593 = vmatprep.subr.bf16.mxu1 %v1592_v39  ;;  %v1604_v16 = vpack.c.bf16 %v441_v15, %v440_v14  ;;  %v2121_v17 = vld [vmem:[#allocation7] ss:$0 sm:$0xff] }
  0x98   :  { %1567 = vmatpush3.bf16.msra.mxu0 %v1564_v21 }
  0x99   :  { %1569 = vmatprep.subr.bf16.mxu0 %v1568_v29  ;;  %1595 = vmatpush3.bf16.msra.mxu1 %v1592_v39 }
  0x9a   :  { %1597 = vmatprep.subr.bf16.mxu1 %v1596_v44 }
  0x9c   :  { %1571 = vmatpush3.bf16.msra.mxu0 %v1568_v29 }
  0x9d   :  { %1573 = vmatprep.subr.bf16.mxu0 %v1572_v35  ;;  %1599 = vmatpush3.bf16.msra.mxu1 %v1596_v44 }
  0x9e   :  { %1601 = vmatprep.subr.bf16.mxu1 %v1600_v49 }
  0xa0   :  { %1575 = vmatpush3.bf16.msra.mxu0 %v1572_v35 }
  0xa1   :  { %1603 = vmatpush3.bf16.msra.mxu1 %v1600_v49 }
  0xa2   :  { %1605 = vmatprep.subr.bf16.mxu1 %v1604_v16 }
  0xa3   :  { %1417 = vmatmul.mubr.f32.vlgmr.msra.gmra.mrb[0].mxu0 %v2028_v42 }
  0xa4   :  { %1419 = vmatprep.mubr.f32.mxu0 %v2030_v43 }
  0xa5   :  { %1607 = vmatpush3.bf16.msra.mxu1 %v1604_v16 }
  0xa7   :  { %1420 = vmatmul.mubr.f32.gmra.mrb[2].mxu0 %v2034_v47 }
  0xa8   :  { %1422 = vmatprep.mubr.f32.mxu0 %v2036_v48 }
  0xab   :  { %1423 = vmatmul.mubr.f32.gmra.mrb[4].mxu0 %v2040_v50 }
  0xac   :  { %1425 = vmatprep.mubr.f32.mxu0 %v2042_v51 }
  0xaf   :  { %1426 = vmatmul.mubr.f32.gmra.mrb[6].mxu0 %v2046_v52 }
  0xb0   :  { %1428 = vmatprep.mubr.f32.mxu0 %v2048_v53 }
  0xb3   :  { %1429 = vmatmul.mubr.f32.gmra.mrb[8].mxu0 %v2052_v54 }
  0xb4   :  { %1431 = vmatprep.mubr.f32.mxu0 %v2054_v55 }
  0xb7   :  { %1432 = vmatmul.mubr.f32.gmra.mrb[10].mxu0 %v2058_v56 }
  0xb8   :  { %1434 = vmatprep.mubr.f32.mxu0 %v2060_v57 }
  0xbb   :  { %1435 = vmatmul.mubr.f32.gmra.mrb[12].mxu0 %v2064_v58 }
  0xbc   :  { %1437 = vmatprep.mubr.f32.mxu0 %v2066_v59 }
  0xbf   :  { %1438 = vmatmul.mubr.f32.gmra.mrb[14].mxu0 %v2070_v60 }
  0xc0   :  { %1440 = vmatprep.mubr.f32.mxu0 %v2072_v61 }
  0xc3   :  { %1441 = vmatmul.mubr.f32.gmra.mrb[16].mxu0 %v2076_v62 }
  0xc4   :  { %1443 = vmatprep.mubr.f32.mxu0 %v2078_v63 }
  0xc7   :  { %1444 = vmatmul.mubr.f32.gmra.mrb[18].mxu0 %v2082_v0 }
  0xc8   :  { %1446 = vmatprep.mubr.f32.mxu0 %v2084_v1 }
  0xcb   :  { %1447 = vmatmul.mubr.f32.gmra.mrb[20].mxu0 %v2088_v2 }
  0xcc   :  { %1449 = vmatprep.mubr.f32.mxu0 %v2090_v3 }
  0xcf   :  { %1450 = vmatmul.mubr.f32.gmra.mrb[22].mxu0 %v2094_v4 }
  0xd0   :  { %1452 = vmatprep.mubr.f32.mxu0 %v2096_v5 }
  0xd3   :  { %1453 = vmatmul.mubr.f32.gmra.mrb[24].mxu0 %v2100_v6 }
  0xd4   :  { %1455 = vmatprep.mubr.f32.mxu0 %v2102_v7 }
  0xd7   :  { %1456 = vmatmul.mubr.f32.gmra.mrb[26].mxu0 %v2106_v8 }
  0xd8   :  { %1458 = vmatprep.mubr.f32.mxu0 %v2108_v10 }
  0xdb   :  { %1459 = vmatmul.mubr.f32.gmra.mrb[28].mxu0 %v2112_v11 }
  0xdc   :  { %1461 = vmatprep.mubr.f32.mxu0 %v2114_v12 }
  0xdf   :  { %1462 = vmatmul.mubr.f32.gmra.mrb[30].mxu0 %v2118_v13 }
 0x176   :  { %v1418_v18 = vpop.f32.mrb[0].mxu0 }
 0x177   :  { %v241_v19 = vadd.f32 %v1418_v18, %v2121_v17  ;;  %v235_v20 = vpop.f32.mrb[1].mxu0 }
 0x178   :  { %v236_v21 = vadd.f32 %v2121_v17, %v235_v20 }
 0x179   :  { %v395_v24 = vmax.f32 %v241_v19, 0.0 }
 0x17a   :  { %v1421_v22 = vpop.f32.mrb[2].mxu0  ;;  %v394_v23 = vmax.f32 %v236_v21, 0.0 }
 0x17b   :  { %v251_v25 = vadd.f32 %v1421_v22, %v2121_v17  ;;  %v245_v26 = vpop.f32.mrb[3].mxu0 }
 0x17c   :  { %v246_v27 = vadd.f32 %v2121_v17, %v245_v26  ;;  %1496 = vmatprep.mubr.f32.mxu1 %v394_v23 }
 0x17d   :  { %v397_v28 = vmax.f32 %v251_v25, 0.0  ;;  %1497 = vmatmul.mubr.f32.vlgmr.msra.gmra.mrb[0].mxu1 %v395_v24 }
 0x17e   :  { %v396_v29 = vmax.f32 %v246_v27, 0.0  ;;  %v1424_v30 = vpop.f32.mrb[4].mxu0 }
 0x17f   :  { %v261_v31 = vadd.f32 %v1424_v30, %v2121_v17  ;;  %v255_v32 = vpop.f32.mrb[5].mxu0 }
 0x180   :  { %1499 = vmatprep.mubr.f32.mxu1 %v396_v29  ;;  %v256_v33 = vadd.f32 %v2121_v17, %v255_v32 }
 0x181   :  { %1500 = vmatmul.mubr.f32.gmra.mrb[2].mxu1 %v397_v28  ;;  %v399_v34 = vmax.f32 %v261_v31, 0.0 }
 0x182   :  { %v398_v35 = vmax.f32 %v256_v33, 0.0  ;;  %v1427_v36 = vpop.f32.mrb[6].mxu0 }
 0x183   :  { %v271_v37 = vadd.f32 %v1427_v36, %v2121_v17  ;;  %v265_v38 = vpop.f32.mrb[7].mxu0 }
 0x184   :  { %1502 = vmatprep.mubr.f32.mxu1 %v398_v35  ;;  %v266_v39 = vadd.f32 %v2121_v17, %v265_v38 }
 0x185   :  { %1503 = vmatmul.mubr.f32.gmra.mrb[4].mxu1 %v399_v34  ;;  %v401_v40 = vmax.f32 %v271_v37, 0.0 }
 0x186   :  { %v400_v41 = vmax.f32 %v266_v39, 0.0  ;;  %v1430_v44 = vpop.f32.mrb[8].mxu0 }
 0x187   :  { %v281_v45 = vadd.f32 %v1430_v44, %v2121_v17  ;;  %v275_v46 = vpop.f32.mrb[9].mxu0 }
 0x188   :  { %1505 = vmatprep.mubr.f32.mxu1 %v400_v41  ;;  %v276_v49 = vadd.f32 %v2121_v17, %v275_v46 }
 0x189   :  { %1506 = vmatmul.mubr.f32.gmra.mrb[6].mxu1 %v401_v40  ;;  %v403_v14 = vmax.f32 %v281_v45, 0.0 }
 0x18a   :  { %v402_v15 = vmax.f32 %v276_v49, 0.0  ;;  %v1433_v16 = vpop.f32.mrb[10].mxu0 }
 0x18b   :  { %v291_v18 = vadd.f32 %v1433_v16, %v2121_v17  ;;  %v285_v19 = vpop.f32.mrb[11].mxu0 }
 0x18c   :  { %1508 = vmatprep.mubr.f32.mxu1 %v402_v15  ;;  %v286_v20 = vadd.f32 %v2121_v17, %v285_v19 }
 0x18d   :  { %1509 = vmatmul.mubr.f32.gmra.mrb[8].mxu1 %v403_v14  ;;  %v405_v21 = vmax.f32 %v291_v18, 0.0 }
 0x18e   :  { %v404_v22 = vmax.f32 %v286_v20, 0.0  ;;  %v1436_v23 = vpop.f32.mrb[12].mxu0 }
 0x18f   :  { %v301_v24 = vadd.f32 %v1436_v23, %v2121_v17  ;;  %v295_v25 = vpop.f32.mrb[13].mxu0 }
 0x190   :  { %1511 = vmatprep.mubr.f32.mxu1 %v404_v22  ;;  %v296_v26 = vadd.f32 %v2121_v17, %v295_v25 }
 0x191   :  { %1512 = vmatmul.mubr.f32.gmra.mrb[10].mxu1 %v405_v21  ;;  %v407_v27 = vmax.f32 %v301_v24, 0.0 }
 0x192   :  { %v406_v28 = vmax.f32 %v296_v26, 0.0  ;;  %v1439_v29 = vpop.f32.mrb[14].mxu0 }
 0x193   :  { %v311_v30 = vadd.f32 %v1439_v29, %v2121_v17  ;;  %v305_v31 = vpop.f32.mrb[15].mxu0 }
 0x194   :  { %1514 = vmatprep.mubr.f32.mxu1 %v406_v28  ;;  %v306_v32 = vadd.f32 %v2121_v17, %v305_v31 }
 0x195   :  { %1515 = vmatmul.mubr.f32.gmra.mrb[12].mxu1 %v407_v27  ;;  %v409_v33 = vmax.f32 %v311_v30, 0.0 }
 0x196   :  { %v408_v34 = vmax.f32 %v306_v32, 0.0  ;;  %v1442_v35 = vpop.f32.mrb[16].mxu0 }
 0x197   :  { %v321_v36 = vadd.f32 %v1442_v35, %v2121_v17  ;;  %v315_v37 = vpop.f32.mrb[17].mxu0 }
 0x198   :  { %1517 = vmatprep.mubr.f32.mxu1 %v408_v34  ;;  %v316_v38 = vadd.f32 %v2121_v17, %v315_v37 }
 0x199   :  { %1518 = vmatmul.mubr.f32.gmra.mrb[14].mxu1 %v409_v33  ;;  %v411_v39 = vmax.f32 %v321_v36, 0.0 }
 0x19a   :  { %v410_v40 = vmax.f32 %v316_v38, 0.0  ;;  %v1445_v41 = vpop.f32.mrb[18].mxu0 }
 0x19b   :  { %v331_v44 = vadd.f32 %v1445_v41, %v2121_v17  ;;  %v325_v45 = vpop.f32.mrb[19].mxu0 }
 0x19c   :  { %1520 = vmatprep.mubr.f32.mxu1 %v410_v40  ;;  %v326_v46 = vadd.f32 %v2121_v17, %v325_v45 }
 0x19d   :  { %1521 = vmatmul.mubr.f32.gmra.mrb[16].mxu1 %v411_v39  ;;  %v413_v49 = vmax.f32 %v331_v44, 0.0 }
 0x19e   :  { %v412_v14 = vmax.f32 %v326_v46, 0.0  ;;  %v1448_v15 = vpop.f32.mrb[20].mxu0 }
 0x19f   :  { %v341_v16 = vadd.f32 %v1448_v15, %v2121_v17  ;;  %v335_v18 = vpop.f32.mrb[21].mxu0 }
 0x1a0   :  { %1523 = vmatprep.mubr.f32.mxu1 %v412_v14  ;;  %v336_v19 = vadd.f32 %v2121_v17, %v335_v18 }
 0x1a1   :  { %1524 = vmatmul.mubr.f32.gmra.mrb[18].mxu1 %v413_v49  ;;  %v415_v20 = vmax.f32 %v341_v16, 0.0 }
 0x1a2   :  { %v414_v21 = vmax.f32 %v336_v19, 0.0  ;;  %v1451_v22 = vpop.f32.mrb[22].mxu0 }
 0x1a3   :  { %v351_v23 = vadd.f32 %v1451_v22, %v2121_v17  ;;  %v345_v24 = vpop.f32.mrb[23].mxu0 }
 0x1a4   :  { %1526 = vmatprep.mubr.f32.mxu1 %v414_v21  ;;  %v346_v25 = vadd.f32 %v2121_v17, %v345_v24  ;;  %v2155_v21 = vld [vmem:[#allocation10] ss:$0 sm:$0xff] }
 0x1a5   :  { %1527 = vmatmul.mubr.f32.gmra.mrb[20].mxu1 %v415_v20  ;;  %v417_v26 = vmax.f32 %v351_v23, 0.0 }
 0x1a6   :  { %v416_v27 = vmax.f32 %v346_v25, 0.0  ;;  %v1454_v28 = vpop.f32.mrb[24].mxu0 }
 0x1a7   :  { %v361_v29 = vadd.f32 %v1454_v28, %v2121_v17  ;;  %v355_v30 = vpop.f32.mrb[25].mxu0 }
 0x1a8   :  { %1529 = vmatprep.mubr.f32.mxu1 %v416_v27  ;;  %v356_v31 = vadd.f32 %v2121_v17, %v355_v30 }
 0x1a9   :  { %1530 = vmatmul.mubr.f32.gmra.mrb[22].mxu1 %v417_v26  ;;  %v419_v32 = vmax.f32 %v361_v29, 0.0 }
 0x1aa   :  { %v418_v33 = vmax.f32 %v356_v31, 0.0  ;;  %v1457_v34 = vpop.f32.mrb[26].mxu0 }
 0x1ab   :  { %v371_v35 = vadd.f32 %v1457_v34, %v2121_v17  ;;  %v365_v36 = vpop.f32.mrb[27].mxu0 }
 0x1ac   :  { %1532 = vmatprep.mubr.f32.mxu1 %v418_v33  ;;  %v366_v37 = vadd.f32 %v2121_v17, %v365_v36 }
 0x1ad   :  { %1533 = vmatmul.mubr.f32.gmra.mrb[24].mxu1 %v419_v32  ;;  %v421_v38 = vmax.f32 %v371_v35, 0.0 }
 0x1ae   :  { %v420_v39 = vmax.f32 %v366_v37, 0.0  ;;  %v1460_v40 = vpop.f32.mrb[28].mxu0 }
 0x1af   :  { %v381_v41 = vadd.f32 %v1460_v40, %v2121_v17  ;;  %v375_v44 = vpop.f32.mrb[29].mxu0 }
 0x1b0   :  { %1535 = vmatprep.mubr.f32.mxu1 %v420_v39  ;;  %v376_v45 = vadd.f32 %v2121_v17, %v375_v44 }
 0x1b1   :  { %1536 = vmatmul.mubr.f32.gmra.mrb[26].mxu1 %v421_v38  ;;  %v423_v46 = vmax.f32 %v381_v41, 0.0 }
 0x1b2   :  { %v422_v49 = vmax.f32 %v376_v45, 0.0  ;;  %v1463_v14 = vpop.f32.mrb[30].mxu0 }
 0x1b3   :  { %v391_v15 = vadd.f32 %v1463_v14, %v2121_v17  ;;  %v385_v16 = vpop.f32.mrb[31].mxu0 }
 0x1b4   :  { %1538 = vmatprep.mubr.f32.mxu1 %v422_v49  ;;  %v386_v18 = vadd.f32 %v2121_v17, %v385_v16 }
 0x1b5   :  { %1539 = vmatmul.mubr.f32.gmra.mrb[28].mxu1 %v423_v46  ;;  %v425_v19 = vmax.f32 %v391_v15, 0.0 }
 0x1b6   :  { %v424_v20 = vmax.f32 %v386_v18, 0.0 }
 0x1b8   :  { %1541 = vmatprep.mubr.f32.mxu1 %v424_v20 }
 0x1b9   :  { %1542 = vmatmul.mubr.f32.gmra.mrb[30].mxu1 %v425_v19 }
 0x250   :  { %v1498_v22 = vpop.f32.mrb[0].mxu1 }
 0x251   :  { %v521_v23 = vadd.f32 %v1498_v22, %v2155_v21  ;;  %v515_v24 = vpop.f32.mrb[1].mxu1 }
 0x252   :  { %v516_v26 = vadd.f32 %v2155_v21, %v515_v24 }
 0x253   :  { %v2159_v25 = vadd.f32 %v521_v23, %v2028_v42 }
 0x254   :  { %v1501_v27 = vpop.f32.mrb[2].mxu1  ;;  %v2167_v30 = vadd.f32 %v516_v26, %v2025_v9 }
 0x255   :  { %v531_v28 = vadd.f32 %v1501_v27, %v2155_v21  ;;  %708 = vadd.xlane.f32.xlu0 %v2159_v25  ;;  %v525_v17 = vpop.f32.mrb[3].mxu1  ;;  %v771_v29 = vmul.f32 %v2159_v25, %v2159_v25 }
 0x256   :  { %v526_v31 = vadd.f32 %v2155_v21, %v525_v17  ;;  %v770_v35 = vmul.f32 %v2167_v30, %v2167_v30 }
 0x257   :  { %804 = vadd.xlane.f32.xlu1 %v771_v29  ;;  %v2171_v42 = vadd.f32 %v531_v28, %v2034_v47 }
 0x258   :  { %v1504_v32 = vpop.f32.mrb[4].mxu1  ;;  %v2175_v34 = vadd.f32 %v526_v31, %v2030_v43 }
 0x259   :  { %706 = vadd.xlane.f32.xlu0 %v2167_v30  ;;  %v535_v33 = vpop.f32.mrb[5].mxu1  ;;  %v541_v39 = vadd.f32 %v1504_v32, %v2155_v21  ;;  %v773_v40 = vmul.f32 %v2171_v42, %v2171_v42 }
 0x25a   :  { %v536_v36 = vadd.f32 %v2155_v21, %v535_v33  ;;  %v772_v47 = vmul.f32 %v2175_v34, %v2175_v34 }
 0x25b   :  { %712 = vadd.xlane.f32.xlu1 %v2171_v42  ;;  %v2191_v45 = vadd.f32 %v541_v39, %v2040_v50 }
 0x25c   :  { %v1507_v9 = vpop.f32.mrb[6].mxu1  ;;  %v2186_v43 = vadd.f32 %v536_v36, %v2036_v48 }
 0x25d   :  { %802 = vadd.xlane.f32.xlu0 %v770_v35  ;;  %v545_v37 = vpop.f32.mrb[7].mxu1  ;;  %v551_v15 = vadd.f32 %v1507_v9, %v2155_v21  ;;  %v775_v50 = vmul.f32 %v2191_v45, %v2191_v45 }
 0x25e   :  { %v546_v46 = vadd.f32 %v2155_v21, %v545_v37  ;;  %v774_v48 = vmul.f32 %v2186_v43, %v2186_v43 }
 0x25f   :  { %710 = vadd.xlane.f32.xlu1 %v2175_v34  ;;  %v2205_v20 = vadd.f32 %v551_v15, %v2046_v52 }
 0x260   :  { %v1510_v38 = vpop.f32.mrb[8].mxu1  ;;  %v2200_v16 = vadd.f32 %v546_v46, %v2042_v51 }
 0x261   :  { %806 = vadd.xlane.f32.xlu0 %v772_v47  ;;  %v555_v41 = vpop.f32.mrb[9].mxu1  ;;  %v561_v26 = vadd.f32 %v1510_v38, %v2155_v21  ;;  %v777_v52 = vmul.f32 %v2205_v20, %v2205_v20 }
 0x262   :  { %v556_v22 = vadd.f32 %v2155_v21, %v555_v41  ;;  %v776_v51 = vmul.f32 %v2200_v16, %v2200_v16 }
 0x263   :  { %808 = vadd.xlane.f32.xlu1 %v773_v40  ;;  %v2225_v32 = vadd.f32 %v561_v26, %v2052_v54 }
 0x264   :  { %v1513_v44 = vpop.f32.mrb[10].mxu1  ;;  %v2214_v27 = vadd.f32 %v556_v22, %v2048_v53 }
 0x265   :  { %714 = vadd.xlane.f32.xlu0 %v2186_v43  ;;  %v565_v49 = vpop.f32.mrb[11].mxu1  ;;  %v571_v54 = vadd.f32 %v1513_v44, %v2155_v21  ;;  %v779_v38 = vmul.f32 %v2225_v32, %v2225_v32 }
 0x266   :  { %v566_v53 = vadd.f32 %v2155_v21, %v565_v49  ;;  %v778_v36 = vmul.f32 %v2214_v27, %v2214_v27 }
 0x267   :  { %716 = vadd.xlane.f32.xlu1 %v2191_v45  ;;  %v2249_v49 = vadd.f32 %v571_v54, %v2058_v56 }
 0x268   :  { %v1516_v14 = vpop.f32.mrb[12].mxu1  ;;  %v2240_v47 = vadd.f32 %v566_v53, %v2054_v55 }
 0x269   :  { %810 = vadd.xlane.f32.xlu0 %v774_v48  ;;  %v575_v18 = vpop.f32.mrb[13].mxu1 }
 0x26a   :  { %v576_v55 = vadd.f32 %v2155_v21, %v575_v18  ;;  %v781_v18 = vmul.f32 %v2249_v49, %v2249_v49 }
 0x26b   :  { %812 = vadd.xlane.f32.xlu1 %v775_v50  ;;  %v780_v50 = vmul.f32 %v2240_v47, %v2240_v47 }
 0x26c   :  { %v1519_v19 = vpop.f32.mrb[14].mxu1  ;;  %v2262_v56 = vadd.f32 %v576_v55, %v2060_v57 }
 0x26d   :  { %718 = vadd.xlane.f32.xlu0 %v2200_v16  ;;  %v585_v23 = vpop.f32.mrb[15].mxu1  ;;  %v591_v54 = vadd.f32 %v1519_v19, %v2155_v21 }
 0x26e   :  { %v586_v57 = vadd.f32 %v2155_v21, %v585_v23 }
 0x26f   :  { %720 = vadd.xlane.f32.xlu1 %v2205_v20 }
 0x270   :  { %v1522_v24 = vpop.f32.mrb[16].mxu1 }
 0x271   :  { %814 = vadd.xlane.f32.xlu0 %v776_v51  ;;  %v2219_v28 = vadd.f32 %v1522_v24, %v2155_v21  ;;  %v595_v17 = vpop.f32.mrb[17].mxu1  ;;  %v581_v51 = vadd.f32 %v1516_v14, %v2155_v21 }
 0x272   :  { %v2222_v29 = vadd.f32 %v2155_v21, %v595_v17 }
 0x273   :  { %816 = vadd.xlane.f32.xlu1 %v777_v52 }
 0x274   :  { %v1525_v31 = vpop.f32.mrb[18].mxu1 }
 0x275   :  { %722 = vadd.xlane.f32.xlu0 %v2214_v27  ;;  %v2230_v33 = vadd.f32 %v1525_v31, %v2155_v21  ;;  %v605_v35 = vpop.f32.mrb[19].mxu1  ;;  %v2271_v31 = vadd.f32 %v581_v51, %v2064_v58  ;;  %v2284_v58 = vadd.f32 %v586_v57, %v2066_v59  ;;  %v2305_v51 = vadd.f32 %v2222_v29, %v2072_v61 }
 0x276   :  { %v2233_v9 = vadd.f32 %v2155_v21, %v605_v35 }
 0x277   :  { %724 = vadd.xlane.f32.xlu1 %v2225_v32  ;;  %v783_v23 = vmul.f32 %v2271_v31, %v2271_v31 }
 0x278   :  { %v1528_v37 = vpop.f32.mrb[20].mxu1  ;;  %v2319_v61 = vadd.f32 %v2233_v9, %v2078_v63 }
 0x279   :  { %818 = vadd.xlane.f32.xlu0 %v778_v36  ;;  %v2245_v39 = vadd.f32 %v1528_v37, %v2155_v21  ;;  %v615_v40 = vpop.f32.mrb[21].mxu1  ;;  %v782_v36 = vmul.f32 %v2262_v56, %v2262_v56 }
 0x27a   :  { %v616_v41 = vadd.f32 %v2155_v21, %v615_v40 }
 0x27b   :  { %820 = vadd.xlane.f32.xlu1 %v779_v38  ;;  %v2338_v9 = vadd.f32 %v2245_v39, %v2088_v2 }
 0x27c   :  { %v1531_v46 = vpop.f32.mrb[22].mxu1 }
 0x27d   :  { %726 = vadd.xlane.f32.xlu0 %v2240_v47  ;;  %v2254_v44 = vadd.f32 %v1531_v46, %v2155_v21  ;;  %v625_v48 = vpop.f32.mrb[23].mxu1 }
 0x27e   :  { %v626_v15 = vadd.f32 %v2155_v21, %v625_v48  ;;  %v2293_v48 = vadd.f32 %v591_v54, %v2070_v60 }
 0x27f   :  { %728 = vadd.xlane.f32.xlu1 %v2249_v49 }
 0x280   :  { %v1534_v22 = vpop.f32.mrb[24].mxu1  ;;  %v785_v60 = vmul.f32 %v2293_v48, %v2293_v48 }
 0x281   :  { %822 = vadd.xlane.f32.xlu0 %v780_v50  ;;  %v2267_v24 = vadd.f32 %v1534_v22, %v2155_v21  ;;  %v635_v26 = vpop.f32.mrb[25].mxu1  ;;  %v784_v22 = vmul.f32 %v2284_v58, %v2284_v58 }
 0x282   :  { %v636_v52 = vadd.f32 %v2155_v21, %v635_v26  ;;  %v2332_v26 = vadd.f32 %v616_v41, %v2084_v1  ;;  %v791_v1 = vmul.f32 %v2338_v9, %v2338_v9  ;;  %v2351_v41 = vadd.f32 %v2254_v44, %v2094_v4 }
 0x283   :  { %824 = vadd.xlane.f32.xlu1 %v781_v18  ;;  %v2311_v18 = vadd.f32 %v2219_v28, %v2076_v62  ;;  %v2325_v62 = vadd.f32 %v2230_v33, %v2082_v0  ;;  %v788_v28 = vmul.f32 %v2319_v61, %v2319_v61  ;;  %v2345_v33 = vadd.f32 %v626_v15, %v2090_v3 }
 0x284   :  { %v1537_v17 = vpop.f32.mrb[26].mxu1  ;;  %v790_v0 = vmul.f32 %v2332_v26, %v2332_v26  ;;  %v2358_v39 = vadd.f32 %v636_v52, %v2096_v5  ;;  %v793_v3 = vmul.f32 %v2351_v41, %v2351_v41  ;;  %v2364_v15 = vadd.f32 %v2267_v24, %v2100_v6 }
 0x285   :  { %730 = vadd.xlane.f32.xlu0 %v2262_v56  ;;  %v2276_v14 = vadd.f32 %v1537_v17, %v2155_v21  ;;  %v645_v53 = vpop.f32.mrb[27].mxu1  ;;  %v787_v29 = vmul.f32 %v2311_v18, %v2311_v18  ;;  %v789_v63 = vmul.f32 %v2325_v62, %v2325_v62  ;;  %v792_v2 = vmul.f32 %v2345_v33, %v2345_v33 }
 0x286   :  { %v646_v35 = vadd.f32 %v2155_v21, %v645_v53  ;;  %v794_v4 = vmul.f32 %v2358_v39, %v2358_v39  ;;  %v795_v5 = vmul.f32 %v2364_v15, %v2364_v15 }
 0x287   :  { %732 = vadd.xlane.f32.xlu1 %v2271_v31  ;;  %v2377_v52 = vadd.f32 %v2276_v14, %v2106_v8 }
 0x288   :  { %v1540_v37 = vpop.f32.mrb[28].mxu1  ;;  %v2371_v44 = vadd.f32 %v646_v35, %v2102_v7 }
 0x289   :  { %826 = vadd.xlane.f32.xlu0 %v782_v36  ;;  %v2289_v38 = vadd.f32 %v1540_v37, %v2155_v21  ;;  %v655_v40 = vpop.f32.mrb[29].mxu1  ;;  %v797_v7 = vmul.f32 %v2377_v52, %v2377_v52 }
 0x28a   :  { %v656_v46 = vadd.f32 %v2155_v21, %v655_v40  ;;  %v796_v6 = vmul.f32 %v2371_v44, %v2371_v44 }
 0x28b   :  { %828 = vadd.xlane.f32.xlu1 %v783_v23  ;;  %v2390_v17 = vadd.f32 %v2289_v38, %v2112_v11 }
 0x28c   :  { %v1543_v55 = vpop.f32.mrb[30].mxu1  ;;  %v2384_v24 = vadd.f32 %v656_v46, %v2108_v10 }
 0x28d   :  { %734 = vadd.xlane.f32.xlu0 %v2284_v58  ;;  %v2297_v59 = vadd.f32 %v1543_v55, %v2155_v21  ;;  %v665_v19 = vpop.f32.mrb[31].mxu1  ;;  %v799_v10 = vmul.f32 %v2390_v17, %v2390_v17 }
 0x28e   :  { %v666_v50 = vadd.f32 %v2155_v21, %v665_v19  ;;  %v786_v21 = vmul.f32 %v2305_v51, %v2305_v51  ;;  %v798_v8 = vmul.f32 %v2384_v24, %v2384_v24 }
 0x28f   :  { %736 = vadd.xlane.f32.xlu1 %v2293_v48  ;;  %v2403_v14 = vadd.f32 %v2297_v59, %v2118_v13 }
 0x290   :  { %v2397_v57 = vadd.f32 %v666_v50, %v2114_v12 }
 0x291   :  { %830 = vadd.xlane.f32.xlu0 %v784_v22  ;;  %v801_v12 = vmul.f32 %v2403_v14, %v2403_v14 }
 0x292   :  { %v800_v11 = vmul.f32 %v2397_v57, %v2397_v57 }
 0x293   :  { %832 = vadd.xlane.f32.xlu1 %v785_v60 }
 0x295   :  { %738 = vadd.xlane.f32.xlu0 %v2305_v51 }
 0x297   :  { %740 = vadd.xlane.f32.xlu1 %v2311_v18 }
 0x299   :  { %834 = vadd.xlane.f32.xlu0 %v786_v21 }
 0x29b   :  { %836 = vadd.xlane.f32.xlu1 %v787_v29 }
 0x29d   :  { %742 = vadd.xlane.f32.xlu0 %v2319_v61 }
 0x29f   :  { %744 = vadd.xlane.f32.xlu1 %v2325_v62 }
 0x2a1   :  { %838 = vadd.xlane.f32.xlu0 %v788_v28 }
 0x2a3   :  { %840 = vadd.xlane.f32.xlu1 %v789_v63 }
 0x2a5   :  { %746 = vadd.xlane.f32.xlu0 %v2332_v26 }
 0x2a7   :  { %748 = vadd.xlane.f32.xlu1 %v2338_v9 }
 0x2a9   :  { %842 = vadd.xlane.f32.xlu0 %v790_v0 }
 0x2ab   :  { %844 = vadd.xlane.f32.xlu1 %v791_v1 }
 0x2ad   :  { %750 = vadd.xlane.f32.xlu0 %v2345_v33 }
 0x2af   :  { %752 = vadd.xlane.f32.xlu1 %v2351_v41 }
 0x2b1   :  { %846 = vadd.xlane.f32.xlu0 %v792_v2 }
 0x2b3   :  { %848 = vadd.xlane.f32.xlu1 %v793_v3 }
 0x2b5   :  { %754 = vadd.xlane.f32.xlu0 %v2358_v39 }
 0x2b7   :  { %756 = vadd.xlane.f32.xlu1 %v2364_v15 }
 0x2b9   :  { %850 = vadd.xlane.f32.xlu0 %v794_v4 }
 0x2bb   :  { %852 = vadd.xlane.f32.xlu1 %v795_v5 }
 0x2bd   :  { %758 = vadd.xlane.f32.xlu0 %v2371_v44 }
 0x2bf   :  { %760 = vadd.xlane.f32.xlu1 %v2377_v52 }
 0x2c1   :  { %854 = vadd.xlane.f32.xlu0 %v796_v6 }
 0x2c3   :  { %856 = vadd.xlane.f32.xlu1 %v797_v7 }
 0x2c5   :  { %762 = vadd.xlane.f32.xlu0 %v2384_v24 }
 0x2c7   :  { %764 = vadd.xlane.f32.xlu1 %v2390_v17 }
 0x2c9   :  { %858 = vadd.xlane.f32.xlu0 %v798_v8 }
 0x2cb   :  { %860 = vadd.xlane.f32.xlu1 %v799_v10 }
 0x2cd   :  { %766 = vadd.xlane.f32.xlu0 %v2397_v57 }
 0x2cf   :  { %768 = vadd.xlane.f32.xlu1 %v2403_v14 }
 0x2d1   :  { %862 = vadd.xlane.f32.xlu0 %v800_v11 }
 0x2d3   :  { %864 = vadd.xlane.f32.xlu1 %v801_v12 }
 0x2e2   :  { %v709_v53 = vpop.xlane.xlu0 %708 }
 0x2e3   :  { %v867_v35 = vmul.f32 0.03125, %v709_v53 }
 0x2e4   :  { %v805_v36 = vpop.xlane.xlu1 %804 }
 0x2e5   :  { %v931_v37 = vmul.f32 %v867_v35, %v867_v35  ;;  %v899_v54 = vmul.f32 0.03125, %v805_v36 }
 0x2e6   :  { %v707_v23 = vpop.xlane.xlu0 %706 }
 0x2e7   :  { %v963_v13 = vsub.f32 %v899_v54, %v931_v37  ;;  %v866_v38 = vmul.f32 0.03125, %v707_v23  ;;  %v1091_v37 = vsub.f32 %v2159_v25, %v867_v35 }
 0x2e8   :  { %v713_v40 = vpop.xlane.xlu1 %712 }
 0x2e9   :  { %v995_v46 = vmax.f32 %v963_v13, 0.0  ;;  %v930_v19 = vmul.f32 %v866_v38, %v866_v38  ;;  %v2411_v60 = vmul.f32 0.03125, %v713_v40  ;;  %v2424_v40 = vld [vmem:[#allocation11] ss:$0 sm:$0xff] }
 0x2ea   :  { %v803_v55 = vpop.xlane.xlu0 %802 }
 0x2eb   :  { %v1027_v59 = vadd.f32 1e-05, %v995_v46  ;;  %v898_v50 = vmul.f32 0.03125, %v803_v55  ;;  %v933_v3 = vmul.f32 %v2411_v60, %v2411_v60 }
 0x2ec   :  { %v711_v22 = vpop.xlane.xlu1 %710 }
 0x2ed   :  { %1618 = vrsqrt.f32 %v1027_v59  ;;  %v962_v21 = vsub.f32 %v898_v50, %v930_v19  ;;  %v2413_v29 = vmul.f32 0.03125, %v711_v22  ;;  %v2428_v22 = vld [vmem:[#allocation13] ss:$0 sm:$0xff] }
 0x2ee   :  { %v807_v28 = vpop.xlane.xlu0 %806 }
 0x2ef   :  { %v994_v63 = vmax.f32 %v962_v21, 0.0  ;;  %v932_v0 = vmul.f32 %v2413_v29, %v2413_v29  ;;  %v900_v1 = vmul.f32 0.03125, %v807_v28 }
 0x2f0   :  { %v809_v2 = vpop.xlane.xlu1 %808 }
 0x2f1   :  { %v1026_v4 = vadd.f32 1e-05, %v994_v63  ;;  %v964_v5 = vsub.f32 %v900_v1, %v932_v0  ;;  %v901_v6 = vmul.f32 0.03125, %v809_v2 }
 0x2f2   :  { %v715_v7 = vpop.xlane.xlu0 %714 }
 0x2f3   :  { %1620 = vrsqrt.f32 %v1026_v4  ;;  %v996_v8 = vmax.f32 %v964_v5, 0.0  ;;  %v965_v10 = vsub.f32 %v901_v6, %v933_v3  ;;  %v2419_v11 = vmul.f32 0.03125, %v715_v7 }
 0x2f4   :  { %v717_v12 = vpop.xlane.xlu1 %716  ;;  %v1090_v4 = vsub.f32 %v2167_v30, %v866_v38  ;;  %v1092_v30 = vsub.f32 %v2175_v34, %v2413_v29 }
 0x2f5   :  { %v1028_v53 = vadd.f32 1e-05, %v996_v8  ;;  %v997_v36 = vmax.f32 %v965_v10, 0.0  ;;  %v2422_v54 = vmul.f32 0.03125, %v717_v12  ;;  %v934_v55 = vmul.f32 %v2419_v11, %v2419_v11 }
 0x2f6   :  { %v811_v23 = vpop.xlane.xlu0 %810 }
 0x2f7   :  { %v1619_v13 = vpop.eup %1618  ;;  %1622 = vrsqrt.f32 %v1028_v53  ;;  %v1029_v46 = vadd.f32 1e-05, %v997_v36  ;;  %v902_v59 = vmul.f32 0.03125, %v811_v23  ;;  %v935_v25 = vmul.f32 %v2422_v54, %v2422_v54 }
 0x2f8   :  { %v1123_v19 = vmul.f32 %v1619_v13, %v1091_v37  ;;  %v813_v50 = vpop.xlane.xlu1 %812 }
 0x2f9   :  { %1624 = vrsqrt.f32 %v1029_v46  ;;  %v966_v35 = vsub.f32 %v902_v59, %v934_v55  ;;  %v903_v21 = vmul.f32 0.03125, %v813_v50  ;;  %v1093_v50 = vsub.f32 %v2171_v42, %v2411_v60 }
 0x2fa   :  { %v1162_v28 = vmul.f32 %v2424_v40, %v1123_v19  ;;  %v719_v63 = vpop.xlane.xlu0 %718 }
 0x2fb   :  { %v998_v0 = vmax.f32 %v966_v35, 0.0  ;;  %v967_v1 = vsub.f32 %v903_v21, %v935_v25  ;;  %v2433_v2 = vmul.f32 0.03125, %v719_v63 }
 0x2fc   :  { %v1201_v3 = vadd.f32 %v2428_v22, %v1162_v28  ;;  %v721_v5 = vpop.xlane.xlu1 %720 }
 0x2fd   :  { %v1621_v6 = vpop.eup %1620  ;;  %v1030_v7 = vadd.f32 1e-05, %v998_v0  ;;  %v999_v8 = vmax.f32 %v967_v1, 0.0  ;;  %v2437_v12 = vmul.f32 0.03125, %v721_v5  ;;  %v936_v37 = vmul.f32 %v2433_v2, %v2433_v2 }
 0x2fe   :  { %1233 = vst [vmem:[#allocation14 + $0x8] sm:$0xff] %v1201_v3  ;;  %v1122_v10 = vmul.f32 %v1621_v6, %v1090_v4  ;;  %v815_v53 = vpop.xlane.xlu0 %814 }
 0x2ff   :  { %1626 = vrsqrt.f32 %v1030_v7  ;;  %v1031_v36 = vadd.f32 1e-05, %v999_v8  ;;  %v904_v23 = vmul.f32 0.03125, %v815_v53  ;;  %v937_v55 = vmul.f32 %v2437_v12, %v2437_v12 }
 0x300   :  { %v1161_v13 = vmul.f32 %v2424_v40, %v1122_v10  ;;  %v817_v38 = vpop.xlane.xlu1 %816 }
 0x301   :  { %v1623_v46 = vpop.eup %1622  ;;  %1628 = vrsqrt.f32 %v1031_v36  ;;  %v968_v59 = vsub.f32 %v904_v23, %v936_v37  ;;  %v905_v19 = vmul.f32 0.03125, %v817_v38  ;;  %v1094_v37 = vsub.f32 %v2186_v43, %v2419_v11 }
 0x302   :  { %v1200_v25 = vadd.f32 %v2428_v22, %v1161_v13  ;;  %v1124_v35 = vmul.f32 %v1623_v46, %v1092_v30  ;;  %v723_v21 = vpop.xlane.xlu0 %722 }
 0x303   :  { %v1625_v28 = vpop.eup %1624  ;;  %v1000_v63 = vmax.f32 %v968_v59, 0.0  ;;  %v969_v0 = vsub.f32 %v905_v19, %v937_v55  ;;  %v2449_v1 = vmul.f32 0.03125, %v723_v21  ;;  %v1095_v55 = vsub.f32 %v2191_v45, %v2422_v54 }
 0x304   :  { %1232 = vst [vmem:[#allocation14] sm:$0xff] %v1200_v25  ;;  %v1163_v34 = vmul.f32 %v2424_v40, %v1124_v35  ;;  %v1125_v29 = vmul.f32 %v1625_v28, %v1093_v50  ;;  %v725_v3 = vpop.xlane.xlu1 %724 }
 0x305   :  { %v1032_v4 = vadd.f32 1e-05, %v1000_v63  ;;  %v1001_v5 = vmax.f32 %v969_v0, 0.0  ;;  %v2454_v60 = vmul.f32 0.03125, %v725_v3  ;;  %v938_v10 = vmul.f32 %v2449_v1, %v2449_v1 }
 0x306   :  { %v1202_v6 = vadd.f32 %v2428_v22, %v1163_v34  ;;  %v1164_v42 = vmul.f32 %v2424_v40, %v1125_v29  ;;  %v819_v7 = vpop.xlane.xlu0 %818 }
 0x307   :  { %1630 = vrsqrt.f32 %v1032_v4  ;;  %v1033_v8 = vadd.f32 1e-05, %v1001_v5  ;;  %v906_v53 = vmul.f32 0.03125, %v819_v7  ;;  %v939_v30 = vmul.f32 %v2454_v60, %v2454_v60 }
 0x308   :  { %1234 = vst [vmem:[#allocation14 + $0x10] sm:$0xff] %v1202_v6  ;;  %v1203_v36 = vadd.f32 %v2428_v22, %v1164_v42  ;;  %v821_v23 = vpop.xlane.xlu1 %820  ;;  %v1096_v42 = vsub.f32 %v2200_v16, %v2433_v2 }
 0x309   :  { %v1627_v13 = vpop.eup %1626  ;;  %1632 = vrsqrt.f32 %v1033_v8  ;;  %v970_v38 = vsub.f32 %v906_v53, %v938_v10  ;;  %v907_v46 = vmul.f32 0.03125, %v821_v23 }
 0x30a   :  { %1235 = vst [vmem:[#allocation14 + $0x18] sm:$0xff] %v1203_v36  ;;  %v1126_v59 = vmul.f32 %v1627_v13, %v1094_v37  ;;  %v727_v19 = vpop.xlane.xlu0 %726  ;;  %v1097_v37 = vsub.f32 %v2205_v20, %v2437_v12 }
 0x30b   :  { %v1629_v50 = vpop.eup %1628  ;;  %v1002_v25 = vmax.f32 %v970_v38, 0.0  ;;  %v971_v35 = vsub.f32 %v907_v46, %v939_v30  ;;  %v2465_v21 = vmul.f32 0.03125, %v727_v19 }
 0x30c   :  { %v1165_v43 = vmul.f32 %v2424_v40, %v1126_v59  ;;  %v1127_v11 = vmul.f32 %v1629_v50, %v1095_v55  ;;  %v729_v28 = vpop.xlane.xlu1 %728 }
 0x30d   :  { %v1034_v63 = vadd.f32 1e-05, %v1002_v25  ;;  %v1003_v0 = vmax.f32 %v971_v35, 0.0  ;;  %v2470_v3 = vmul.f32 0.03125, %v729_v28  ;;  %v940_v4 = vmul.f32 %v2465_v21, %v2465_v21 }
 0x30e   :  { %v1204_v34 = vadd.f32 %v2428_v22, %v1165_v43  ;;  %v1166_v29 = vmul.f32 %v2424_v40, %v1127_v11  ;;  %v823_v45 = vpop.xlane.xlu0 %822 }
 0x30f   :  { %1634 = vrsqrt.f32 %v1034_v63  ;;  %v1035_v54 = vadd.f32 1e-05, %v1003_v0  ;;  %v908_v5 = vmul.f32 0.03125, %v823_v45  ;;  %v941_v10 = vmul.f32 %v2470_v3, %v2470_v3 }
 0x310   :  { %1236 = vst [vmem:[#allocation14 + $0x20] sm:$0xff] %v1204_v34  ;;  %v1205_v6 = vadd.f32 %v2428_v22, %v1166_v29  ;;  %v825_v7 = vpop.xlane.xlu1 %824  ;;  %v1098_v0 = vsub.f32 %v2214_v27, %v2449_v1 }
 0x311   :  { %v1631_v8 = vpop.eup %1630  ;;  %1636 = vrsqrt.f32 %v1035_v54  ;;  %v972_v53 = vsub.f32 %v908_v5, %v940_v4  ;;  %v909_v36 = vmul.f32 0.03125, %v825_v7  ;;  %v1099_v5 = vsub.f32 %v2225_v32, %v2454_v60 }
 0x312   :  { %1237 = vst [vmem:[#allocation14 + $0x28] sm:$0xff] %v1205_v6  ;;  %v1128_v23 = vmul.f32 %v1631_v8, %v1096_v42  ;;  %v731_v13 = vpop.xlane.xlu0 %730 }
 0x313   :  { %v1633_v30 = vpop.eup %1632  ;;  %v1004_v38 = vmax.f32 %v972_v53, 0.0  ;;  %v973_v46 = vsub.f32 %v909_v36, %v941_v10  ;;  %v2481_v55 = vmul.f32 0.03125, %v731_v13 }
 0x314   :  { %v1167_v16 = vmul.f32 %v2424_v40, %v1128_v23  ;;  %v1129_v2 = vmul.f32 %v1633_v30, %v1097_v37  ;;  %v733_v59 = vpop.xlane.xlu1 %732 }
 0x315   :  { %v1036_v19 = vadd.f32 1e-05, %v1004_v38  ;;  %v1005_v50 = vmax.f32 %v973_v46, 0.0  ;;  %v2486_v43 = vmul.f32 0.03125, %v733_v59  ;;  %v942_v11 = vmul.f32 %v2481_v55, %v2481_v55 }
 0x316   :  { %v1206_v25 = vadd.f32 %v2428_v22, %v1167_v16  ;;  %v1168_v35 = vmul.f32 %v2424_v40, %v1129_v2  ;;  %v827_v20 = vpop.xlane.xlu0 %826  ;;  %v1100_v59 = vsub.f32 %v2240_v47, %v2465_v21 }
 0x317   :  { %1638 = vrsqrt.f32 %v1036_v19  ;;  %v1037_v12 = vadd.f32 1e-05, %v1005_v50  ;;  %v910_v28 = vmul.f32 0.03125, %v827_v20  ;;  %v943_v45 = vmul.f32 %v2486_v43, %v2486_v43 }
 0x318   :  { %1238 = vst [vmem:[#allocation14 + $0x30] sm:$0xff] %v1206_v25  ;;  %v1207_v63 = vadd.f32 %v2428_v22, %v1168_v35  ;;  %v829_v34 = vpop.xlane.xlu1 %828 }
 0x319   :  { %v1635_v29 = vpop.eup %1634  ;;  %1640 = vrsqrt.f32 %v1037_v12  ;;  %v974_v54 = vsub.f32 %v910_v28, %v942_v11  ;;  %v911_v4 = vmul.f32 0.03125, %v829_v34  ;;  %v1101_v12 = vsub.f32 %v2249_v49, %v2470_v3 }
 0x31a   :  { %1239 = vst [vmem:[#allocation14 + $0x38] sm:$0xff] %v1207_v63  ;;  %v1130_v6 = vmul.f32 %v1635_v29, %v1098_v0  ;;  %v735_v42 = vpop.xlane.xlu0 %734 }
 0x31b   :  { %v1637_v7 = vpop.eup %1636  ;;  %v1006_v8 = vmax.f32 %v974_v54, 0.0  ;;  %v975_v10 = vsub.f32 %v911_v4, %v943_v45  ;;  %v2497_v53 = vmul.f32 0.03125, %v735_v42 }
 0x31c   :  { %v1169_v27 = vmul.f32 %v2424_v40, %v1130_v6  ;;  %v1131_v1 = vmul.f32 %v1637_v7, %v1099_v5  ;;  %v737_v36 = vpop.xlane.xlu1 %736 }
 0x31d   :  { %v1038_v37 = vadd.f32 1e-05, %v1006_v8  ;;  %v1007_v23 = vmax.f32 %v975_v10, 0.0  ;;  %v2502_v38 = vmul.f32 0.03125, %v737_v36  ;;  %v944_v46 = vmul.f32 %v2497_v53, %v2497_v53 }
 0x31e   :  { %v1208_v13 = vadd.f32 %v2428_v22, %v1169_v27  ;;  %v1170_v30 = vmul.f32 %v2424_v40, %v1131_v1  ;;  %v831_v32 = vpop.xlane.xlu0 %830  ;;  %v1102_v27 = vsub.f32 %v2262_v56, %v2481_v55 }
 0x31f   :  { %1642 = vrsqrt.f32 %v1038_v37  ;;  %v1039_v60 = vadd.f32 1e-05, %v1007_v23  ;;  %v912_v16 = vmul.f32 0.03125, %v831_v32  ;;  %v945_v25 = vmul.f32 %v2502_v38, %v2502_v38 }
 0x320   :  { %1240 = vst [vmem:[#allocation14 + $0x40] sm:$0xff] %v1208_v13  ;;  %v1209_v2 = vadd.f32 %v2428_v22, %v1170_v30  ;;  %v833_v19 = vpop.xlane.xlu1 %832  ;;  %v1103_v30 = vsub.f32 %v2271_v31, %v2486_v43 }
 0x321   :  { %v1639_v50 = vpop.eup %1638  ;;  %1644 = vrsqrt.f32 %v1039_v60  ;;  %v976_v35 = vsub.f32 %v912_v16, %v944_v46  ;;  %v913_v20 = vmul.f32 0.03125, %v833_v19 }
 0x322   :  { %1241 = vst [vmem:[#allocation14 + $0x48] sm:$0xff] %v1209_v2  ;;  %v1132_v11 = vmul.f32 %v1639_v50, %v1100_v59  ;;  %v739_v28 = vpop.xlane.xlu0 %738 }
 0x323   :  { %v1641_v63 = vpop.eup %1640  ;;  %v1008_v0 = vmax.f32 %v976_v35, 0.0  ;;  %v977_v34 = vsub.f32 %v913_v20, %v945_v25  ;;  %v2513_v29 = vmul.f32 0.03125, %v739_v28 }
 0x324   :  { %v1171_v47 = vmul.f32 %v2424_v40, %v1132_v11  ;;  %v1133_v21 = vmul.f32 %v1641_v63, %v1101_v12  ;;  %v741_v45 = vpop.xlane.xlu1 %740 }
 0x325   :  { %v1040_v54 = vadd.f32 1e-05, %v1008_v0  ;;  %v1009_v4 = vmax.f32 %v977_v34, 0.0  ;;  %v2518_v42 = vmul.f32 0.03125, %v741_v45  ;;  %v946_v7 = vmul.f32 %v2513_v29, %v2513_v29 }
 0x326   :  { %v1210_v5 = vadd.f32 %v2428_v22, %v1171_v47  ;;  %v1172_v6 = vmul.f32 %v2424_v40, %v1133_v21  ;;  %v835_v49 = vpop.xlane.xlu0 %834  ;;  %v1104_v0 = vsub.f32 %v2284_v58, %v2497_v53 }
 0x327   :  { %1646 = vrsqrt.f32 %v1040_v54  ;;  %v1041_v3 = vadd.f32 1e-05, %v1009_v4  ;;  %v914_v8 = vmul.f32 0.03125, %v835_v49  ;;  %v947_v37 = vmul.f32 %v2518_v42, %v2518_v42 }
 0x328   :  { %1242 = vst [vmem:[#allocation14 + $0x50] sm:$0xff] %v1210_v5  ;;  %v1211_v10 = vadd.f32 %v2428_v22, %v1172_v6  ;;  %v837_v1 = vpop.xlane.xlu1 %836  ;;  %v1105_v4 = vsub.f32 %v2293_v48, %v2502_v38 }
 0x329   :  { %v1643_v36 = vpop.eup %1642  ;;  %1648 = vrsqrt.f32 %v1041_v3  ;;  %v978_v23 = vsub.f32 %v914_v8, %v946_v7  ;;  %v915_v13 = vmul.f32 0.03125, %v837_v1 }
 0x32a   :  { %1243 = vst [vmem:[#allocation14 + $0x58] sm:$0xff] %v1211_v10  ;;  %v1134_v32 = vmul.f32 %v1643_v36, %v1102_v27  ;;  %v743_v60 = vpop.xlane.xlu0 %742 }
 0x32b   :  { %v1645_v46 = vpop.eup %1644  ;;  %v1010_v16 = vmax.f32 %v978_v23, 0.0  ;;  %v979_v2 = vsub.f32 %v915_v13, %v947_v37  ;;  %v2529_v59 = vmul.f32 0.03125, %v743_v60  ;;  %v1106_v60 = vsub.f32 %v2305_v51, %v2513_v29 }
 0x32c   :  { %v1173_v56 = vmul.f32 %v2424_v40, %v1134_v32  ;;  %v1135_v55 = vmul.f32 %v1645_v46, %v1103_v30  ;;  %v745_v19 = vpop.xlane.xlu1 %744 }
 0x32d   :  { %v1042_v50 = vadd.f32 1e-05, %v1010_v16  ;;  %v1011_v25 = vmax.f32 %v979_v2, 0.0  ;;  %v2534_v12 = vmul.f32 0.03125, %v745_v19  ;;  %v948_v11 = vmul.f32 %v2529_v59, %v2529_v59 }
 0x32e   :  { %v1212_v35 = vadd.f32 %v2428_v22, %v1173_v56  ;;  %v1174_v20 = vmul.f32 %v2424_v40, %v1135_v55  ;;  %v839_v31 = vpop.xlane.xlu0 %838  ;;  %v1107_v19 = vsub.f32 %v2311_v18, %v2518_v42 }
 0x32f   :  { %1650 = vrsqrt.f32 %v1042_v50  ;;  %v1043_v43 = vadd.f32 1e-05, %v1011_v25  ;;  %v916_v28 = vmul.f32 0.03125, %v839_v31  ;;  %v949_v21 = vmul.f32 %v2534_v12, %v2534_v12 }
 0x330   :  { %1244 = vst [vmem:[#allocation14 + $0x60] sm:$0xff] %v1212_v35  ;;  %v1213_v63 = vadd.f32 %v2428_v22, %v1174_v20  ;;  %v841_v34 = vpop.xlane.xlu1 %840 }
 0x331   :  { %v1647_v47 = vpop.eup %1646  ;;  %1652 = vrsqrt.f32 %v1043_v43  ;;  %v980_v45 = vsub.f32 %v916_v28, %v948_v11  ;;  %v917_v54 = vmul.f32 0.03125, %v841_v34 }
 0x332   :  { %1245 = vst [vmem:[#allocation14 + $0x68] sm:$0xff] %v1213_v63  ;;  %v1136_v5 = vmul.f32 %v1647_v47, %v1104_v0  ;;  %v747_v6 = vpop.xlane.xlu0 %746 }
 0x333   :  { %v1649_v49 = vpop.eup %1648  ;;  %v1012_v3 = vmax.f32 %v980_v45, 0.0  ;;  %v981_v7 = vsub.f32 %v917_v54, %v949_v21  ;;  %v2545_v8 = vmul.f32 0.03125, %v747_v6 }
 0x334   :  { %v1175_v58 = vmul.f32 %v2424_v40, %v1136_v5  ;;  %v1137_v53 = vmul.f32 %v1649_v49, %v1105_v4  ;;  %v749_v10 = vpop.xlane.xlu1 %748  ;;  %v1108_v4 = vsub.f32 %v2319_v61, %v2529_v59 }
 0x335   :  { %v1044_v27 = vadd.f32 1e-05, %v1012_v3  ;;  %v1013_v1 = vmax.f32 %v981_v7, 0.0  ;;  %v2550_v23 = vmul.f32 0.03125, %v749_v10  ;;  %v950_v13 = vmul.f32 %v2545_v8, %v2545_v8 }
 0x336   :  { %v1214_v36 = vadd.f32 %v2428_v22, %v1175_v58  ;;  %v1176_v37 = vmul.f32 %v2424_v40, %v1137_v53  ;;  %v843_v48 = vpop.xlane.xlu0 %842  ;;  %v1109_v58 = vsub.f32 %v2325_v62, %v2534_v12 }
 0x337   :  { %1654 = vrsqrt.f32 %v1044_v27  ;;  %v1045_v38 = vadd.f32 1e-05, %v1013_v1  ;;  %v918_v30 = vmul.f32 0.03125, %v843_v48  ;;  %v951_v2 = vmul.f32 %v2550_v23, %v2550_v23 }
 0x338   :  { %1246 = vst [vmem:[#allocation14 + $0x70] sm:$0xff] %v1214_v36  ;;  %v1215_v32 = vadd.f32 %v2428_v22, %v1176_v37  ;;  %v845_v46 = vpop.xlane.xlu1 %844 }
 0x339   :  { %v1651_v16 = vpop.eup %1650  ;;  %1656 = vrsqrt.f32 %v1045_v38  ;;  %v982_v56 = vsub.f32 %v918_v30, %v950_v13  ;;  %v919_v55 = vmul.f32 0.03125, %v845_v46 }
 0x33a   :  { %1247 = vst [vmem:[#allocation14 + $0x78] sm:$0xff] %v1215_v32  ;;  %v1138_v50 = vmul.f32 %v1651_v16, %v1106_v60  ;;  %v751_v25 = vpop.xlane.xlu0 %750 }
 0x33b   :  { %v1653_v35 = vpop.eup %1652  ;;  %v1014_v20 = vmax.f32 %v982_v56, 0.0  ;;  %v983_v31 = vsub.f32 %v919_v55, %v951_v2  ;;  %v2561_v43 = vmul.f32 0.03125, %v751_v25  ;;  %v1110_v56 = vsub.f32 %v2332_v26, %v2545_v8 }
 0x33c   :  { %v1177_v51 = vmul.f32 %v2424_v40, %v1138_v50  ;;  %v1139_v29 = vmul.f32 %v1653_v35, %v1107_v19  ;;  %v753_v11 = vpop.xlane.xlu1 %752 }
 0x33d   :  { %v1046_v28 = vadd.f32 1e-05, %v1014_v20  ;;  %v1015_v63 = vmax.f32 %v983_v31, 0.0  ;;  %v2566_v47 = vmul.f32 0.03125, %v753_v11  ;;  %v952_v21 = vmul.f32 %v2561_v43, %v2561_v43 }
 0x33e   :  { %v1216_v0 = vadd.f32 %v2428_v22, %v1177_v51  ;;  %v1178_v34 = vmul.f32 %v2424_v40, %v1139_v29  ;;  %v847_v18 = vpop.xlane.xlu0 %846  ;;  %v1111_v20 = vsub.f32 %v2338_v9, %v2550_v23 }
 0x33f   :  { %1658 = vrsqrt.f32 %v1046_v28  ;;  %v1047_v42 = vadd.f32 1e-05, %v1015_v63  ;;  %v920_v45 = vmul.f32 0.03125, %v847_v18  ;;  %v953_v49 = vmul.f32 %v2566_v47, %v2566_v47 }
 0x340   :  { %1248 = vst [vmem:[#allocation14 + $0x80] sm:$0xff] %v1216_v0  ;;  %v1217_v54 = vadd.f32 %v2428_v22, %v1178_v34  ;;  %v849_v5 = vpop.xlane.xlu1 %848 }
 0x341   :  { %v1655_v6 = vpop.eup %1654  ;;  %1660 = vrsqrt.f32 %v1047_v42  ;;  %v984_v3 = vsub.f32 %v920_v45, %v952_v21  ;;  %v921_v7 = vmul.f32 0.03125, %v849_v5 }
 0x342   :  { %1249 = vst [vmem:[#allocation14 + $0x88] sm:$0xff] %v1217_v54  ;;  %v1140_v53 = vmul.f32 %v1655_v6, %v1108_v4  ;;  %v755_v10 = vpop.xlane.xlu0 %754  ;;  %v1112_v6 = vsub.f32 %v2345_v33, %v2561_v43 }
 0x343   :  { %v1657_v27 = vpop.eup %1656  ;;  %v1016_v1 = vmax.f32 %v984_v3, 0.0  ;;  %v985_v36 = vsub.f32 %v921_v7, %v953_v49  ;;  %v2577_v37 = vmul.f32 0.03125, %v755_v10  ;;  %v1113_v10 = vsub.f32 %v2351_v41, %v2566_v47 }
 0x344   :  { %v1179_v61 = vmul.f32 %v2424_v40, %v1140_v53  ;;  %v1141_v59 = vmul.f32 %v1657_v27, %v1109_v58  ;;  %v757_v48 = vpop.xlane.xlu1 %756 }
 0x345   :  { %v1048_v38 = vadd.f32 1e-05, %v1016_v1  ;;  %v1017_v13 = vmax.f32 %v985_v36, 0.0  ;;  %v2582_v60 = vmul.f32 0.03125, %v757_v48  ;;  %v954_v46 = vmul.f32 %v2577_v37, %v2577_v37 }
 0x346   :  { %v1218_v30 = vadd.f32 %v2428_v22, %v1179_v61  ;;  %v1180_v32 = vmul.f32 %v2424_v40, %v1141_v59  ;;  %v851_v62 = vpop.xlane.xlu0 %850 }
 0x347   :  { %1662 = vrsqrt.f32 %v1048_v38  ;;  %v1049_v12 = vadd.f32 1e-05, %v1017_v13  ;;  %v922_v16 = vmul.f32 0.03125, %v851_v62  ;;  %v955_v50 = vmul.f32 %v2582_v60, %v2582_v60 }
 0x348   :  { %1250 = vst [vmem:[#allocation14 + $0x90] sm:$0xff] %v1218_v30  ;;  %v1219_v2 = vadd.f32 %v2428_v22, %v1180_v32  ;;  %v853_v55 = vpop.xlane.xlu1 %852 }
 0x349   :  { %v1659_v19 = vpop.eup %1658  ;;  %1664 = vrsqrt.f32 %v1049_v12  ;;  %v986_v25 = vsub.f32 %v922_v16, %v954_v46  ;;  %v923_v35 = vmul.f32 0.03125, %v853_v55 }
 0x34a   :  { %1251 = vst [vmem:[#allocation14 + $0x98] sm:$0xff] %v1219_v2  ;;  %v1142_v31 = vmul.f32 %v1659_v19, %v1110_v56  ;;  %v759_v51 = vpop.xlane.xlu0 %758  ;;  %v1114_v56 = vsub.f32 %v2358_v39, %v2577_v37 }
 0x34b   :  { %v1661_v29 = vpop.eup %1660  ;;  %v1018_v11 = vmax.f32 %v986_v25, 0.0  ;;  %v987_v28 = vsub.f32 %v923_v35, %v955_v50  ;;  %v2593_v63 = vmul.f32 0.03125, %v759_v51 }
 0x34c   :  { %v1181_v26 = vmul.f32 %v2424_v40, %v1142_v31  ;;  %v1143_v8 = vmul.f32 %v1661_v29, %v1111_v20  ;;  %v761_v0 = vpop.xlane.xlu1 %760  ;;  %v1115_v20 = vsub.f32 %v2364_v15, %v2582_v60 }
 0x34d   :  { %v1050_v34 = vadd.f32 1e-05, %v1018_v11  ;;  %v1019_v18 = vmax.f32 %v987_v28, 0.0  ;;  %v2598_v45 = vmul.f32 0.03125, %v761_v0  ;;  %v956_v54 = vmul.f32 %v2593_v63, %v2593_v63 }
 0x34e   :  { %v1220_v42 = vadd.f32 %v2428_v22, %v1181_v26  ;;  %v1182_v21 = vmul.f32 %v2424_v40, %v1143_v8  ;;  %v855_v9 = vpop.xlane.xlu0 %854 }
 0x34f   :  { %1666 = vrsqrt.f32 %v1050_v34  ;;  %v1051_v23 = vadd.f32 1e-05, %v1019_v18  ;;  %v924_v4 = vmul.f32 0.03125, %v855_v9  ;;  %v957_v7 = vmul.f32 %v2598_v45, %v2598_v45 }
 0x350   :  { %1252 = vst [vmem:[#allocation14 + $0xa0] sm:$0xff] %v1220_v42  ;;  %v1221_v5 = vadd.f32 %v2428_v22, %v1182_v21  ;;  %v857_v49 = vpop.xlane.xlu1 %856 }
 0x351   :  { %v1663_v3 = vpop.eup %1662  ;;  %1668 = vrsqrt.f32 %v1051_v23  ;;  %v988_v58 = vsub.f32 %v924_v4, %v956_v54  ;;  %v925_v53 = vmul.f32 0.03125, %v857_v49  ;;  %v1116_v4 = vsub.f32 %v2371_v44, %v2593_v63 }
 0x352   :  { %1253 = vst [vmem:[#allocation14 + $0xa8] sm:$0xff] %v1221_v5  ;;  %v1144_v27 = vmul.f32 %v1663_v3, %v1112_v6  ;;  %v763_v1 = vpop.xlane.xlu0 %762 }
 0x353   :  { %v1665_v36 = vpop.eup %1664  ;;  %v1020_v61 = vmax.f32 %v988_v58, 0.0  ;;  %v989_v59 = vsub.f32 %v925_v53, %v957_v7  ;;  %v2609_v48 = vmul.f32 0.03125, %v763_v1  ;;  %v1117_v58 = vsub.f32 %v2377_v52, %v2598_v45 }
 0x354   :  { %v1183_v33 = vmul.f32 %v2424_v40, %v1144_v27  ;;  %v1145_v43 = vmul.f32 %v1665_v36, %v1113_v10  ;;  %v765_v38 = vpop.xlane.xlu1 %764 }
 0x355   :  { %v1052_v13 = vadd.f32 1e-05, %v1020_v61  ;;  %v1021_v30 = vmax.f32 %v989_v59, 0.0  ;;  %v2614_v12 = vmul.f32 0.03125, %v765_v38  ;;  %v958_v46 = vmul.f32 %v2609_v48, %v2609_v48 }
 0x356   :  { %v1222_v32 = vadd.f32 %v2428_v22, %v1183_v33  ;;  %v1184_v62 = vmul.f32 %v2424_v40, %v1145_v43  ;;  %v859_v41 = vpop.xlane.xlu0 %858  ;;  %v1118_v52 = vsub.f32 %v2384_v24, %v2609_v48 }
 0x357   :  { %1670 = vrsqrt.f32 %v1052_v13  ;;  %v1053_v47 = vadd.f32 1e-05, %v1021_v30  ;;  %v926_v16 = vmul.f32 0.03125, %v859_v41  ;;  %v959_v50 = vmul.f32 %v2614_v12, %v2614_v12 }
 0x358   :  { %1254 = vst [vmem:[#allocation14 + $0xb0] sm:$0xff] %v1222_v32  ;;  %v1223_v2 = vadd.f32 %v2428_v22, %v1184_v62  ;;  %v861_v55 = vpop.xlane.xlu1 %860  ;;  %v1119_v13 = vsub.f32 %v2390_v17, %v2614_v12 }
 0x359   :  { %v1667_v19 = vpop.eup %1666  ;;  %1672 = vrsqrt.f32 %v1053_v47  ;;  %v990_v25 = vsub.f32 %v926_v16, %v958_v46  ;;  %v927_v35 = vmul.f32 0.03125, %v861_v55 }
 0x35a   :  { %1255 = vst [vmem:[#allocation14 + $0xb8] sm:$0xff] %v1223_v2  ;;  %v1146_v31 = vmul.f32 %v1667_v19, %v1114_v56  ;;  %v767_v51 = vpop.xlane.xlu0 %766 }
 0x35b   :  { %v1669_v29 = vpop.eup %1668  ;;  %v1022_v11 = vmax.f32 %v990_v25, 0.0  ;;  %v991_v28 = vsub.f32 %v927_v35, %v959_v50  ;;  %v896_v26 = vmul.f32 0.03125, %v767_v51 }
 0x35c   :  { %v1185_v39 = vmul.f32 %v2424_v40, %v1146_v31  ;;  %v1147_v37 = vmul.f32 %v1669_v29, %v1115_v20  ;;  %v769_v8 = vpop.xlane.xlu1 %768 }
 0x35d   :  { %v1054_v0 = vadd.f32 1e-05, %v1022_v11  ;;  %v1023_v34 = vmax.f32 %v991_v28, 0.0  ;;  %v897_v21 = vmul.f32 0.03125, %v769_v8  ;;  %v960_v60 = vmul.f32 %v896_v26, %v896_v26 }
 0x35e   :  { %v1224_v18 = vadd.f32 %v2428_v22, %v1185_v39  ;;  %v1186_v42 = vmul.f32 %v2424_v40, %v1147_v37  ;;  %v863_v9 = vpop.xlane.xlu0 %862  ;;  %v1120_v24 = vsub.f32 %v2397_v57, %v896_v26 }
 0x35f   :  { %1674 = vrsqrt.f32 %v1054_v0  ;;  %v1055_v15 = vadd.f32 1e-05, %v1023_v34  ;;  %v928_v23 = vmul.f32 0.03125, %v863_v9  ;;  %v961_v49 = vmul.f32 %v897_v21, %v897_v21 }
 0x360   :  { %1256 = vst [vmem:[#allocation14 + $0xc0] sm:$0xff] %v1224_v18  ;;  %v1225_v54 = vadd.f32 %v2428_v22, %v1186_v42  ;;  %v865_v5 = vpop.xlane.xlu1 %864  ;;  %v1121_v2 = vsub.f32 %v2403_v14, %v897_v21 }
 0x361   :  { %v1671_v6 = vpop.eup %1670  ;;  %1676 = vrsqrt.f32 %v1055_v15  ;;  %v992_v3 = vsub.f32 %v928_v23, %v960_v60  ;;  %v929_v7 = vmul.f32 0.03125, %v865_v5 }
 0x362   :  { %1257 = vst [vmem:[#allocation14 + $0xc8] sm:$0xff] %v1225_v54  ;;  %v1148_v53 = vmul.f32 %v1671_v6, %v1116_v4 }
 0x363   :  { %v1673_v10 = vpop.eup %1672  ;;  %v1024_v27 = vmax.f32 %v992_v3, 0.0  ;;  %v993_v1 = vsub.f32 %v929_v7, %v961_v49 }
 0x364   :  { %v1187_v36 = vmul.f32 %v2424_v40, %v1148_v53  ;;  %v1149_v61 = vmul.f32 %v1673_v10, %v1117_v58 }
 0x365   :  { %v1056_v59 = vadd.f32 1e-05, %v1024_v27  ;;  %v1025_v33 = vmax.f32 %v993_v1, 0.0 }
 0x366   :  { %v1226_v44 = vadd.f32 %v2428_v22, %v1187_v36  ;;  %v1188_v63 = vmul.f32 %v2424_v40, %v1149_v61 }
 0x367   :  { %1678 = vrsqrt.f32 %v1056_v59  ;;  %v1057_v43 = vadd.f32 1e-05, %v1025_v33 }
 0x368   :  { %1258 = vst [vmem:[#allocation14 + $0xd0] sm:$0xff] %v1226_v44  ;;  %v1227_v38 = vadd.f32 %v2428_v22, %v1188_v63 }
 0x369   :  { %v1675_v45 = vpop.eup %1674  ;;  %1680 = vrsqrt.f32 %v1057_v43 }
 0x36a   :  { %1259 = vst [vmem:[#allocation14 + $0xd8] sm:$0xff] %v1227_v38  ;;  %v1150_v30 = vmul.f32 %v1675_v45, %v1118_v52 }
 0x36b   :  { %v1677_v32 = vpop.eup %1676 }
 0x36c   :  { %v1189_v62 = vmul.f32 %v2424_v40, %v1150_v30  ;;  %v1151_v41 = vmul.f32 %v1677_v32, %v1119_v13 }
 0x36e   :  { %v1228_v47 = vadd.f32 %v2428_v22, %v1189_v62  ;;  %v1190_v46 = vmul.f32 %v2424_v40, %v1151_v41 }
 0x370   :  { %1260 = vst [vmem:[#allocation14 + $0xe0] sm:$0xff] %v1228_v47  ;;  %v1229_v16 = vadd.f32 %v2428_v22, %v1190_v46 }
 0x371   :  { %v1679_v48 = vpop.eup %1678 }
 0x372   :  { %1261 = vst [vmem:[#allocation14 + $0xe8] sm:$0xff] %v1229_v16  ;;  %v1152_v56 = vmul.f32 %v1679_v48, %v1120_v24 }
 0x373   :  { %v1681_v17 = vpop.eup %1680 }
 0x374   :  { %v1191_v12 = vmul.f32 %v2424_v40, %v1152_v56  ;;  %v1153_v55 = vmul.f32 %v1681_v17, %v1121_v2 }
 0x376   :  { %v1230_v19 = vadd.f32 %v2428_v22, %v1191_v12  ;;  %v1192_v50 = vmul.f32 %v2424_v40, %v1153_v55 }
 0x378   :  { %1262 = vst [vmem:[#allocation14 + $0xf0] sm:$0xff] %v1230_v19  ;;  %v1231_v25 = vadd.f32 %v2428_v22, %v1192_v50 }
 0x37a   :  { %1263 = vst [vmem:[#allocation14 + $0xf8] sm:$0xff] %v1231_v25 }
 0x37b   :  { %1847 = shalt.err (!%p1844_p4)
}
 0x37c   :  { %s1848_s20 = scalar_lea.hbm %s2673_s7, 4096 }
 0x37d   :  { %p1849_p5 = scmp.ne.s32.totalorder %s2673_s7, %s1848_s20  ;;  %p1852_p6 = scmp.lt.u32.totalorder %s1848_s20, %s2673_s7 }
 0x37f   :  { %p1854_p7 = pnand %p1852_p6, %p1849_p5 }
 0x381   :  { %1857 = shalt.err (!%p1854_p7)
}
 0x382   :  { %1275 = dma.vmem_to_hbm [thread:$0]  %s1270_s30, 4096, %s2673_s7, [#allocation4], %s1870_s13, %s1870_s13, %s1871_s14  }
 0x383   :  { %1866 = dma.done.wait [#allocation4], 4096  }
 0x384   :  { %1867 = vsyncadd [#allocation4], 4294963200 }
 0x385   :  { %1279 = vsyncpa [#allocation3], 1 }
 0x386   :  { %1280 = vsyncpa [#allocation6], 1 }
 0x387   :  { %1281 = vsyncpa [#allocation9], 1 }
 0x388   :  { %1282 = vsyncpa [#allocation12], 1 }
 0x389   :  { %1283 = vsyncpa [#allocation4], 1 }

// kernel: tpu_custom_call.1
= control target key start
LH: loop header
LB: loop body
LE: loop exit
PB: predicated region body
PF: predicated region fallthrough
CT: control target
= control target key end

     0   :  { %12 = vsyncpa [#allocation3], 0  ;;  %s2666_s0 = inlined_call_operand.hbm [shape: f32[256,128], index: 0, kind: input, shape index: {}]   ;;  %s2667_s1 = inlined_call_operand.hbm [shape: f32[128,128], index: 1, kind: input, shape index: {}]   ;;  %s2668_s2 = inlined_call_operand.hbm [shape: f32[1,128], index: 2, kind: input, shape index: {}]   ;;  %s2669_s3 = inlined_call_operand.hbm [shape: f32[128,128], index: 3, kind: input, shape index: {}]   ;;  %s2670_s4 = inlined_call_operand.hbm [shape: f32[1,128], index: 4, kind: input, shape index: {}]   ;;  %s2671_s5 = inlined_call_operand.hbm [shape: f32[1,128], index: 5, kind: input, shape index: {}]   ;;  %s2672_s6 = inlined_call_operand.hbm [shape: f32[1,128], index: 6, kind: input, shape index: {}]   ;;  %s2673_s7 = inlined_call_operand.hbm [shape: f32[256,128], index: 7, kind: output, shape index: {}]  }
   0x1   :  { %13 = vsyncpa [#allocation6], 0 }
   0x2   :  { %14 = vsyncpa [#allocation9], 0 }
   0x3   :  { %15 = vsyncpa [#allocation12], 0 }
   0x4   :  { %16 = vsyncpa [#allocation4], 0  ;;  %s1868_s24 = smov [#allocation5]   ;;  %s1869_s26 = smov [#allocation8]  }
   0x5   :  { %s34_s25 = sshll.u32 %s1868_s24, 4  ;;  %s56_s27 = sshll.u32 %s1869_s26, 4  ;;  %s35_s25 = int_to_ptr.vmem [resolvable:$true] %s34_s25  ;;  %s1918_s27 = int_to_ptr.vmem [resolvable:$true] %s56_s27 }
   0x6   :  { %s1682_s30 = scalar_lea.hbm %s2667_s1, 2048 }
   0x7   :  { %p1683_p0 = scmp.ne.s32.totalorder %s2667_s1, %s1682_s30  ;;  %p1686_p1 = scmp.lt.u32.totalorder %s1682_s30, %s2667_s1 }
   0x9   :  { %p1688_p2 = pnand %p1686_p1, %p1683_p0 }
   0xb   :  { %1691 = shalt.err (!%p1688_p2)
}
   0xc   :  { %s1692_s12 = scalar_lea.vmem %s35_s25, 2048  ;;  %p1697_p4 = scmp.lt.s32.totalorder %s35_s25, %s35_s25 }
   0xd   :  { %p1693_p3 = scmp.ne.s32.totalorder %s35_s25, %s1692_s12  ;;  %p1698_p5 = scmp.lt.s32.totalorder %s1692_s12, %s1692_s12 }
   0xf   :  { %p1699_p6 = por %p1698_p5, %p1697_p4 }
  0x11   :  { %p1700_p7 = pnand %p1699_p6, %p1693_p3 }
  0x13   :  { %1703 = shalt.err (!%p1700_p7)
}
  0x14   :  { %s1870_s13 = smov 128   ;;  %s1871_s14 = smov 8  }
  0x15   :  { %40 = dma.hbm_to_vmem [thread:$0]  %s2667_s1, 2048, %s35_s25, [#allocation6], %s1870_s13, %s1870_s13, %s1871_s14  }
  0x16   :  { %s1704_s19 = scalar_lea.hbm %s2669_s3, 2048 }
  0x17   :  { %p1705_p8 = scmp.ne.s32.totalorder %s2669_s3, %s1704_s19  ;;  %p1708_p9 = scmp.lt.u32.totalorder %s1704_s19, %s2669_s3 }
  0x19   :  { %p1710_p10 = pnand %p1708_p9, %p1705_p8 }
  0x1b   :  { %1713 = shalt.err (!%p1710_p10)
}
  0x1c   :  { %s1714_s24 = scalar_lea.vmem %s1918_s27, 2048  ;;  %p1719_p12 = scmp.lt.s32.totalorder %s1918_s27, %s1918_s27 }
  0x1d   :  { %p1715_p11 = scmp.ne.s32.totalorder %s1918_s27, %s1714_s24  ;;  %p1720_p13 = scmp.lt.s32.totalorder %s1714_s24, %s1714_s24 }
  0x1f   :  { %p1721_p0 = por %p1720_p13, %p1719_p12 }
  0x21   :  { %p1722_p1 = pnand %p1721_p0, %p1715_p11 }
  0x23   :  { %1725 = shalt.err (!%p1722_p1)
}
  0x24   :  { %62 = dma.hbm_to_vmem [thread:$0]  %s2669_s3, 2048, %s1918_s27, [#allocation9], %s1870_s13, %s1870_s13, %s1871_s14  }
  0x25   :  { %s1872_s26 = smov [#allocation11]   ;;  %s1873_s29 = smov [#allocation2]  }
  0x26   :  { %s79_s28 = sshll.u32 %s1872_s26, 4  ;;  %s22_s30 = sshll.u32 %s1873_s29, 4  ;;  %s80_s28 = int_to_ptr.vmem [resolvable:$true] %s79_s28  ;;  %s1955_s30 = int_to_ptr.vmem [resolvable:$true] %s22_s30 }
  0x27   :  { %s1726_s10 = scalar_lea.hbm %s2671_s5, 16 }
  0x28   :  { %p1727_p2 = scmp.ne.s32.totalorder %s2671_s5, %s1726_s10  ;;  %p1730_p3 = scmp.lt.u32.totalorder %s1726_s10, %s2671_s5 }
  0x2a   :  { %p1732_p4 = pnand %p1730_p3, %p1727_p2 }
  0x2c   :  { %1735 = shalt.err (!%p1732_p4)
}
  0x2d   :  { %s1736_s3 = scalar_lea.vmem %s80_s28, 16  ;;  %s1740_s27 = scalar_lea.vmem %s80_s28, 32 }
  0x2e   :  { %p1737_p5 = scmp.ne.s32.totalorder %s80_s28, %s1736_s3  ;;  %p1741_p6 = scmp.lt.s32.totalorder %s80_s28, %s80_s28 }
  0x2f   :  { %p1742_p7 = scmp.lt.s32.totalorder %s1740_s27, %s1736_s3 }
  0x31   :  { %p1743_p8 = por %p1742_p7, %p1741_p6 }
  0x33   :  { %p1744_p9 = pnand %p1743_p8, %p1737_p5 }
  0x35   :  { %1747 = shalt.err (!%p1744_p9)
}
  0x36   :  { %82 = dma.hbm_to_vmem [thread:$0]  %s2671_s5, 16, %s80_s28, [#allocation12]  }
  0x37   :  { %s1748_s21 = scalar_lea.hbm %s2666_s0, 4096 }
  0x38   :  { %p1749_p10 = scmp.ne.s32.totalorder %s2666_s0, %s1748_s21  ;;  %p1752_p11 = scmp.lt.u32.totalorder %s1748_s21, %s2666_s0 }
  0x3a   :  { %p1754_p12 = pnand %p1752_p11, %p1749_p10 }
  0x3c   :  { %1757 = shalt.err (!%p1754_p12)
}
  0x3d   :  { %s1758_s25 = scalar_lea.vmem %s1955_s30, 4096  ;;  %p1763_p0 = scmp.lt.s32.totalorder %s1955_s30, %s1955_s30 }
  0x3e   :  { %p1759_p13 = scmp.ne.s32.totalorder %s1955_s30, %s1758_s25  ;;  %p1764_p1 = scmp.lt.s32.totalorder %s1758_s25, %s1758_s25 }
  0x40   :  { %p1765_p2 = por %p1764_p1, %p1763_p0 }
  0x42   :  { %p1766_p3 = pnand %p1765_p2, %p1759_p13 }
  0x44   :  { %1769 = shalt.err (!%p1766_p3)
}
  0x45   :  { %28 = dma.hbm_to_vmem [thread:$0]  %s2666_s0, 4096, %s1955_s30, [#allocation3], %s1870_s13, %s1870_s13, %s1871_s14  }
  0x46   :  { %s1874_s28 = smov [#allocation7]   ;;  %s1875_s8 = smov [#allocation10]  }
  0x47   :  { %s47_s29 = sshll.u32 %s1874_s28, 4  ;;  %s69_s9 = sshll.u32 %s1875_s8, 4  ;;  %s48_s29 = int_to_ptr.vmem [resolvable:$true] %s47_s29  ;;  %s70_s9 = int_to_ptr.vmem [resolvable:$true] %s69_s9 }
  0x48   :  { %s1770_s12 = scalar_lea.hbm %s2668_s2, 16 }
  0x49   :  { %p1771_p4 = scmp.ne.s32.totalorder %s2668_s2, %s1770_s12  ;;  %p1774_p5 = scmp.lt.u32.totalorder %s1770_s12, %s2668_s2 }
  0x4b   :  { %p1776_p6 = pnand %p1774_p5, %p1771_p4 }
  0x4d   :  { %1779 = shalt.err (!%p1776_p6)
}
  0x4e   :  { %s1780_s0 = scalar_lea.vmem %s48_s29, 16  ;;  %s1784_s30 = scalar_lea.vmem %s48_s29, 32 }
  0x4f   :  { %p1781_p7 = scmp.ne.s32.totalorder %s48_s29, %s1780_s0  ;;  %p1785_p8 = scmp.lt.s32.totalorder %s48_s29, %s48_s29 }
  0x50   :  { %p1786_p9 = scmp.lt.s32.totalorder %s1784_s30, %s1780_s0 }
  0x52   :  { %p1787_p10 = por %p1786_p9, %p1785_p8 }
  0x54   :  { %p1788_p11 = pnand %p1787_p10, %p1781_p7 }
  0x56   :  { %1791 = shalt.err (!%p1788_p11)
}
  0x57   :  { %50 = dma.hbm_to_vmem [thread:$0]  %s2668_s2, 16, %s48_s29, [#allocation6]  }
  0x58   :  { %s1792_s21 = scalar_lea.hbm %s2670_s4, 16 }
  0x59   :  { %p1793_p12 = scmp.ne.s32.totalorder %s2670_s4, %s1792_s21  ;;  %p1796_p13 = scmp.lt.u32.totalorder %s1792_s21, %s2670_s4 }
  0x5b   :  { %p1798_p0 = pnand %p1796_p13, %p1793_p12 }
  0x5d   :  { %1801 = shalt.err (!%p1798_p0)
}
  0x5e   :  { %s1802_s25 = scalar_lea.vmem %s70_s9, 16  ;;  %s1806_s5 = scalar_lea.vmem %s70_s9, 32 }
  0x5f   :  { %p1803_p1 = scmp.ne.s32.totalorder %s70_s9, %s1802_s25  ;;  %p1807_p2 = scmp.lt.s32.totalorder %s70_s9, %s70_s9 }
  0x60   :  { %p1808_p3 = scmp.lt.s32.totalorder %s1806_s5, %s1802_s25 }
  0x62   :  { %p1809_p4 = por %p1808_p3, %p1807_p2 }
  0x64   :  { %p1810_p5 = pnand %p1809_p4, %p1803_p1 }
  0x66   :  { %1813 = shalt.err (!%p1810_p5)
}
  0x67   :  { %72 = dma.hbm_to_vmem [thread:$0]  %s2670_s4, 16, %s70_s9, [#allocation9]  }
  0x68   :  { %s1876_s28 = smov [#allocation13]   ;;  %s1814_s11 = scalar_lea.hbm %s2672_s6, 16 }
  0x69   :  { %s89_s29 = sshll.u32 %s1876_s28, 4  ;;  %p1815_p6 = scmp.ne.s32.totalorder %s2672_s6, %s1814_s11  ;;  %s90_s29 = int_to_ptr.vmem [resolvable:$true] %s89_s29 }
  0x6a   :  { %p1818_p7 = scmp.lt.u32.totalorder %s1814_s11, %s2672_s6 }
  0x6c   :  { %p1820_p8 = pnand %p1818_p7, %p1815_p6 }
  0x6e   :  { %1823 = shalt.err (!%p1820_p8)
}
  0x6f   :  { %s1824_s27 = scalar_lea.vmem %s90_s29, 16  ;;  %s1828_s4 = scalar_lea.vmem %s90_s29, 32 }
  0x70   :  { %p1825_p9 = scmp.ne.s32.totalorder %s90_s29, %s1824_s27  ;;  %p1829_p10 = scmp.lt.s32.totalorder %s90_s29, %s90_s29 }
  0x71   :  { %p1830_p11 = scmp.lt.s32.totalorder %s1828_s4, %s1824_s27 }
  0x73   :  { %p1831_p12 = por %p1830_p11, %p1829_p10 }
  0x75   :  { %p1832_p13 = pnand %p1831_p12, %p1825_p9 }
  0x77   :  { %1835 = shalt.err (!%p1832_p13)
}
  0x78   :  { %92 = dma.hbm_to_vmem [thread:$0]  %s2672_s6, 16, %s90_s29, [#allocation12]  }
  0x79   :  { %1858 = dma.done.wait [#allocation3], 4096  }
  0x7a   :  { %1859 = vsyncadd [#allocation3], 4294963200 }
  0x7b   :  { %1860 = dma.done.wait [#allocation6], 2064  }
  0x7c   :  { %1861 = vsyncadd [#allocation6], 4294965232 }
  0x7d   :  { %1862 = dma.done.wait [#allocation9], 2064  }
  0x7e   :  { %1863 = vsyncadd [#allocation9], 4294965232 }
  0x7f   :  { %1864 = dma.done.wait [#allocation12], 32  }
  0x80   :  { %1865 = vsyncadd [#allocation12], 4294967264  ;;  %v146_v0 = vld [vmem:[#allocation5] sm:$0xff]  ;;  %v147_v1 = vld [vmem:[#allocation5 + $0x8] sm:$0xff]  ;;  %s1877_s6 = smov [#allocation14]  }
  0x81   :  { %v148_v2 = vld [vmem:[#allocation5 + $0x10] sm:$0xff]  ;;  %v1544_v3 = vpack.c.bf16 %v147_v1, %v146_v0  ;;  %v149_v4 = vld [vmem:[#allocation5 + $0x18] sm:$0xff]  ;;  %v150_v6 = vld [vmem:[#allocation5 + $0x20] sm:$0xff]  ;;  %s1269_s30 = sshll.u32 %s1877_s6, 4  ;;  %s1270_s30 = int_to_ptr.vmem [resolvable:$true] %s1269_s30 }
  0x82   :  { %v1548_v5 = vpack.c.bf16 %v149_v4, %v148_v2  ;;  %v151_v7 = vld [vmem:[#allocation5 + $0x28] sm:$0xff]  ;;  %v2025_v9 = vld [vmem:[#allocation2] sm:$0xff]  ;;  %v152_v10 = vld [vmem:[#allocation5 + $0x30] sm:$0xff]  ;;  %s1836_s17 = scalar_lea.vmem %s1270_s30, 4096  ;;  %p1841_p1 = scmp.lt.s32.totalorder %s1270_s30, %s1270_s30 }
  0x83   :  { %1545 = vmatprep.subr.bf16.mxu0 %v1544_v3  ;;  %v1552_v8 = vpack.c.bf16 %v151_v7, %v150_v6  ;;  %v153_v11 = vld [vmem:[#allocation5 + $0x38] sm:$0xff]  ;;  %1416 = vmatprep.mubr.f32.mxu0 %v2025_v9  ;;  %v154_v13 = vld [vmem:[#allocation5 + $0x40] sm:$0xff]  ;;  %v155_v14 = vld [vmem:[#allocation5 + $0x48] sm:$0xff]  ;;  %p1837_p0 = scmp.ne.s32.totalorder %s1270_s30, %s1836_s17  ;;  %p1842_p2 = scmp.lt.s32.totalorder %s1836_s17, %s1836_s17 }
  0x84   :  { %1547 = vmatpush3.bf16.msra.mxu0 %v1544_v3  ;;  %v1556_v12 = vpack.c.bf16 %v153_v11, %v152_v10  ;;  %v1560_v15 = vpack.c.bf16 %v155_v14, %v154_v13  ;;  %v156_v16 = vld [vmem:[#allocation5 + $0x50] sm:$0xff]  ;;  %v157_v17 = vld [vmem:[#allocation5 + $0x58] sm:$0xff]  ;;  %v426_v18 = vld [vmem:[#allocation8] sm:$0xff] }
  0x85   :  { %1549 = vmatprep.subr.bf16.mxu0 %v1548_v5  ;;  %v427_v19 = vld [vmem:[#allocation8 + $0x8] sm:$0xff]  ;;  %v428_v20 = vld [vmem:[#allocation8 + $0x10] sm:$0xff]  ;;  %v1564_v21 = vpack.c.bf16 %v157_v17, %v156_v16  ;;  %v158_v22 = vld [vmem:[#allocation5 + $0x60] sm:$0xff]  ;;  %p1843_p3 = por %p1842_p2, %p1841_p1 }
  0x86   :  { %v1576_v23 = vpack.c.bf16 %v427_v19, %v426_v18  ;;  %v429_v24 = vld [vmem:[#allocation8 + $0x18] sm:$0xff]  ;;  %v159_v25 = vld [vmem:[#allocation5 + $0x68] sm:$0xff]  ;;  %v160_v30 = vld [vmem:[#allocation5 + $0x70] sm:$0xff] }
  0x87   :  { %v1580_v26 = vpack.c.bf16 %v429_v24, %v428_v20  ;;  %v430_v27 = vld [vmem:[#allocation8 + $0x20] sm:$0xff]  ;;  %v431_v28 = vld [vmem:[#allocation8 + $0x28] sm:$0xff]  ;;  %v1568_v29 = vpack.c.bf16 %v159_v25, %v158_v22  ;;  %v161_v32 = vld [vmem:[#allocation5 + $0x78] sm:$0xff]  ;;  %p1844_p4 = pnand %p1843_p3, %p1837_p0 }
  0x88   :  { %1551 = vmatpush3.bf16.msra.mxu0 %v1548_v5  ;;  %1577 = vmatprep.subr.bf16.mxu1 %v1576_v23  ;;  %v1584_v31 = vpack.c.bf16 %v431_v28, %v430_v27  ;;  %v432_v33 = vld [vmem:[#allocation8 + $0x30] sm:$0xff]  ;;  %v433_v34 = vld [vmem:[#allocation8 + $0x38] sm:$0xff]  ;;  %v1572_v35 = vpack.c.bf16 %v161_v32, %v160_v30  ;;  %v434_v37 = vld [vmem:[#allocation8 + $0x40] sm:$0xff] }
  0x89   :  { %1553 = vmatprep.subr.bf16.mxu0 %v1552_v8  ;;  %1579 = vmatpush3.bf16.msra.mxu1 %v1576_v23  ;;  %v1588_v36 = vpack.c.bf16 %v433_v34, %v432_v33  ;;  %v435_v38 = vld [vmem:[#allocation8 + $0x48] sm:$0xff]  ;;  %v436_v40 = vld [vmem:[#allocation8 + $0x50] sm:$0xff]  ;;  %v437_v41 = vld [vmem:[#allocation8 + $0x58] sm:$0xff] }
  0x8a   :  { %1581 = vmatprep.subr.bf16.mxu1 %v1580_v26  ;;  %v1592_v39 = vpack.c.bf16 %v435_v38, %v434_v37  ;;  %v2028_v42 = vld [vmem:[#allocation2 + $0x8] sm:$0xff]  ;;  %v2030_v43 = vld [vmem:[#allocation2 + $0x10] sm:$0xff]  ;;  %v1596_v44 = vpack.c.bf16 %v437_v41, %v436_v40  ;;  %v2034_v47 = vld [vmem:[#allocation2 + $0x18] sm:$0xff] }
  0x8b   :  { %v438_v45 = vld [vmem:[#allocation8 + $0x60] sm:$0xff]  ;;  %v439_v46 = vld [vmem:[#allocation8 + $0x68] sm:$0xff]  ;;  %v2046_v52 = vld [vmem:[#allocation2 + $0x38] sm:$0xff] }
  0x8c   :  { %1555 = vmatpush3.bf16.msra.mxu0 %v1552_v8  ;;  %v2036_v48 = vld [vmem:[#allocation2 + $0x20] sm:$0xff]  ;;  %v1600_v49 = vpack.c.bf16 %v439_v46, %v438_v45  ;;  %v2040_v50 = vld [vmem:[#allocation2 + $0x28] sm:$0xff]  ;;  %v2042_v51 = vld [vmem:[#allocation2 + $0x30] sm:$0xff] }
  0x8d   :  { %1557 = vmatprep.subr.bf16.mxu0 %v1556_v12  ;;  %1583 = vmatpush3.bf16.msra.mxu1 %v1580_v26  ;;  %v2048_v53 = vld [vmem:[#allocation2 + $0x40] sm:$0xff]  ;;  %v2052_v54 = vld [vmem:[#allocation2 + $0x48] sm:$0xff]  ;;  %v2054_v55 = vld [vmem:[#allocation2 + $0x50] sm:$0xff] }
  0x8e   :  { %1585 = vmatprep.subr.bf16.mxu1 %v1584_v31  ;;  %v2058_v56 = vld [vmem:[#allocation2 + $0x58] sm:$0xff]  ;;  %v2060_v57 = vld [vmem:[#allocation2 + $0x60] sm:$0xff]  ;;  %v2064_v58 = vld [vmem:[#allocation2 + $0x68] sm:$0xff] }
  0x8f   :  { %v2066_v59 = vld [vmem:[#allocation2 + $0x70] sm:$0xff]  ;;  %v2070_v60 = vld [vmem:[#allocation2 + $0x78] sm:$0xff]  ;;  %v2072_v61 = vld [vmem:[#allocation2 + $0x80] sm:$0xff] }
  0x90   :  { %1559 = vmatpush3.bf16.msra.mxu0 %v1556_v12  ;;  %v2076_v62 = vld [vmem:[#allocation2 + $0x88] sm:$0xff]  ;;  %v2078_v63 = vld [vmem:[#allocation2 + $0x90] sm:$0xff]  ;;  %v2082_v0 = vld [vmem:[#allocation2 + $0x98] sm:$0xff] }
  0x91   :  { %1561 = vmatprep.subr.bf16.mxu0 %v1560_v15  ;;  %1587 = vmatpush3.bf16.msra.mxu1 %v1584_v31  ;;  %v2084_v1 = vld [vmem:[#allocation2 + $0xa0] sm:$0xff]  ;;  %v2088_v2 = vld [vmem:[#allocation2 + $0xa8] sm:$0xff]  ;;  %v2090_v3 = vld [vmem:[#allocation2 + $0xb0] sm:$0xff] }
  0x92   :  { %1589 = vmatprep.subr.bf16.mxu1 %v1588_v36  ;;  %v2094_v4 = vld [vmem:[#allocation2 + $0xb8] sm:$0xff]  ;;  %v2096_v5 = vld [vmem:[#allocation2 + $0xc0] sm:$0xff]  ;;  %v2100_v6 = vld [vmem:[#allocation2 + $0xc8] sm:$0xff] }
  0x93   :  { %v2102_v7 = vld [vmem:[#allocation2 + $0xd0] sm:$0xff]  ;;  %v2106_v8 = vld [vmem:[#allocation2 + $0xd8] sm:$0xff]  ;;  %v2108_v10 = vld [vmem:[#allocation2 + $0xe0] sm:$0xff] }
  0x94   :  { %1563 = vmatpush3.bf16.msra.mxu0 %v1560_v15  ;;  %v2112_v11 = vld [vmem:[#allocation2 + $0xe8] sm:$0xff]  ;;  %v2114_v12 = vld [vmem:[#allocation2 + $0xf0] sm:$0xff]  ;;  %v2118_v13 = vld [vmem:[#allocation2 + $0xf8] sm:$0xff] }
  0x95   :  { %1565 = vmatprep.subr.bf16.mxu0 %v1564_v21  ;;  %1591 = vmatpush3.bf16.msra.mxu1 %v1588_v36  ;;  %v440_v14 = vld [vmem:[#allocation8 + $0x70] sm:$0xff]  ;;  %v441_v15 = vld [vmem:[#allocation8 + $0x78] sm:$0xff] }
  0x96   :  { %1593 = vmatprep.subr.bf16.mxu1 %v1592_v39  ;;  %v1604_v16 = vpack.c.bf16 %v441_v15, %v440_v14  ;;  %v2121_v17 = vld [vmem:[#allocation7] ss:$0 sm:$0xff] }
  0x98   :  { %1567 = vmatpush3.bf16.msra.mxu0 %v1564_v21 }
  0x99   :  { %1569 = vmatprep.subr.bf16.mxu0 %v1568_v29  ;;  %1595 = vmatpush3.bf16.msra.mxu1 %v1592_v39 }
  0x9a   :  { %1597 = vmatprep.subr.bf16.mxu1 %v1596_v44 }
  0x9c   :  { %1571 = vmatpush3.bf16.msra.mxu0 %v1568_v29 }
  0x9d   :  { %1573 = vmatprep.subr.bf16.mxu0 %v1572_v35  ;;  %1599 = vmatpush3.bf16.msra.mxu1 %v1596_v44 }
  0x9e   :  { %1601 = vmatprep.subr.bf16.mxu1 %v1600_v49 }
  0xa0   :  { %1575 = vmatpush3.bf16.msra.mxu0 %v1572_v35 }
  0xa1   :  { %1603 = vmatpush3.bf16.msra.mxu1 %v1600_v49 }
  0xa2   :  { %1605 = vmatprep.subr.bf16.mxu1 %v1604_v16 }
  0xa3   :  { %1417 = vmatmul.mubr.f32.vlgmr.msra.gmra.mrb[0].mxu0 %v2028_v42 }
  0xa4   :  { %1419 = vmatprep.mubr.f32.mxu0 %v2030_v43 }
  0xa5   :  { %1607 = vmatpush3.bf16.msra.mxu1 %v1604_v16 }
  0xa7   :  { %1420 = vmatmul.mubr.f32.gmra.mrb[2].mxu0 %v2034_v47 }
  0xa8   :  { %1422 = vmatprep.mubr.f32.mxu0 %v2036_v48 }
  0xab   :  { %1423 = vmatmul.mubr.f32.gmra.mrb[4].mxu0 %v2040_v50 }
  0xac   :  { %1425 = vmatprep.mubr.f32.mxu0 %v2042_v51 }
  0xaf   :  { %1426 = vmatmul.mubr.f32.gmra.mrb[6].mxu0 %v2046_v52 }
  0xb0   :  { %1428 = vmatprep.mubr.f32.mxu0 %v2048_v53 }
  0xb3   :  { %1429 = vmatmul.mubr.f32.gmra.mrb[8].mxu0 %v2052_v54 }
  0xb4   :  { %1431 = vmatprep.mubr.f32.mxu0 %v2054_v55 }
  0xb7   :  { %1432 = vmatmul.mubr.f32.gmra.mrb[10].mxu0 %v2058_v56 }
  0xb8   :  { %1434 = vmatprep.mubr.f32.mxu0 %v2060_v57 }
  0xbb   :  { %1435 = vmatmul.mubr.f32.gmra.mrb[12].mxu0 %v2064_v58 }
  0xbc   :  { %1437 = vmatprep.mubr.f32.mxu0 %v2066_v59 }
  0xbf   :  { %1438 = vmatmul.mubr.f32.gmra.mrb[14].mxu0 %v2070_v60 }
  0xc0   :  { %1440 = vmatprep.mubr.f32.mxu0 %v2072_v61 }
  0xc3   :  { %1441 = vmatmul.mubr.f32.gmra.mrb[16].mxu0 %v2076_v62 }
  0xc4   :  { %1443 = vmatprep.mubr.f32.mxu0 %v2078_v63 }
  0xc7   :  { %1444 = vmatmul.mubr.f32.gmra.mrb[18].mxu0 %v2082_v0 }
  0xc8   :  { %1446 = vmatprep.mubr.f32.mxu0 %v2084_v1 }
  0xcb   :  { %1447 = vmatmul.mubr.f32.gmra.mrb[20].mxu0 %v2088_v2 }
  0xcc   :  { %1449 = vmatprep.mubr.f32.mxu0 %v2090_v3 }
  0xcf   :  { %1450 = vmatmul.mubr.f32.gmra.mrb[22].mxu0 %v2094_v4 }
  0xd0   :  { %1452 = vmatprep.mubr.f32.mxu0 %v2096_v5 }
  0xd3   :  { %1453 = vmatmul.mubr.f32.gmra.mrb[24].mxu0 %v2100_v6 }
  0xd4   :  { %1455 = vmatprep.mubr.f32.mxu0 %v2102_v7 }
  0xd7   :  { %1456 = vmatmul.mubr.f32.gmra.mrb[26].mxu0 %v2106_v8 }
  0xd8   :  { %1458 = vmatprep.mubr.f32.mxu0 %v2108_v10 }
  0xdb   :  { %1459 = vmatmul.mubr.f32.gmra.mrb[28].mxu0 %v2112_v11 }
  0xdc   :  { %1461 = vmatprep.mubr.f32.mxu0 %v2114_v12 }
  0xdf   :  { %1462 = vmatmul.mubr.f32.gmra.mrb[30].mxu0 %v2118_v13 }
 0x176   :  { %v1418_v18 = vpop.f32.mrb[0].mxu0 }
 0x177   :  { %v241_v19 = vadd.f32 %v1418_v18, %v2121_v17  ;;  %v235_v20 = vpop.f32.mrb[1].mxu0 }
 0x178   :  { %v236_v21 = vadd.f32 %v2121_v17, %v235_v20 }
 0x179   :  { %v395_v24 = vmax.f32 %v241_v19, 0.0 }
 0x17a   :  { %v1421_v22 = vpop.f32.mrb[2].mxu0  ;;  %v394_v23 = vmax.f32 %v236_v21, 0.0 }
 0x17b   :  { %v251_v25 = vadd.f32 %v1421_v22, %v2121_v17  ;;  %v245_v26 = vpop.f32.mrb[3].mxu0 }
 0x17c   :  { %v246_v27 = vadd.f32 %v2121_v17, %v245_v26  ;;  %1496 = vmatprep.mubr.f32.mxu1 %v394_v23 }
 0x17d   :  { %v397_v28 = vmax.f32 %v251_v25, 0.0  ;;  %1497 = vmatmul.mubr.f32.vlgmr.msra.gmra.mrb[0].mxu1 %v395_v24 }
 0x17e   :  { %v396_v29 = vmax.f32 %v246_v27, 0.0  ;;  %v1424_v30 = vpop.f32.mrb[4].mxu0 }
 0x17f   :  { %v261_v31 = vadd.f32 %v1424_v30, %v2121_v17  ;;  %v255_v32 = vpop.f32.mrb[5].mxu0 }
 0x180   :  { %1499 = vmatprep.mubr.f32.mxu1 %v396_v29  ;;  %v256_v33 = vadd.f32 %v2121_v17, %v255_v32 }
 0x181   :  { %1500 = vmatmul.mubr.f32.gmra.mrb[2].mxu1 %v397_v28  ;;  %v399_v34 = vmax.f32 %v261_v31, 0.0 }
 0x182   :  { %v398_v35 = vmax.f32 %v256_v33, 0.0  ;;  %v1427_v36 = vpop.f32.mrb[6].mxu0 }
 0x183   :  { %v271_v37 = vadd.f32 %v1427_v36, %v2121_v17  ;;  %v265_v38 = vpop.f32.mrb[7].mxu0 }
 0x184   :  { %1502 = vmatprep.mubr.f32.mxu1 %v398_v35  ;;  %v266_v39 = vadd.f32 %v2121_v17, %v265_v38 }
 0x185   :  { %1503 = vmatmul.mubr.f32.gmra.mrb[4].mxu1 %v399_v34  ;;  %v401_v40 = vmax.f32 %v271_v37, 0.0 }
 0x186   :  { %v400_v41 = vmax.f32 %v266_v39, 0.0  ;;  %v1430_v44 = vpop.f32.mrb[8].mxu0 }
 0x187   :  { %v281_v45 = vadd.f32 %v1430_v44, %v2121_v17  ;;  %v275_v46 = vpop.f32.mrb[9].mxu0 }
 0x188   :  { %1505 = vmatprep.mubr.f32.mxu1 %v400_v41  ;;  %v276_v49 = vadd.f32 %v2121_v17, %v275_v46 }
 0x189   :  { %1506 = vmatmul.mubr.f32.gmra.mrb[6].mxu1 %v401_v40  ;;  %v403_v14 = vmax.f32 %v281_v45, 0.0 }
 0x18a   :  { %v402_v15 = vmax.f32 %v276_v49, 0.0  ;;  %v1433_v16 = vpop.f32.mrb[10].mxu0 }
 0x18b   :  { %v291_v18 = vadd.f32 %v1433_v16, %v2121_v17  ;;  %v285_v19 = vpop.f32.mrb[11].mxu0 }
 0x18c   :  { %1508 = vmatprep.mubr.f32.mxu1 %v402_v15  ;;  %v286_v20 = vadd.f32 %v2121_v17, %v285_v19 }
 0x18d   :  { %1509 = vmatmul.mubr.f32.gmra.mrb[8].mxu1 %v403_v14  ;;  %v405_v21 = vmax.f32 %v291_v18, 0.0 }
 0x18e   :  { %v404_v22 = vmax.f32 %v286_v20, 0.0  ;;  %v1436_v23 = vpop.f32.mrb[12].mxu0 }
 0x18f   :  { %v301_v24 = vadd.f32 %v1436_v23, %v2121_v17  ;;  %v295_v25 = vpop.f32.mrb[13].mxu0 }
 0x190   :  { %1511 = vmatprep.mubr.f32.mxu1 %v404_v22  ;;  %v296_v26 = vadd.f32 %v2121_v17, %v295_v25 }
 0x191   :  { %1512 = vmatmul.mubr.f32.gmra.mrb[10].mxu1 %v405_v21  ;;  %v407_v27 = vmax.f32 %v301_v24, 0.0 }
 0x192   :  { %v406_v28 = vmax.f32 %v296_v26, 0.0  ;;  %v1439_v29 = vpop.f32.mrb[14].mxu0 }
 0x193   :  { %v311_v30 = vadd.f32 %v1439_v29, %v2121_v17  ;;  %v305_v31 = vpop.f32.mrb[15].mxu0 }
 0x194   :  { %1514 = vmatprep.mubr.f32.mxu1 %v406_v28  ;;  %v306_v32 = vadd.f32 %v2121_v17, %v305_v31 }
 0x195   :  { %1515 = vmatmul.mubr.f32.gmra.mrb[12].mxu1 %v407_v27  ;;  %v409_v33 = vmax.f32 %v311_v30, 0.0 }
 0x196   :  { %v408_v34 = vmax.f32 %v306_v32, 0.0  ;;  %v1442_v35 = vpop.f32.mrb[16].mxu0 }
 0x197   :  { %v321_v36 = vadd.f32 %v1442_v35, %v2121_v17  ;;  %v315_v37 = vpop.f32.mrb[17].mxu0 }
 0x198   :  { %1517 = vmatprep.mubr.f32.mxu1 %v408_v34  ;;  %v316_v38 = vadd.f32 %v2121_v17, %v315_v37 }
 0x199   :  { %1518 = vmatmul.mubr.f32.gmra.mrb[14].mxu1 %v409_v33  ;;  %v411_v39 = vmax.f32 %v321_v36, 0.0 }
 0x19a   :  { %v410_v40 = vmax.f32 %v316_v38, 0.0  ;;  %v1445_v41 = vpop.f32.mrb[18].mxu0 }
 0x19b   :  { %v331_v44 = vadd.f32 %v1445_v41, %v2121_v17  ;;  %v325_v45 = vpop.f32.mrb[19].mxu0 }
 0x19c   :  { %1520 = vmatprep.mubr.f32.mxu1 %v410_v40  ;;  %v326_v46 = vadd.f32 %v2121_v17, %v325_v45 }
 0x19d   :  { %1521 = vmatmul.mubr.f32.gmra.mrb[16].mxu1 %v411_v39  ;;  %v413_v49 = vmax.f32 %v331_v44, 0.0 }
 0x19e   :  { %v412_v14 = vmax.f32 %v326_v46, 0.0  ;;  %v1448_v15 = vpop.f32.mrb[20].mxu0 }
 0x19f   :  { %v341_v16 = vadd.f32 %v1448_v15, %v2121_v17  ;;  %v335_v18 = vpop.f32.mrb[21].mxu0 }
 0x1a0   :  { %1523 = vmatprep.mubr.f32.mxu1 %v412_v14  ;;  %v336_v19 = vadd.f32 %v2121_v17, %v335_v18 }
 0x1a1   :  { %1524 = vmatmul.mubr.f32.gmra.mrb[18].mxu1 %v413_v49  ;;  %v415_v20 = vmax.f32 %v341_v16, 0.0 }
 0x1a2   :  { %v414_v21 = vmax.f32 %v336_v19, 0.0  ;;  %v1451_v22 = vpop.f32.mrb[22].mxu0 }
 0x1a3   :  { %v351_v23 = vadd.f32 %v1451_v22, %v2121_v17  ;;  %v345_v24 = vpop.f32.mrb[23].mxu0 }
 0x1a4   :  { %1526 = vmatprep.mubr.f32.mxu1 %v414_v21  ;;  %v346_v25 = vadd.f32 %v2121_v17, %v345_v24  ;;  %v2155_v21 = vld [vmem:[#allocation10] ss:$0 sm:$0xff] }
 0x1a5   :  { %1527 = vmatmul.mubr.f32.gmra.mrb[20].mxu1 %v415_v20  ;;  %v417_v26 = vmax.f32 %v351_v23, 0.0 }
 0x1a6   :  { %v416_v27 = vmax.f32 %v346_v25, 0.0  ;;  %v1454_v28 = vpop.f32.mrb[24].mxu0 }
 0x1a7   :  { %v361_v29 = vadd.f32 %v1454_v28, %v2121_v17  ;;  %v355_v30 = vpop.f32.mrb[25].mxu0 }
 0x1a8   :  { %1529 = vmatprep.mubr.f32.mxu1 %v416_v27  ;;  %v356_v31 = vadd.f32 %v2121_v17, %v355_v30 }
 0x1a9   :  { %1530 = vmatmul.mubr.f32.gmra.mrb[22].mxu1 %v417_v26  ;;  %v419_v32 = vmax.f32 %v361_v29, 0.0 }
 0x1aa   :  { %v418_v33 = vmax.f32 %v356_v31, 0.0  ;;  %v1457_v34 = vpop.f32.mrb[26].mxu0 }
 0x1ab   :  { %v371_v35 = vadd.f32 %v1457_v34, %v2121_v17  ;;  %v365_v36 = vpop.f32.mrb[27].mxu0 }
 0x1ac   :  { %1532 = vmatprep.mubr.f32.mxu1 %v418_v33  ;;  %v366_v37 = vadd.f32 %v2121_v17, %v365_v36 }
 0x1ad   :  { %1533 = vmatmul.mubr.f32.gmra.mrb[24].mxu1 %v419_v32  ;;  %v421_v38 = vmax.f32 %v371_v35, 0.0 }
 0x1ae   :  { %v420_v39 = vmax.f32 %v366_v37, 0.0  ;;  %v1460_v40 = vpop.f32.mrb[28].mxu0 }
 0x1af   :  { %v381_v41 = vadd.f32 %v1460_v40, %v2121_v17  ;;  %v375_v44 = vpop.f32.mrb[29].mxu0 }
 0x1b0   :  { %1535 = vmatprep.mubr.f32.mxu1 %v420_v39  ;;  %v376_v45 = vadd.f32 %v2121_v17, %v375_v44 }
 0x1b1   :  { %1536 = vmatmul.mubr.f32.gmra.mrb[26].mxu1 %v421_v38  ;;  %v423_v46 = vmax.f32 %v381_v41, 0.0 }
 0x1b2   :  { %v422_v49 = vmax.f32 %v376_v45, 0.0  ;;  %v1463_v14 = vpop.f32.mrb[30].mxu0 }
 0x1b3   :  { %v391_v15 = vadd.f32 %v1463_v14, %v2121_v17  ;;  %v385_v16 = vpop.f32.mrb[31].mxu0 }
 0x1b4   :  { %1538 = vmatprep.mubr.f32.mxu1 %v422_v49  ;;  %v386_v18 = vadd.f32 %v2121_v17, %v385_v16 }
 0x1b5   :  { %1539 = vmatmul.mubr.f32.gmra.mrb[28].mxu1 %v423_v46  ;;  %v425_v19 = vmax.f32 %v391_v15, 0.0 }
 0x1b6   :  { %v424_v20 = vmax.f32 %v386_v18, 0.0 }
 0x1b8   :  { %1541 = vmatprep.mubr.f32.mxu1 %v424_v20 }
 0x1b9   :  { %1542 = vmatmul.mubr.f32.gmra.mrb[30].mxu1 %v425_v19 }
 0x250   :  { %v1498_v22 = vpop.f32.mrb[0].mxu1 }
 0x251   :  { %v521_v23 = vadd.f32 %v1498_v22, %v2155_v21  ;;  %v515_v24 = vpop.f32.mrb[1].mxu1 }
 0x252   :  { %v516_v26 = vadd.f32 %v2155_v21, %v515_v24 }
 0x253   :  { %v2159_v25 = vadd.f32 %v521_v23, %v2028_v42 }
 0x254   :  { %v1501_v27 = vpop.f32.mrb[2].mxu1  ;;  %v2167_v30 = vadd.f32 %v516_v26, %v2025_v9 }
 0x255   :  { %v531_v28 = vadd.f32 %v1501_v27, %v2155_v21  ;;  %708 = vadd.xlane.f32.xlu0 %v2159_v25  ;;  %v525_v17 = vpop.f32.mrb[3].mxu1  ;;  %v771_v29 = vmul.f32 %v2159_v25, %v2159_v25 }
 0x256   :  { %v526_v31 = vadd.f32 %v2155_v21, %v525_v17  ;;  %v770_v35 = vmul.f32 %v2167_v30, %v2167_v30 }
 0x257   :  { %804 = vadd.xlane.f32.xlu1 %v771_v29  ;;  %v2171_v42 = vadd.f32 %v531_v28, %v2034_v47 }
 0x258   :  { %v1504_v32 = vpop.f32.mrb[4].mxu1  ;;  %v2175_v34 = vadd.f32 %v526_v31, %v2030_v43 }
 0x259   :  { %706 = vadd.xlane.f32.xlu0 %v2167_v30  ;;  %v535_v33 = vpop.f32.mrb[5].mxu1  ;;  %v541_v39 = vadd.f32 %v1504_v32, %v2155_v21  ;;  %v773_v40 = vmul.f32 %v2171_v42, %v2171_v42 }
 0x25a   :  { %v536_v36 = vadd.f32 %v2155_v21, %v535_v33  ;;  %v772_v47 = vmul.f32 %v2175_v34, %v2175_v34 }
 0x25b   :  { %712 = vadd.xlane.f32.xlu1 %v2171_v42  ;;  %v2191_v45 = vadd.f32 %v541_v39, %v2040_v50 }
 0x25c   :  { %v1507_v9 = vpop.f32.mrb[6].mxu1  ;;  %v2186_v43 = vadd.f32 %v536_v36, %v2036_v48 }
 0x25d   :  { %802 = vadd.xlane.f32.xlu0 %v770_v35  ;;  %v545_v37 = vpop.f32.mrb[7].mxu1  ;;  %v551_v15 = vadd.f32 %v1507_v9, %v2155_v21  ;;  %v775_v50 = vmul.f32 %v2191_v45, %v2191_v45 }
 0x25e   :  { %v546_v46 = vadd.f32 %v2155_v21, %v545_v37  ;;  %v774_v48 = vmul.f32 %v2186_v43, %v2186_v43 }
 0x25f   :  { %710 = vadd.xlane.f32.xlu1 %v2175_v34  ;;  %v2205_v20 = vadd.f32 %v551_v15, %v2046_v52 }
 0x260   :  { %v1510_v38 = vpop.f32.mrb[8].mxu1  ;;  %v2200_v16 = vadd.f32 %v546_v46, %v2042_v51 }
 0x261   :  { %806 = vadd.xlane.f32.xlu0 %v772_v47  ;;  %v555_v41 = vpop.f32.mrb[9].mxu1  ;;  %v561_v26 = vadd.f32 %v1510_v38, %v2155_v21  ;;  %v777_v52 = vmul.f32 %v2205_v20, %v2205_v20 }
 0x262   :  { %v556_v22 = vadd.f32 %v2155_v21, %v555_v41  ;;  %v776_v51 = vmul.f32 %v2200_v16, %v2200_v16 }
 0x263   :  { %808 = vadd.xlane.f32.xlu1 %v773_v40  ;;  %v2225_v32 = vadd.f32 %v561_v26, %v2052_v54 }
 0x264   :  { %v1513_v44 = vpop.f32.mrb[10].mxu1  ;;  %v2214_v27 = vadd.f32 %v556_v22, %v2048_v53 }
 0x265   :  { %714 = vadd.xlane.f32.xlu0 %v2186_v43  ;;  %v565_v49 = vpop.f32.mrb[11].mxu1  ;;  %v571_v54 = vadd.f32 %v1513_v44, %v2155_v21  ;;  %v779_v38 = vmul.f32 %v2225_v32, %v2225_v32 }
 0x266   :  { %v566_v53 = vadd.f32 %v2155_v21, %v565_v49  ;;  %v778_v36 = vmul.f32 %v2214_v27, %v2214_v27 }
 0x267   :  { %716 = vadd.xlane.f32.xlu1 %v2191_v45  ;;  %v2249_v49 = vadd.f32 %v571_v54, %v2058_v56 }
 0x268   :  { %v1516_v14 = vpop.f32.mrb[12].mxu1  ;;  %v2240_v47 = vadd.f32 %v566_v53, %v2054_v55 }
 0x269   :  { %810 = vadd.xlane.f32.xlu0 %v774_v48  ;;  %v575_v18 = vpop.f32.mrb[13].mxu1 }
 0x26a   :  { %v576_v55 = vadd.f32 %v2155_v21, %v575_v18  ;;  %v781_v18 = vmul.f32 %v2249_v49, %v2249_v49 }
 0x26b   :  { %812 = vadd.xlane.f32.xlu1 %v775_v50  ;;  %v780_v50 = vmul.f32 %v2240_v47, %v2240_v47 }
 0x26c   :  { %v1519_v19 = vpop.f32.mrb[14].mxu1  ;;  %v2262_v56 = vadd.f32 %v576_v55, %v2060_v57 }
 0x26d   :  { %718 = vadd.xlane.f32.xlu0 %v2200_v16  ;;  %v585_v23 = vpop.f32.mrb[15].mxu1  ;;  %v591_v54 = vadd.f32 %v1519_v19, %v2155_v21 }
 0x26e   :  { %v586_v57 = vadd.f32 %v2155_v21, %v585_v23 }
 0x26f   :  { %720 = vadd.xlane.f32.xlu1 %v2205_v20 }
 0x270   :  { %v1522_v24 = vpop.f32.mrb[16].mxu1 }
 0x271   :  { %814 = vadd.xlane.f32.xlu0 %v776_v51  ;;  %v2219_v28 = vadd.f32 %v1522_v24, %v2155_v21  ;;  %v595_v17 = vpop.f32.mrb[17].mxu1  ;;  %v581_v51 = vadd.f32 %v1516_v14, %v2155_v21 }
 0x272   :  { %v2222_v29 = vadd.f32 %v2155_v21, %v595_v17 }
 0x273   :  { %816 = vadd.xlane.f32.xlu1 %v777_v52 }
 0x274   :  { %v1525_v31 = vpop.f32.mrb[18].mxu1 }
 0x275   :  { %722 = vadd.xlane.f32.xlu0 %v2214_v27  ;;  %v2230_v33 = vadd.f32 %v1525_v31, %v2155_v21  ;;  %v605_v35 = vpop.f32.mrb[19].mxu1  ;;  %v2271_v31 = vadd.f32 %v581_v51, %v2064_v58  ;;  %v2284_v58 = vadd.f32 %v586_v57, %v2066_v59  ;;  %v2305_v51 = vadd.f32 %v2222_v29, %v2072_v61 }
 0x276   :  { %v2233_v9 = vadd.f32 %v2155_v21, %v605_v35 }
 0x277   :  { %724 = vadd.xlane.f32.xlu1 %v2225_v32  ;;  %v783_v23 = vmul.f32 %v2271_v31, %v2271_v31 }
 0x278   :  { %v1528_v37 = vpop.f32.mrb[20].mxu1  ;;  %v2319_v61 = vadd.f32 %v2233_v9, %v2078_v63 }
 0x279   :  { %818 = vadd.xlane.f32.xlu0 %v778_v36  ;;  %v2245_v39 = vadd.f32 %v1528_v37, %v2155_v21  ;;  %v615_v40 = vpop.f32.mrb[21].mxu1  ;;  %v782_v36 = vmul.f32 %v2262_v56, %v2262_v56 }
 0x27a   :  { %v616_v41 = vadd.f32 %v2155_v21, %v615_v40 }
 0x27b   :  { %820 = vadd.xlane.f32.xlu1 %v779_v38  ;;  %v2338_v9 = vadd.f32 %v2245_v39, %v2088_v2 }
 0x27c   :  { %v1531_v46 = vpop.f32.mrb[22].mxu1 }
 0x27d   :  { %726 = vadd.xlane.f32.xlu0 %v2240_v47  ;;  %v2254_v44 = vadd.f32 %v1531_v46, %v2155_v21  ;;  %v625_v48 = vpop.f32.mrb[23].mxu1 }
 0x27e   :  { %v626_v15 = vadd.f32 %v2155_v21, %v625_v48  ;;  %v2293_v48 = vadd.f32 %v591_v54, %v2070_v60 }
 0x27f   :  { %728 = vadd.xlane.f32.xlu1 %v2249_v49 }
 0x280   :  { %v1534_v22 = vpop.f32.mrb[24].mxu1  ;;  %v785_v60 = vmul.f32 %v2293_v48, %v2293_v48 }
 0x281   :  { %822 = vadd.xlane.f32.xlu0 %v780_v50  ;;  %v2267_v24 = vadd.f32 %v1534_v22, %v2155_v21  ;;  %v635_v26 = vpop.f32.mrb[25].mxu1  ;;  %v784_v22 = vmul.f32 %v2284_v58, %v2284_v58 }
 0x282   :  { %v636_v52 = vadd.f32 %v2155_v21, %v635_v26  ;;  %v2332_v26 = vadd.f32 %v616_v41, %v2084_v1  ;;  %v791_v1 = vmul.f32 %v2338_v9, %v2338_v9  ;;  %v2351_v41 = vadd.f32 %v2254_v44, %v2094_v4 }
 0x283   :  { %824 = vadd.xlane.f32.xlu1 %v781_v18  ;;  %v2311_v18 = vadd.f32 %v2219_v28, %v2076_v62  ;;  %v2325_v62 = vadd.f32 %v2230_v33, %v2082_v0  ;;  %v788_v28 = vmul.f32 %v2319_v61, %v2319_v61  ;;  %v2345_v33 = vadd.f32 %v626_v15, %v2090_v3 }
 0x284   :  { %v1537_v17 = vpop.f32.mrb[26].mxu1  ;;  %v790_v0 = vmul.f32 %v2332_v26, %v2332_v26  ;;  %v2358_v39 = vadd.f32 %v636_v52, %v2096_v5  ;;  %v793_v3 = vmul.f32 %v2351_v41, %v2351_v41  ;;  %v2364_v15 = vadd.f32 %v2267_v24, %v2100_v6 }
 0x285   :  { %730 = vadd.xlane.f32.xlu0 %v2262_v56  ;;  %v2276_v14 = vadd.f32 %v1537_v17, %v2155_v21  ;;  %v645_v53 = vpop.f32.mrb[27].mxu1  ;;  %v787_v29 = vmul.f32 %v2311_v18, %v2311_v18  ;;  %v789_v63 = vmul.f32 %v2325_v62, %v2325_v62  ;;  %v792_v2 = vmul.f32 %v2345_v33, %v2345_v33 }
 0x286   :  { %v646_v35 = vadd.f32 %v2155_v21, %v645_v53  ;;  %v794_v4 = vmul.f32 %v2358_v39, %v2358_v39  ;;  %v795_v5 = vmul.f32 %v2364_v15, %v2364_v15 }
 0x287   :  { %732 = vadd.xlane.f32.xlu1 %v2271_v31  ;;  %v2377_v52 = vadd.f32 %v2276_v14, %v2106_v8 }
 0x288   :  { %v1540_v37 = vpop.f32.mrb[28].mxu1  ;;  %v2371_v44 = vadd.f32 %v646_v35, %v2102_v7 }
 0x289   :  { %826 = vadd.xlane.f32.xlu0 %v782_v36  ;;  %v2289_v38 = vadd.f32 %v1540_v37, %v2155_v21  ;;  %v655_v40 = vpop.f32.mrb[29].mxu1  ;;  %v797_v7 = vmul.f32 %v2377_v52, %v2377_v52 }
 0x28a   :  { %v656_v46 = vadd.f32 %v2155_v21, %v655_v40  ;;  %v796_v6 = vmul.f32 %v2371_v44, %v2371_v44 }
 0x28b   :  { %828 = vadd.xlane.f32.xlu1 %v783_v23  ;;  %v2390_v17 = vadd.f32 %v2289_v38, %v2112_v11 }
 0x28c   :  { %v1543_v55 = vpop.f32.mrb[30].mxu1  ;;  %v2384_v24 = vadd.f32 %v656_v46, %v2108_v10 }
 0x28d   :  { %734 = vadd.xlane.f32.xlu0 %v2284_v58  ;;  %v2297_v59 = vadd.f32 %v1543_v55, %v2155_v21  ;;  %v665_v19 = vpop.f32.mrb[31].mxu1  ;;  %v799_v10 = vmul.f32 %v2390_v17, %v2390_v17 }
 0x28e   :  { %v666_v50 = vadd.f32 %v2155_v21, %v665_v19  ;;  %v786_v21 = vmul.f32 %v2305_v51, %v2305_v51  ;;  %v798_v8 = vmul.f32 %v2384_v24, %v2384_v24 }
 0x28f   :  { %736 = vadd.xlane.f32.xlu1 %v2293_v48  ;;  %v2403_v14 = vadd.f32 %v2297_v59, %v2118_v13 }
 0x290   :  { %v2397_v57 = vadd.f32 %v666_v50, %v2114_v12 }
 0x291   :  { %830 = vadd.xlane.f32.xlu0 %v784_v22  ;;  %v801_v12 = vmul.f32 %v2403_v14, %v2403_v14 }
 0x292   :  { %v800_v11 = vmul.f32 %v2397_v57, %v2397_v57 }
 0x293   :  { %832 = vadd.xlane.f32.xlu1 %v785_v60 }
 0x295   :  { %738 = vadd.xlane.f32.xlu0 %v2305_v51 }
 0x297   :  { %740 = vadd.xlane.f32.xlu1 %v2311_v18 }
 0x299   :  { %834 = vadd.xlane.f32.xlu0 %v786_v21 }
 0x29b   :  { %836 = vadd.xlane.f32.xlu1 %v787_v29 }
 0x29d   :  { %742 = vadd.xlane.f32.xlu0 %v2319_v61 }
 0x29f   :  { %744 = vadd.xlane.f32.xlu1 %v2325_v62 }
 0x2a1   :  { %838 = vadd.xlane.f32.xlu0 %v788_v28 }
 0x2a3   :  { %840 = vadd.xlane.f32.xlu1 %v789_v63 }
 0x2a5   :  { %746 = vadd.xlane.f32.xlu0 %v2332_v26 }
 0x2a7   :  { %748 = vadd.xlane.f32.xlu1 %v2338_v9 }
 0x2a9   :  { %842 = vadd.xlane.f32.xlu0 %v790_v0 }
 0x2ab   :  { %844 = vadd.xlane.f32.xlu1 %v791_v1 }
 0x2ad   :  { %750 = vadd.xlane.f32.xlu0 %v2345_v33 }
 0x2af   :  { %752 = vadd.xlane.f32.xlu1 %v2351_v41 }
 0x2b1   :  { %846 = vadd.xlane.f32.xlu0 %v792_v2 }
 0x2b3   :  { %848 = vadd.xlane.f32.xlu1 %v793_v3 }
 0x2b5   :  { %754 = vadd.xlane.f32.xlu0 %v2358_v39 }
 0x2b7   :  { %756 = vadd.xlane.f32.xlu1 %v2364_v15 }
 0x2b9   :  { %850 = vadd.xlane.f32.xlu0 %v794_v4 }
 0x2bb   :  { %852 = vadd.xlane.f32.xlu1 %v795_v5 }
 0x2bd   :  { %758 = vadd.xlane.f32.xlu0 %v2371_v44 }
 0x2bf   :  { %760 = vadd.xlane.f32.xlu1 %v2377_v52 }
 0x2c1   :  { %854 = vadd.xlane.f32.xlu0 %v796_v6 }
 0x2c3   :  { %856 = vadd.xlane.f32.xlu1 %v797_v7 }
 0x2c5   :  { %762 = vadd.xlane.f32.xlu0 %v2384_v24 }
 0x2c7   :  { %764 = vadd.xlane.f32.xlu1 %v2390_v17 }
 0x2c9   :  { %858 = vadd.xlane.f32.xlu0 %v798_v8 }
 0x2cb   :  { %860 = vadd.xlane.f32.xlu1 %v799_v10 }
 0x2cd   :  { %766 = vadd.xlane.f32.xlu0 %v2397_v57 }
 0x2cf   :  { %768 = vadd.xlane.f32.xlu1 %v2403_v14 }
 0x2d1   :  { %862 = vadd.xlane.f32.xlu0 %v800_v11 }
 0x2d3   :  { %864 = vadd.xlane.f32.xlu1 %v801_v12 }
 0x2e2   :  { %v709_v53 = vpop.xlane.xlu0 %708 }
 0x2e3   :  { %v867_v35 = vmul.f32 0.03125, %v709_v53 }
 0x2e4   :  { %v805_v36 = vpop.xlane.xlu1 %804 }
 0x2e5   :  { %v931_v37 = vmul.f32 %v867_v35, %v867_v35  ;;  %v899_v54 = vmul.f32 0.03125, %v805_v36 }
 0x2e6   :  { %v707_v23 = vpop.xlane.xlu0 %706 }
 0x2e7   :  { %v963_v13 = vsub.f32 %v899_v54, %v931_v37  ;;  %v866_v38 = vmul.f32 0.03125, %v707_v23  ;;  %v1091_v37 = vsub.f32 %v2159_v25, %v867_v35 }
 0x2e8   :  { %v713_v40 = vpop.xlane.xlu1 %712 }
 0x2e9   :  { %v995_v46 = vmax.f32 %v963_v13, 0.0  ;;  %v930_v19 = vmul.f32 %v866_v38, %v866_v38  ;;  %v2411_v60 = vmul.f32 0.03125, %v713_v40  ;;  %v2424_v40 = vld [vmem:[#allocation11] ss:$0 sm:$0xff] }
 0x2ea   :  { %v803_v55 = vpop.xlane.xlu0 %802 }
 0x2eb   :  { %v1027_v59 = vadd.f32 1e-05, %v995_v46  ;;  %v898_v50 = vmul.f32 0.03125, %v803_v55  ;;  %v933_v3 = vmul.f32 %v2411_v60, %v2411_v60 }
 0x2ec   :  { %v711_v22 = vpop.xlane.xlu1 %710 }
 0x2ed   :  { %1618 = vrsqrt.f32 %v1027_v59  ;;  %v962_v21 = vsub.f32 %v898_v50, %v930_v19  ;;  %v2413_v29 = vmul.f32 0.03125, %v711_v22  ;;  %v2428_v22 = vld [vmem:[#allocation13] ss:$0 sm:$0xff] }
 0x2ee   :  { %v807_v28 = vpop.xlane.xlu0 %806 }
 0x2ef   :  { %v994_v63 = vmax.f32 %v962_v21, 0.0  ;;  %v932_v0 = vmul.f32 %v2413_v29, %v2413_v29  ;;  %v900_v1 = vmul.f32 0.03125, %v807_v28 }
 0x2f0   :  { %v809_v2 = vpop.xlane.xlu1 %808 }
 0x2f1   :  { %v1026_v4 = vadd.f32 1e-05, %v994_v63  ;;  %v964_v5 = vsub.f32 %v900_v1, %v932_v0  ;;  %v901_v6 = vmul.f32 0.03125, %v809_v2 }
 0x2f2   :  { %v715_v7 = vpop.xlane.xlu0 %714 }
 0x2f3   :  { %1620 = vrsqrt.f32 %v1026_v4  ;;  %v996_v8 = vmax.f32 %v964_v5, 0.0  ;;  %v965_v10 = vsub.f32 %v901_v6, %v933_v3  ;;  %v2419_v11 = vmul.f32 0.03125, %v715_v7 }
 0x2f4   :  { %v717_v12 = vpop.xlane.xlu1 %716  ;;  %v1090_v4 = vsub.f32 %v2167_v30, %v866_v38  ;;  %v1092_v30 = vsub.f32 %v2175_v34, %v2413_v29 }
 0x2f5   :  { %v1028_v53 = vadd.f32 1e-05, %v996_v8  ;;  %v997_v36 = vmax.f32 %v965_v10, 0.0  ;;  %v2422_v54 = vmul.f32 0.03125, %v717_v12  ;;  %v934_v55 = vmul.f32 %v2419_v11, %v2419_v11 }
 0x2f6   :  { %v811_v23 = vpop.xlane.xlu0 %810 }
 0x2f7   :  { %v1619_v13 = vpop.eup %1618  ;;  %1622 = vrsqrt.f32 %v1028_v53  ;;  %v1029_v46 = vadd.f32 1e-05, %v997_v36  ;;  %v902_v59 = vmul.f32 0.03125, %v811_v23  ;;  %v935_v25 = vmul.f32 %v2422_v54, %v2422_v54 }
 0x2f8   :  { %v1123_v19 = vmul.f32 %v1619_v13, %v1091_v37  ;;  %v813_v50 = vpop.xlane.xlu1 %812 }
 0x2f9   :  { %1624 = vrsqrt.f32 %v1029_v46  ;;  %v966_v35 = vsub.f32 %v902_v59, %v934_v55  ;;  %v903_v21 = vmul.f32 0.03125, %v813_v50  ;;  %v1093_v50 = vsub.f32 %v2171_v42, %v2411_v60 }
 0x2fa   :  { %v1162_v28 = vmul.f32 %v2424_v40, %v1123_v19  ;;  %v719_v63 = vpop.xlane.xlu0 %718 }
 0x2fb   :  { %v998_v0 = vmax.f32 %v966_v35, 0.0  ;;  %v967_v1 = vsub.f32 %v903_v21, %v935_v25  ;;  %v2433_v2 = vmul.f32 0.03125, %v719_v63 }
 0x2fc   :  { %v1201_v3 = vadd.f32 %v2428_v22, %v1162_v28  ;;  %v721_v5 = vpop.xlane.xlu1 %720 }
 0x2fd   :  { %v1621_v6 = vpop.eup %1620  ;;  %v1030_v7 = vadd.f32 1e-05, %v998_v0  ;;  %v999_v8 = vmax.f32 %v967_v1, 0.0  ;;  %v2437_v12 = vmul.f32 0.03125, %v721_v5  ;;  %v936_v37 = vmul.f32 %v2433_v2, %v2433_v2 }
 0x2fe   :  { %1233 = vst [vmem:[#allocation14 + $0x8] sm:$0xff] %v1201_v3  ;;  %v1122_v10 = vmul.f32 %v1621_v6, %v1090_v4  ;;  %v815_v53 = vpop.xlane.xlu0 %814 }
 0x2ff   :  { %1626 = vrsqrt.f32 %v1030_v7  ;;  %v1031_v36 = vadd.f32 1e-05, %v999_v8  ;;  %v904_v23 = vmul.f32 0.03125, %v815_v53  ;;  %v937_v55 = vmul.f32 %v2437_v12, %v2437_v12 }
 0x300   :  { %v1161_v13 = vmul.f32 %v2424_v40, %v1122_v10  ;;  %v817_v38 = vpop.xlane.xlu1 %816 }
 0x301   :  { %v1623_v46 = vpop.eup %1622  ;;  %1628 = vrsqrt.f32 %v1031_v36  ;;  %v968_v59 = vsub.f32 %v904_v23, %v936_v37  ;;  %v905_v19 = vmul.f32 0.03125, %v817_v38  ;;  %v1094_v37 = vsub.f32 %v2186_v43, %v2419_v11 }
 0x302   :  { %v1200_v25 = vadd.f32 %v2428_v22, %v1161_v13  ;;  %v1124_v35 = vmul.f32 %v1623_v46, %v1092_v30  ;;  %v723_v21 = vpop.xlane.xlu0 %722 }
 0x303   :  { %v1625_v28 = vpop.eup %1624  ;;  %v1000_v63 = vmax.f32 %v968_v59, 0.0  ;;  %v969_v0 = vsub.f32 %v905_v19, %v937_v55  ;;  %v2449_v1 = vmul.f32 0.03125, %v723_v21  ;;  %v1095_v55 = vsub.f32 %v2191_v45, %v2422_v54 }
 0x304   :  { %1232 = vst [vmem:[#allocation14] sm:$0xff] %v1200_v25  ;;  %v1163_v34 = vmul.f32 %v2424_v40, %v1124_v35  ;;  %v1125_v29 = vmul.f32 %v1625_v28, %v1093_v50  ;;  %v725_v3 = vpop.xlane.xlu1 %724 }
 0x305   :  { %v1032_v4 = vadd.f32 1e-05, %v1000_v63  ;;  %v1001_v5 = vmax.f32 %v969_v0, 0.0  ;;  %v2454_v60 = vmul.f32 0.03125, %v725_v3  ;;  %v938_v10 = vmul.f32 %v2449_v1, %v2449_v1 }
 0x306   :  { %v1202_v6 = vadd.f32 %v2428_v22, %v1163_v34  ;;  %v1164_v42 = vmul.f32 %v2424_v40, %v1125_v29  ;;  %v819_v7 = vpop.xlane.xlu0 %818 }
 0x307   :  { %1630 = vrsqrt.f32 %v1032_v4  ;;  %v1033_v8 = vadd.f32 1e-05, %v1001_v5  ;;  %v906_v53 = vmul.f32 0.03125, %v819_v7  ;;  %v939_v30 = vmul.f32 %v2454_v60, %v2454_v60 }
 0x308   :  { %1234 = vst [vmem:[#allocation14 + $0x10] sm:$0xff] %v1202_v6  ;;  %v1203_v36 = vadd.f32 %v2428_v22, %v1164_v42  ;;  %v821_v23 = vpop.xlane.xlu1 %820  ;;  %v1096_v42 = vsub.f32 %v2200_v16, %v2433_v2 }
 0x309   :  { %v1627_v13 = vpop.eup %1626  ;;  %1632 = vrsqrt.f32 %v1033_v8  ;;  %v970_v38 = vsub.f32 %v906_v53, %v938_v10  ;;  %v907_v46 = vmul.f32 0.03125, %v821_v23 }
 0x30a   :  { %1235 = vst [vmem:[#allocation14 + $0x18] sm:$0xff] %v1203_v36  ;;  %v1126_v59 = vmul.f32 %v1627_v13, %v1094_v37  ;;  %v727_v19 = vpop.xlane.xlu0 %726  ;;  %v1097_v37 = vsub.f32 %v2205_v20, %v2437_v12 }
 0x30b   :  { %v1629_v50 = vpop.eup %1628  ;;  %v1002_v25 = vmax.f32 %v970_v38, 0.0  ;;  %v971_v35 = vsub.f32 %v907_v46, %v939_v30  ;;  %v2465_v21 = vmul.f32 0.03125, %v727_v19 }
 0x30c   :  { %v1165_v43 = vmul.f32 %v2424_v40, %v1126_v59  ;;  %v1127_v11 = vmul.f32 %v1629_v50, %v1095_v55  ;;  %v729_v28 = vpop.xlane.xlu1 %728 }
 0x30d   :  { %v1034_v63 = vadd.f32 1e-05, %v1002_v25  ;;  %v1003_v0 = vmax.f32 %v971_v35, 0.0  ;;  %v2470_v3 = vmul.f32 0.03125, %v729_v28  ;;  %v940_v4 = vmul.f32 %v2465_v21, %v2465_v21 }
 0x30e   :  { %v1204_v34 = vadd.f32 %v2428_v22, %v1165_v43  ;;  %v1166_v29 = vmul.f32 %v2424_v40, %v1127_v11  ;;  %v823_v45 = vpop.xlane.xlu0 %822 }
 0x30f   :  { %1634 = vrsqrt.f32 %v1034_v63  ;;  %v1035_v54 = vadd.f32 1e-05, %v1003_v0  ;;  %v908_v5 = vmul.f32 0.03125, %v823_v45  ;;  %v941_v10 = vmul.f32 %v2470_v3, %v2470_v3 }
 0x310   :  { %1236 = vst [vmem:[#allocation14 + $0x20] sm:$0xff] %v1204_v34  ;;  %v1205_v6 = vadd.f32 %v2428_v22, %v1166_v29  ;;  %v825_v7 = vpop.xlane.xlu1 %824  ;;  %v1098_v0 = vsub.f32 %v2214_v27, %v2449_v1 }
 0x311   :  { %v1631_v8 = vpop.eup %1630  ;;  %1636 = vrsqrt.f32 %v1035_v54  ;;  %v972_v53 = vsub.f32 %v908_v5, %v940_v4  ;;  %v909_v36 = vmul.f32 0.03125, %v825_v7  ;;  %v1099_v5 = vsub.f32 %v2225_v32, %v2454_v60 }
 0x312   :  { %1237 = vst [vmem:[#allocation14 + $0x28] sm:$0xff] %v1205_v6  ;;  %v1128_v23 = vmul.f32 %v1631_v8, %v1096_v42  ;;  %v731_v13 = vpop.xlane.xlu0 %730 }
 0x313   :  { %v1633_v30 = vpop.eup %1632  ;;  %v1004_v38 = vmax.f32 %v972_v53, 0.0  ;;  %v973_v46 = vsub.f32 %v909_v36, %v941_v10  ;;  %v2481_v55 = vmul.f32 0.03125, %v731_v13 }
 0x314   :  { %v1167_v16 = vmul.f32 %v2424_v40, %v1128_v23  ;;  %v1129_v2 = vmul.f32 %v1633_v30, %v1097_v37  ;;  %v733_v59 = vpop.xlane.xlu1 %732 }
 0x315   :  { %v1036_v19 = vadd.f32 1e-05, %v1004_v38  ;;  %v1005_v50 = vmax.f32 %v973_v46, 0.0  ;;  %v2486_v43 = vmul.f32 0.03125, %v733_v59  ;;  %v942_v11 = vmul.f32 %v2481_v55, %v2481_v55 }
 0x316   :  { %v1206_v25 = vadd.f32 %v2428_v22, %v1167_v16  ;;  %v1168_v35 = vmul.f32 %v2424_v40, %v1129_v2  ;;  %v827_v20 = vpop.xlane.xlu0 %826  ;;  %v1100_v59 = vsub.f32 %v2240_v47, %v2465_v21 }
 0x317   :  { %1638 = vrsqrt.f32 %v1036_v19  ;;  %v1037_v12 = vadd.f32 1e-05, %v1005_v50  ;;  %v910_v28 = vmul.f32 0.03125, %v827_v20  ;;  %v943_v45 = vmul.f32 %v2486_v43, %v2486_v43 }
 0x318   :  { %1238 = vst [vmem:[#allocation14 + $0x30] sm:$0xff] %v1206_v25  ;;  %v1207_v63 = vadd.f32 %v2428_v22, %v1168_v35  ;;  %v829_v34 = vpop.xlane.xlu1 %828 }
 0x319   :  { %v1635_v29 = vpop.eup %1634  ;;  %1640 = vrsqrt.f32 %v1037_v12  ;;  %v974_v54 = vsub.f32 %v910_v28, %v942_v11  ;;  %v911_v4 = vmul.f32 0.03125, %v829_v34  ;;  %v1101_v12 = vsub.f32 %v2249_v49, %v2470_v3 }
 0x31a   :  { %1239 = vst [vmem:[#allocation14 + $0x38] sm:$0xff] %v1207_v63  ;;  %v1130_v6 = vmul.f32 %v1635_v29, %v1098_v0  ;;  %v735_v42 = vpop.xlane.xlu0 %734 }
 0x31b   :  { %v1637_v7 = vpop.eup %1636  ;;  %v1006_v8 = vmax.f32 %v974_v54, 0.0  ;;  %v975_v10 = vsub.f32 %v911_v4, %v943_v45  ;;  %v2497_v53 = vmul.f32 0.03125, %v735_v42 }
 0x31c   :  { %v1169_v27 = vmul.f32 %v2424_v40, %v1130_v6  ;;  %v1131_v1 = vmul.f32 %v1637_v7, %v1099_v5  ;;  %v737_v36 = vpop.xlane.xlu1 %736 }
 0x31d   :  { %v1038_v37 = vadd.f32 1e-05, %v1006_v8  ;;  %v1007_v23 = vmax.f32 %v975_v10, 0.0  ;;  %v2502_v38 = vmul.f32 0.03125, %v737_v36  ;;  %v944_v46 = vmul.f32 %v2497_v53, %v2497_v53 }
 0x31e   :  { %v1208_v13 = vadd.f32 %v2428_v22, %v1169_v27  ;;  %v1170_v30 = vmul.f32 %v2424_v40, %v1131_v1  ;;  %v831_v32 = vpop.xlane.xlu0 %830  ;;  %v1102_v27 = vsub.f32 %v2262_v56, %v2481_v55 }
 0x31f   :  { %1642 = vrsqrt.f32 %v1038_v37  ;;  %v1039_v60 = vadd.f32 1e-05, %v1007_v23  ;;  %v912_v16 = vmul.f32 0.03125, %v831_v32  ;;  %v945_v25 = vmul.f32 %v2502_v38, %v2502_v38 }
 0x320   :  { %1240 = vst [vmem:[#allocation14 + $0x40] sm:$0xff] %v1208_v13  ;;  %v1209_v2 = vadd.f32 %v2428_v22, %v1170_v30  ;;  %v833_v19 = vpop.xlane.xlu1 %832  ;;  %v1103_v30 = vsub.f32 %v2271_v31, %v2486_v43 }
 0x321   :  { %v1639_v50 = vpop.eup %1638  ;;  %1644 = vrsqrt.f32 %v1039_v60  ;;  %v976_v35 = vsub.f32 %v912_v16, %v944_v46  ;;  %v913_v20 = vmul.f32 0.03125, %v833_v19 }
 0x322   :  { %1241 = vst [vmem:[#allocation14 + $0x48] sm:$0xff] %v1209_v2  ;;  %v1132_v11 = vmul.f32 %v1639_v50, %v1100_v59  ;;  %v739_v28 = vpop.xlane.xlu0 %738 }
 0x323   :  { %v1641_v63 = vpop.eup %1640  ;;  %v1008_v0 = vmax.f32 %v976_v35, 0.0  ;;  %v977_v34 = vsub.f32 %v913_v20, %v945_v25  ;;  %v2513_v29 = vmul.f32 0.03125, %v739_v28 }
 0x324   :  { %v1171_v47 = vmul.f32 %v2424_v40, %v1132_v11  ;;  %v1133_v21 = vmul.f32 %v1641_v63, %v1101_v12  ;;  %v741_v45 = vpop.xlane.xlu1 %740 }
 0x325   :  { %v1040_v54 = vadd.f32 1e-05, %v1008_v0  ;;  %v1009_v4 = vmax.f32 %v977_v34, 0.0  ;;  %v2518_v42 = vmul.f32 0.03125, %v741_v45  ;;  %v946_v7 = vmul.f32 %v2513_v29, %v2513_v29 }
 0x326   :  { %v1210_v5 = vadd.f32 %v2428_v22, %v1171_v47  ;;  %v1172_v6 = vmul.f32 %v2424_v40, %v1133_v21  ;;  %v835_v49 = vpop.xlane.xlu0 %834  ;;  %v1104_v0 = vsub.f32 %v2284_v58, %v2497_v53 }
 0x327   :  { %1646 = vrsqrt.f32 %v1040_v54  ;;  %v1041_v3 = vadd.f32 1e-05, %v1009_v4  ;;  %v914_v8 = vmul.f32 0.03125, %v835_v49  ;;  %v947_v37 = vmul.f32 %v2518_v42, %v2518_v42 }
 0x328   :  { %1242 = vst [vmem:[#allocation14 + $0x50] sm:$0xff] %v1210_v5  ;;  %v1211_v10 = vadd.f32 %v2428_v22, %v1172_v6  ;;  %v837_v1 = vpop.xlane.xlu1 %836  ;;  %v1105_v4 = vsub.f32 %v2293_v48, %v2502_v38 }
 0x329   :  { %v1643_v36 = vpop.eup %1642  ;;  %1648 = vrsqrt.f32 %v1041_v3  ;;  %v978_v23 = vsub.f32 %v914_v8, %v946_v7  ;;  %v915_v13 = vmul.f32 0.03125, %v837_v1 }
 0x32a   :  { %1243 = vst [vmem:[#allocation14 + $0x58] sm:$0xff] %v1211_v10  ;;  %v1134_v32 = vmul.f32 %v1643_v36, %v1102_v27  ;;  %v743_v60 = vpop.xlane.xlu0 %742 }
 0x32b   :  { %v1645_v46 = vpop.eup %1644  ;;  %v1010_v16 = vmax.f32 %v978_v23, 0.0  ;;  %v979_v2 = vsub.f32 %v915_v13, %v947_v37  ;;  %v2529_v59 = vmul.f32 0.03125, %v743_v60  ;;  %v1106_v60 = vsub.f32 %v2305_v51, %v2513_v29 }
 0x32c   :  { %v1173_v56 = vmul.f32 %v2424_v40, %v1134_v32  ;;  %v1135_v55 = vmul.f32 %v1645_v46, %v1103_v30  ;;  %v745_v19 = vpop.xlane.xlu1 %744 }
 0x32d   :  { %v1042_v50 = vadd.f32 1e-05, %v1010_v16  ;;  %v1011_v25 = vmax.f32 %v979_v2, 0.0  ;;  %v2534_v12 = vmul.f32 0.03125, %v745_v19  ;;  %v948_v11 = vmul.f32 %v2529_v59, %v2529_v59 }
 0x32e   :  { %v1212_v35 = vadd.f32 %v2428_v22, %v1173_v56  ;;  %v1174_v20 = vmul.f32 %v2424_v40, %v1135_v55  ;;  %v839_v31 = vpop.xlane.xlu0 %838  ;;  %v1107_v19 = vsub.f32 %v2311_v18, %v2518_v42 }
 0x32f   :  { %1650 = vrsqrt.f32 %v1042_v50  ;;  %v1043_v43 = vadd.f32 1e-05, %v1011_v25  ;;  %v916_v28 = vmul.f32 0.03125, %v839_v31  ;;  %v949_v21 = vmul.f32 %v2534_v12, %v2534_v12 }
 0x330   :  { %1244 = vst [vmem:[#allocation14 + $0x60] sm:$0xff] %v1212_v35  ;;  %v1213_v63 = vadd.f32 %v2428_v22, %v1174_v20  ;;  %v841_v34 = vpop.xlane.xlu1 %840 }
 0x331   :  { %v1647_v47 = vpop.eup %1646  ;;  %1652 = vrsqrt.f32 %v1043_v43  ;;  %v980_v45 = vsub.f32 %v916_v28, %v948_v11  ;;  %v917_v54 = vmul.f32 0.03125, %v841_v34 }
 0x332   :  { %1245 = vst [vmem:[#allocation14 + $0x68] sm:$0xff] %v1213_v63  ;;  %v1136_v5 = vmul.f32 %v1647_v47, %v1104_v0  ;;  %v747_v6 = vpop.xlane.xlu0 %746 }
 0x333   :  { %v1649_v49 = vpop.eup %1648  ;;  %v1012_v3 = vmax.f32 %v980_v45, 0.0  ;;  %v981_v7 = vsub.f32 %v917_v54, %v949_v21  ;;  %v2545_v8 = vmul.f32 0.03125, %v747_v6 }
 0x334   :  { %v1175_v58 = vmul.f32 %v2424_v40, %v1136_v5  ;;  %v1137_v53 = vmul.f32 %v1649_v49, %v1105_v4  ;;  %v749_v10 = vpop.xlane.xlu1 %748  ;;  %v1108_v4 = vsub.f32 %v2319_v61, %v2529_v59 }
 0x335   :  { %v1044_v27 = vadd.f32 1e-05, %v1012_v3  ;;  %v1013_v1 = vmax.f32 %v981_v7, 0.0  ;;  %v2550_v23 = vmul.f32 0.03125, %v749_v10  ;;  %v950_v13 = vmul.f32 %v2545_v8, %v2545_v8 }
 0x336   :  { %v1214_v36 = vadd.f32 %v2428_v22, %v1175_v58  ;;  %v1176_v37 = vmul.f32 %v2424_v40, %v1137_v53  ;;  %v843_v48 = vpop.xlane.xlu0 %842  ;;  %v1109_v58 = vsub.f32 %v2325_v62, %v2534_v12 }
 0x337   :  { %1654 = vrsqrt.f32 %v1044_v27  ;;  %v1045_v38 = vadd.f32 1e-05, %v1013_v1  ;;  %v918_v30 = vmul.f32 0.03125, %v843_v48  ;;  %v951_v2 = vmul.f32 %v2550_v23, %v2550_v23 }
 0x338   :  { %1246 = vst [vmem:[#allocation14 + $0x70] sm:$0xff] %v1214_v36  ;;  %v1215_v32 = vadd.f32 %v2428_v22, %v1176_v37  ;;  %v845_v46 = vpop.xlane.xlu1 %844 }
 0x339   :  { %v1651_v16 = vpop.eup %1650  ;;  %1656 = vrsqrt.f32 %v1045_v38  ;;  %v982_v56 = vsub.f32 %v918_v30, %v950_v13  ;;  %v919_v55 = vmul.f32 0.03125, %v845_v46 }
 0x33a   :  { %1247 = vst [vmem:[#allocation14 + $0x78] sm:$0xff] %v1215_v32  ;;  %v1138_v50 = vmul.f32 %v1651_v16, %v1106_v60  ;;  %v751_v25 = vpop.xlane.xlu0 %750 }
 0x33b   :  { %v1653_v35 = vpop.eup %1652  ;;  %v1014_v20 = vmax.f32 %v982_v56, 0.0  ;;  %v983_v31 = vsub.f32 %v919_v55, %v951_v2  ;;  %v2561_v43 = vmul.f32 0.03125, %v751_v25  ;;  %v1110_v56 = vsub.f32 %v2332_v26, %v2545_v8 }
 0x33c   :  { %v1177_v51 = vmul.f32 %v2424_v40, %v1138_v50  ;;  %v1139_v29 = vmul.f32 %v1653_v35, %v1107_v19  ;;  %v753_v11 = vpop.xlane.xlu1 %752 }
 0x33d   :  { %v1046_v28 = vadd.f32 1e-05, %v1014_v20  ;;  %v1015_v63 = vmax.f32 %v983_v31, 0.0  ;;  %v2566_v47 = vmul.f32 0.03125, %v753_v11  ;;  %v952_v21 = vmul.f32 %v2561_v43, %v2561_v43 }
 0x33e   :  { %v1216_v0 = vadd.f32 %v2428_v22, %v1177_v51  ;;  %v1178_v34 = vmul.f32 %v2424_v40, %v1139_v29  ;;  %v847_v18 = vpop.xlane.xlu0 %846  ;;  %v1111_v20 = vsub.f32 %v2338_v9, %v2550_v23 }
 0x33f   :  { %1658 = vrsqrt.f32 %v1046_v28  ;;  %v1047_v42 = vadd.f32 1e-05, %v1015_v63  ;;  %v920_v45 = vmul.f32 0.03125, %v847_v18  ;;  %v953_v49 = vmul.f32 %v2566_v47, %v2566_v47 }
 0x340   :  { %1248 = vst [vmem:[#allocation14 + $0x80] sm:$0xff] %v1216_v0  ;;  %v1217_v54 = vadd.f32 %v2428_v22, %v1178_v34  ;;  %v849_v5 = vpop.xlane.xlu1 %848 }
 0x341   :  { %v1655_v6 = vpop.eup %1654  ;;  %1660 = vrsqrt.f32 %v1047_v42  ;;  %v984_v3 = vsub.f32 %v920_v45, %v952_v21  ;;  %v921_v7 = vmul.f32 0.03125, %v849_v5 }
 0x342   :  { %1249 = vst [vmem:[#allocation14 + $0x88] sm:$0xff] %v1217_v54  ;;  %v1140_v53 = vmul.f32 %v1655_v6, %v1108_v4  ;;  %v755_v10 = vpop.xlane.xlu0 %754  ;;  %v1112_v6 = vsub.f32 %v2345_v33, %v2561_v43 }
 0x343   :  { %v1657_v27 = vpop.eup %1656  ;;  %v1016_v1 = vmax.f32 %v984_v3, 0.0  ;;  %v985_v36 = vsub.f32 %v921_v7, %v953_v49  ;;  %v2577_v37 = vmul.f32 0.03125, %v755_v10  ;;  %v1113_v10 = vsub.f32 %v2351_v41, %v2566_v47 }
 0x344   :  { %v1179_v61 = vmul.f32 %v2424_v40, %v1140_v53  ;;  %v1141_v59 = vmul.f32 %v1657_v27, %v1109_v58  ;;  %v757_v48 = vpop.xlane.xlu1 %756 }
 0x345   :  { %v1048_v38 = vadd.f32 1e-05, %v1016_v1  ;;  %v1017_v13 = vmax.f32 %v985_v36, 0.0  ;;  %v2582_v60 = vmul.f32 0.03125, %v757_v48  ;;  %v954_v46 = vmul.f32 %v2577_v37, %v2577_v37 }
 0x346   :  { %v1218_v30 = vadd.f32 %v2428_v22, %v1179_v61  ;;  %v1180_v32 = vmul.f32 %v2424_v40, %v1141_v59  ;;  %v851_v62 = vpop.xlane.xlu0 %850 }
 0x347   :  { %1662 = vrsqrt.f32 %v1048_v38  ;;  %v1049_v12 = vadd.f32 1e-05, %v1017_v13  ;;  %v922_v16 = vmul.f32 0.03125, %v851_v62  ;;  %v955_v50 = vmul.f32 %v2582_v60, %v2582_v60 }
 0x348   :  { %1250 = vst [vmem:[#allocation14 + $0x90] sm:$0xff] %v1218_v30  ;;  %v1219_v2 = vadd.f32 %v2428_v22, %v1180_v32  ;;  %v853_v55 = vpop.xlane.xlu1 %852 }
 0x349   :  { %v1659_v19 = vpop.eup %1658  ;;  %1664 = vrsqrt.f32 %v1049_v12  ;;  %v986_v25 = vsub.f32 %v922_v16, %v954_v46  ;;  %v923_v35 = vmul.f32 0.03125, %v853_v55 }
 0x34a   :  { %1251 = vst [vmem:[#allocation14 + $0x98] sm:$0xff] %v1219_v2  ;;  %v1142_v31 = vmul.f32 %v1659_v19, %v1110_v56  ;;  %v759_v51 = vpop.xlane.xlu0 %758  ;;  %v1114_v56 = vsub.f32 %v2358_v39, %v2577_v37 }
 0x34b   :  { %v1661_v29 = vpop.eup %1660  ;;  %v1018_v11 = vmax.f32 %v986_v25, 0.0  ;;  %v987_v28 = vsub.f32 %v923_v35, %v955_v50  ;;  %v2593_v63 = vmul.f32 0.03125, %v759_v51 }
 0x34c   :  { %v1181_v26 = vmul.f32 %v2424_v40, %v1142_v31  ;;  %v1143_v8 = vmul.f32 %v1661_v29, %v1111_v20  ;;  %v761_v0 = vpop.xlane.xlu1 %760  ;;  %v1115_v20 = vsub.f32 %v2364_v15, %v2582_v60 }
 0x34d   :  { %v1050_v34 = vadd.f32 1e-05, %v1018_v11  ;;  %v1019_v18 = vmax.f32 %v987_v28, 0.0  ;;  %v2598_v45 = vmul.f32 0.03125, %v761_v0  ;;  %v956_v54 = vmul.f32 %v2593_v63, %v2593_v63 }
 0x34e   :  { %v1220_v42 = vadd.f32 %v2428_v22, %v1181_v26  ;;  %v1182_v21 = vmul.f32 %v2424_v40, %v1143_v8  ;;  %v855_v9 = vpop.xlane.xlu0 %854 }
 0x34f   :  { %1666 = vrsqrt.f32 %v1050_v34  ;;  %v1051_v23 = vadd.f32 1e-05, %v1019_v18  ;;  %v924_v4 = vmul.f32 0.03125, %v855_v9  ;;  %v957_v7 = vmul.f32 %v2598_v45, %v2598_v45 }
 0x350   :  { %1252 = vst [vmem:[#allocation14 + $0xa0] sm:$0xff] %v1220_v42  ;;  %v1221_v5 = vadd.f32 %v2428_v22, %v1182_v21  ;;  %v857_v49 = vpop.xlane.xlu1 %856 }
 0x351   :  { %v1663_v3 = vpop.eup %1662  ;;  %1668 = vrsqrt.f32 %v1051_v23  ;;  %v988_v58 = vsub.f32 %v924_v4, %v956_v54  ;;  %v925_v53 = vmul.f32 0.03125, %v857_v49  ;;  %v1116_v4 = vsub.f32 %v2371_v44, %v2593_v63 }
 0x352   :  { %1253 = vst [vmem:[#allocation14 + $0xa8] sm:$0xff] %v1221_v5  ;;  %v1144_v27 = vmul.f32 %v1663_v3, %v1112_v6  ;;  %v763_v1 = vpop.xlane.xlu0 %762 }
 0x353   :  { %v1665_v36 = vpop.eup %1664  ;;  %v1020_v61 = vmax.f32 %v988_v58, 0.0  ;;  %v989_v59 = vsub.f32 %v925_v53, %v957_v7  ;;  %v2609_v48 = vmul.f32 0.03125, %v763_v1  ;;  %v1117_v58 = vsub.f32 %v2377_v52, %v2598_v45 }
 0x354   :  { %v1183_v33 = vmul.f32 %v2424_v40, %v1144_v27  ;;  %v1145_v43 = vmul.f32 %v1665_v36, %v1113_v10  ;;  %v765_v38 = vpop.xlane.xlu1 %764 }
 0x355   :  { %v1052_v13 = vadd.f32 1e-05, %v1020_v61  ;;  %v1021_v30 = vmax.f32 %v989_v59, 0.0  ;;  %v2614_v12 = vmul.f32 0.03125, %v765_v38  ;;  %v958_v46 = vmul.f32 %v2609_v48, %v2609_v48 }
 0x356   :  { %v1222_v32 = vadd.f32 %v2428_v22, %v1183_v33  ;;  %v1184_v62 = vmul.f32 %v2424_v40, %v1145_v43  ;;  %v859_v41 = vpop.xlane.xlu0 %858  ;;  %v1118_v52 = vsub.f32 %v2384_v24, %v2609_v48 }
 0x357   :  { %1670 = vrsqrt.f32 %v1052_v13  ;;  %v1053_v47 = vadd.f32 1e-05, %v1021_v30  ;;  %v926_v16 = vmul.f32 0.03125, %v859_v41  ;;  %v959_v50 = vmul.f32 %v2614_v12, %v2614_v12 }
 0x358   :  { %1254 = vst [vmem:[#allocation14 + $0xb0] sm:$0xff] %v1222_v32  ;;  %v1223_v2 = vadd.f32 %v2428_v22, %v1184_v62  ;;  %v861_v55 = vpop.xlane.xlu1 %860  ;;  %v1119_v13 = vsub.f32 %v2390_v17, %v2614_v12 }
 0x359   :  { %v1667_v19 = vpop.eup %1666  ;;  %1672 = vrsqrt.f32 %v1053_v47  ;;  %v990_v25 = vsub.f32 %v926_v16, %v958_v46  ;;  %v927_v35 = vmul.f32 0.03125, %v861_v55 }
 0x35a   :  { %1255 = vst [vmem:[#allocation14 + $0xb8] sm:$0xff] %v1223_v2  ;;  %v1146_v31 = vmul.f32 %v1667_v19, %v1114_v56  ;;  %v767_v51 = vpop.xlane.xlu0 %766 }
 0x35b   :  { %v1669_v29 = vpop.eup %1668  ;;  %v1022_v11 = vmax.f32 %v990_v25, 0.0  ;;  %v991_v28 = vsub.f32 %v927_v35, %v959_v50  ;;  %v896_v26 = vmul.f32 0.03125, %v767_v51 }
 0x35c   :  { %v1185_v39 = vmul.f32 %v2424_v40, %v1146_v31  ;;  %v1147_v37 = vmul.f32 %v1669_v29, %v1115_v20  ;;  %v769_v8 = vpop.xlane.xlu1 %768 }
 0x35d   :  { %v1054_v0 = vadd.f32 1e-05, %v1022_v11  ;;  %v1023_v34 = vmax.f32 %v991_v28, 0.0  ;;  %v897_v21 = vmul.f32 0.03125, %v769_v8  ;;  %v960_v60 = vmul.f32 %v896_v26, %v896_v26 }
 0x35e   :  { %v1224_v18 = vadd.f32 %v2428_v22, %v1185_v39  ;;  %v1186_v42 = vmul.f32 %v2424_v40, %v1147_v37  ;;  %v863_v9 = vpop.xlane.xlu0 %862  ;;  %v1120_v24 = vsub.f32 %v2397_v57, %v896_v26 }
 0x35f   :  { %1674 = vrsqrt.f32 %v1054_v0  ;;  %v1055_v15 = vadd.f32 1e-05, %v1023_v34  ;;  %v928_v23 = vmul.f32 0.03125, %v863_v9  ;;  %v961_v49 = vmul.f32 %v897_v21, %v897_v21 }
 0x360   :  { %1256 = vst [vmem:[#allocation14 + $0xc0] sm:$0xff] %v1224_v18  ;;  %v1225_v54 = vadd.f32 %v2428_v22, %v1186_v42  ;;  %v865_v5 = vpop.xlane.xlu1 %864  ;;  %v1121_v2 = vsub.f32 %v2403_v14, %v897_v21 }
 0x361   :  { %v1671_v6 = vpop.eup %1670  ;;  %1676 = vrsqrt.f32 %v1055_v15  ;;  %v992_v3 = vsub.f32 %v928_v23, %v960_v60  ;;  %v929_v7 = vmul.f32 0.03125, %v865_v5 }
 0x362   :  { %1257 = vst [vmem:[#allocation14 + $0xc8] sm:$0xff] %v1225_v54  ;;  %v1148_v53 = vmul.f32 %v1671_v6, %v1116_v4 }
 0x363   :  { %v1673_v10 = vpop.eup %1672  ;;  %v1024_v27 = vmax.f32 %v992_v3, 0.0  ;;  %v993_v1 = vsub.f32 %v929_v7, %v961_v49 }
 0x364   :  { %v1187_v36 = vmul.f32 %v2424_v40, %v1148_v53  ;;  %v1149_v61 = vmul.f32 %v1673_v10, %v1117_v58 }
 0x365   :  { %v1056_v59 = vadd.f32 1e-05, %v1024_v27  ;;  %v1025_v33 = vmax.f32 %v993_v1, 0.0 }
 0x366   :  { %v1226_v44 = vadd.f32 %v2428_v22, %v1187_v36  ;;  %v1188_v63 = vmul.f32 %v2424_v40, %v1149_v61 }
 0x367   :  { %1678 = vrsqrt.f32 %v1056_v59  ;;  %v1057_v43 = vadd.f32 1e-05, %v1025_v33 }
 0x368   :  { %1258 = vst [vmem:[#allocation14 + $0xd0] sm:$0xff] %v1226_v44  ;;  %v1227_v38 = vadd.f32 %v2428_v22, %v1188_v63 }
 0x369   :  { %v1675_v45 = vpop.eup %1674  ;;  %1680 = vrsqrt.f32 %v1057_v43 }
 0x36a   :  { %1259 = vst [vmem:[#allocation14 + $0xd8] sm:$0xff] %v1227_v38  ;;  %v1150_v30 = vmul.f32 %v1675_v45, %v1118_v52 }
 0x36b   :  { %v1677_v32 = vpop.eup %1676 }
 0x36c   :  { %v1189_v62 = vmul.f32 %v2424_v40, %v1150_v30  ;;  %v1151_v41 = vmul.f32 %v1677_v32, %v1119_v13 }
 0x36e   :  { %v1228_v47 = vadd.f32 %v2428_v22, %v1189_v62  ;;  %v1190_v46 = vmul.f32 %v2424_v40, %v1151_v41 }
 0x370   :  { %1260 = vst [vmem:[#allocation14 + $0xe0] sm:$0xff] %v1228_v47  ;;  %v1229_v16 = vadd.f32 %v2428_v22, %v1190_v46 }
 0x371   :  { %v1679_v48 = vpop.eup %1678 }
 0x372   :  { %1261 = vst [vmem:[#allocation14 + $0xe8] sm:$0xff] %v1229_v16  ;;  %v1152_v56 = vmul.f32 %v1679_v48, %v1120_v24 }
 0x373   :  { %v1681_v17 = vpop.eup %1680 }
 0x374   :  { %v1191_v12 = vmul.f32 %v2424_v40, %v1152_v56  ;;  %v1153_v55 = vmul.f32 %v1681_v17, %v1121_v2 }
 0x376   :  { %v1230_v19 = vadd.f32 %v2428_v22, %v1191_v12  ;;  %v1192_v50 = vmul.f32 %v2424_v40, %v1153_v55 }
 0x378   :  { %1262 = vst [vmem:[#allocation14 + $0xf0] sm:$0xff] %v1230_v19  ;;  %v1231_v25 = vadd.f32 %v2428_v22, %v1192_v50 }
 0x37a   :  { %1263 = vst [vmem:[#allocation14 + $0xf8] sm:$0xff] %v1231_v25 }
 0x37b   :  { %1847 = shalt.err (!%p1844_p4)
}
 0x37c   :  { %s1848_s20 = scalar_lea.hbm %s2673_s7, 4096 }
 0x37d   :  { %p1849_p5 = scmp.ne.s32.totalorder %s2673_s7, %s1848_s20  ;;  %p1852_p6 = scmp.lt.u32.totalorder %s1848_s20, %s2673_s7 }
 0x37f   :  { %p1854_p7 = pnand %p1852_p6, %p1849_p5 }
 0x381   :  { %1857 = shalt.err (!%p1854_p7)
}
 0x382   :  { %1275 = dma.vmem_to_hbm [thread:$0]  %s1270_s30, 4096, %s2673_s7, [#allocation4], %s1870_s13, %s1870_s13, %s1871_s14  }
 0x383   :  { %1866 = dma.done.wait [#allocation4], 4096  }
 0x384   :  { %1867 = vsyncadd [#allocation4], 4294963200 }
 0x385   :  { %1279 = vsyncpa [#allocation3], 1 }
 0x386   :  { %1280 = vsyncpa [#allocation6], 1 }
 0x387   :  { %1281 = vsyncpa [#allocation9], 1 }
 0x388   :  { %1282 = vsyncpa [#allocation12], 1 }
 0x389   :  { %1283 = vsyncpa [#allocation4], 1 }

</bundles_post_ra>
